<compile_context>
chip_gen: v7x
topology: tpu7x:2x2x1
jax: 0.10.0
libtpu: 0.0.40
codegen_flags: <defaults>
</compile_context>

<pallas_src>
import functools

import jax
import jax.numpy as jnp
from jax import lax
from jax.experimental import pallas as pl
from jax.experimental.pallas import tpu as pltpu

EXPANSION = 4
BN_EPS = 1e-5
COMPUTE_DTYPE = jnp.bfloat16          # MXU operand dtype (accumulation stays f32)
VMEM_LIMIT_BYTES = 48 * 1024 * 1024   # leaves headroom under v7x's 64 MiB physical VMEM


# ----------------------------------------------------------------------------
# Kernels
# ----------------------------------------------------------------------------
def _conv1_kernel(x_ref, w_ref, h_ref, st_ref):
    """Row-tile: conv1 (1x1) as a matmul + partial BN1 statistics."""
    h = jnp.dot(x_ref[...].astype(COMPUTE_DTYPE), w_ref[...],
                preferred_element_type=jnp.float32)
    h_ref[...] = h
    st_ref[0] = jnp.concatenate(
        [jnp.sum(h, axis=0, keepdims=True),
         jnp.sum(h * h, axis=0, keepdims=True)], axis=0)


def _conv3x3_kernel(h1_ref, a_ref, b_ref, w_ref, h2_ref, st_ref, pad_ref,
                    *, H, W, P):
    """Per-image: folded BN1 affine + ReLU, im2col 3x3 conv (single matmul),
    partial BN2 statistics."""
    cdt = pad_ref.dtype

    # Zero only the 1-pixel halo; the interior is fully overwritten below.
    pad_ref[0:1, :, :] = jnp.zeros((1, W + 2, P), cdt)
    pad_ref[H + 1:H + 2, :, :] = jnp.zeros((1, W + 2, P), cdt)
    pad_ref[:, 0:1, :] = jnp.zeros((H + 2, 1, P), cdt)
    pad_ref[:, W + 1:W + 2, :] = jnp.zeros((H + 2, 1, P), cdt)

    # BN1 (folded affine) + ReLU in f32, then cast once to bf16 for the MXU.
    y = jnp.maximum(h1_ref[0] * a_ref[...] + b_ref[...], 0.0)        # (H*W, P)
    pad_ref[1:H + 1, 1:W + 1, :] = y.astype(cdt).reshape(H, W, P)

    # im2col: one (H*W, 9P) x (9P, P) matmul instead of 9 small-K matmuls.
    cols = [pad_ref[dh:dh + H, dw:dw + W, :].reshape(H * W, P)
            for dh in range(3) for dw in range(3)]
    patches = jnp.concatenate(cols, axis=-1)                          # (H*W, 9P)
    h2 = jnp.dot(patches, w_ref[...], preferred_element_type=jnp.float32)

    h2_ref[0] = h2
    st_ref[0] = jnp.concatenate(
        [jnp.sum(h2, axis=0, keepdims=True),
         jnp.sum(h2 * h2, axis=0, keepdims=True)], axis=0)


def _conv3_kernel(h_ref, a_ref, b_ref, w_ref, o_ref, st_ref):
    """Row-tile: folded BN2 affine + ReLU, conv3 (1x1) matmul, partial BN3 stats."""
    y = jnp.maximum(h_ref[...] * a_ref[...] + b_ref[...], 0.0)
    o = jnp.dot(y.astype(COMPUTE_DTYPE), w_ref[...],
                preferred_element_type=jnp.float32)
    o_ref[...] = o
    st_ref[0] = jnp.concatenate(
        [jnp.sum(o, axis=0, keepdims=True),
         jnp.sum(o * o, axis=0, keepdims=True)], axis=0)


def _bn_add_relu_kernel(h_ref, x_ref, a_ref, b_ref, o_ref):
    """Row-tile: folded BN3 affine + residual add + ReLU (all f32 VPU math)."""
    o_ref[...] = jnp.maximum(h_ref[...] * a_ref[...] + b_ref[...] + x_ref[...], 0.0)


# ----------------------------------------------------------------------------
# Host-side helpers
# ----------------------------------------------------------------------------
def _pick_block_rows(total_rows, target=512):
    """Largest multiple-of-8 divisor of total_rows that is <= target."""
    if total_rows <= target:
        return total_rows
    for cand in range(target - target % 8, 7, -8):
        if total_rows % cand == 0:
            return cand
    return total_rows


def _bn_scale_shift(partial_stats, gamma, beta, count):
    """partial_stats: (tiles, 2, C) per-tile (sum, sum_sq) -> folded affine."""
    tot = jnp.sum(partial_stats, axis=0)                    # (2, C)
    mean = tot[0] / count
    var = jnp.maximum(tot[1] / count - mean * mean, 0.0)    # biased var (training BN)
    scale = gamma.reshape(-1) * lax.rsqrt(var + BN_EPS)
    shift = beta.reshape(-1) - mean * scale
    return scale.reshape(1, -1), shift.reshape(1, -1)


@functools.partial(jax.jit, static_argnames=("block_rows",))
def bottleneck_forward_nhwc(x, params, block_rows=None):
    """Bottleneck forward, NHWC in / NHWC out (preferred composition layout)."""
    N, H, W, Cin = x.shape
    P = params["w1"].shape[1]
    Cout = P * EXPANSION
    assert Cin == Cout, "identity residual requires inplanes == planes*expansion"

    R = N * H * W
    if block_rows is None:
        block_rows = _pick_block_rows(R)
    assert R % block_rows == 0 and (block_rows % 8 == 0 or block_rows == R)
    T = R // block_rows

    x2d = x.reshape(R, Cin)
    w1 = params["w1"].astype(COMPUTE_DTYPE)                     # (Cin, P)
    w2 = params["w2"].reshape(9 * P, P).astype(COMPUTE_DTYPE)   # (9P, P) im2col layout
    w3 = params["w3"].astype(COMPUTE_DTYPE)                     # (P, Cout)

    cparams = pltpu.CompilerParams(dimension_semantics=("parallel",),
                                   vmem_limit_bytes=VMEM_LIMIT_BYTES)

    # ---- stage A: conv1 (1x1) + partial BN1 stats --------------------------
    h1, st1 = pl.pallas_call(
        _conv1_kernel,
        grid=(T,),
        in_specs=[pl.BlockSpec((block_rows, Cin), lambda i: (i, 0)),
                  pl.BlockSpec((Cin, P), lambda i: (0, 0))],
        out_specs=[pl.BlockSpec((block_rows, P), lambda i: (i, 0)),
                   pl.BlockSpec((1, 2, P), lambda i: (i, 0, 0))],
        out_shape=[jax.ShapeDtypeStruct((R, P), jnp.float32),
                   jax.ShapeDtypeStruct((T, 2, P), jnp.float32)],
        compiler_params=cparams,
        cost_estimate=pl.CostEstimate(flops=2 * R * Cin * P, transcendentals=0,
                                      bytes_accessed=4 * R * (Cin + P)),
    )(x2d, w1)
    a1, b1 = _bn_scale_shift(st1, params["g1"], params["b1"], R)

    # ---- stage B: BN1+ReLU -> 3x3 conv (im2col, per image) + BN2 stats -----
    h2, st2 = pl.pallas_call(
        functools.partial(_conv3x3_kernel, H=H, W=W, P=P),
        grid=(N,),
        in_specs=[pl.BlockSpec((1, H * W, P), lambda n: (n, 0, 0)),
                  pl.BlockSpec((1, P), lambda n: (0, 0)),
                  pl.BlockSpec((1, P), lambda n: (0, 0)),
                  pl.BlockSpec((9 * P, P), lambda n: (0, 0))],
        out_specs=[pl.BlockSpec((1, H * W, P), lambda n: (n, 0, 0)),
                   pl.BlockSpec((1, 2, P), lambda n: (n, 0, 0))],
        out_shape=[jax.ShapeDtypeStruct((N, H * W, P), jnp.float32),
                   jax.ShapeDtypeStruct((N, 2, P), jnp.float32)],
        scratch_shapes=[pltpu.VMEM((H + 2, W + 2, P), COMPUTE_DTYPE)],
        compiler_params=cparams,
        cost_estimate=pl.CostEstimate(flops=2 * R * 9 * P * P, transcendentals=0,
                                      bytes_accessed=8 * R * P),
    )(h1.reshape(N, H * W, P), a1, b1, w2)
    a2, b2 = _bn_scale_shift(st2, params["g2"], params["b2"], R)

    # ---- stage C: BN2+ReLU -> conv3 (1x1) + partial BN3 stats --------------
    h3, st3 = pl.pallas_call(
        _conv3_kernel,
        grid=(T,),
        in_specs=[pl.BlockSpec((block_rows, P), lambda i: (i, 0)),
                  pl.BlockSpec((1, P), lambda i: (0, 0)),
                  pl.BlockSpec((1, P), lambda i: (0, 0)),
                  pl.BlockSpec((P, Cout), lambda i: (0, 0))],
        out_specs=[pl.BlockSpec((block_rows, Cout), lambda i: (i, 0)),
                   pl.BlockSpec((1, 2, Cout), lambda i: (i, 0, 0))],
        out_shape=[jax.ShapeDtypeStruct((R, Cout), jnp.float32),
                   jax.ShapeDtypeStruct((T, 2, Cout), jnp.float32)],
        compiler_params=cparams,
        cost_estimate=pl.CostEstimate(flops=2 * R * P * Cout, transcendentals=0,
                                      bytes_accessed=4 * R * (P + Cout)),
    )(h2.reshape(R, P), a2, b2, w3)
    a3, b3 = _bn_scale_shift(st3, params["g3"], params["b3"], R)

    # ---- stage D: BN3 + residual + ReLU (output aliased onto h3) -----------
    out2d = pl.pallas_call(
        _bn_add_relu_kernel,
        grid=(T,),
        in_specs=[pl.BlockSpec((block_rows, Cout), lambda i: (i, 0)),
                  pl.BlockSpec((block_rows, Cout), lambda i: (i, 0)),
                  pl.BlockSpec((1, Cout), lambda i: (0, 0)),
                  pl.BlockSpec((1, Cout), lambda i: (0, 0))],
        out_specs=pl.BlockSpec((block_rows, Cout), lambda i: (i, 0)),
        out_shape=jax.ShapeDtypeStruct((R, Cout), jnp.float32),
        input_output_aliases={0: 0},
        compiler_params=cparams,
        cost_estimate=pl.CostEstimate(flops=3 * R * Cout, transcendentals=0,
                                      bytes_accessed=12 * R * Cout),
    )(h3, x2d, a3, b3)

    return out2d.reshape(N, H, W, Cout)


def bottleneck_forward(x_nchw, params, block_rows=None):
    """PyTorch-layout wrapper (NCHW in / NCHW out).  In a full network keep
    activations NHWC end-to-end and call bottleneck_forward_nhwc directly."""
    x_nhwc = jnp.transpose(x_nchw, (0, 2, 3, 1))
    out = bottleneck_forward_nhwc(x_nhwc, params, block_rows=block_rows)
    return jnp.transpose(out, (0, 3, 1, 2))


# ----------------------------------------------------------------------------
# Parameters + pure-JAX reference
# ----------------------------------------------------------------------------
def make_params(key, inplanes, planes):
    """Deterministic synthetic parameters (shapes match the PyTorch module)."""
    ks = jax.random.split(key, 9)
    w1_t = jax.random.normal(ks[0], (planes, inplanes, 1, 1), jnp.float32) * 0.1
    w2_t = jax.random.normal(ks[1], (planes, planes, 3, 3), jnp.float32) * 0.1
    w3_t = jax.random.normal(ks[2], (planes * EXPANSION, planes, 1, 1), jnp.float32) * 0.1
    return {
        "w1": jnp.transpose(w1_t[:, :, 0, 0], (1, 0)),          # (Cin, P)
        "w2": jnp.transpose(w2_t, (2, 3, 1, 0)),                 # (3, 3, P, P)  HWIO
        "w3": jnp.transpose(w3_t[:, :, 0, 0], (1, 0)),           # (P, 4P)
        "g1": jax.random.normal(ks[3], (1, planes), jnp.float32) * 0.1 + 1.0,
        "b1": jax.random.normal(ks[4], (1, planes), jnp.float32) * 0.1,
        "g2": jax.random.normal(ks[5], (1, planes), jnp.float32) * 0.1 + 1.0,
        "b2": jax.random.normal(ks[6], (1, planes), jnp.float32) * 0.1,
        "g3": jax.random.normal(ks[7], (1, planes * EXPANSION), jnp.float32) * 0.1 + 1.0,
        "b3": jax.random.normal(ks[8], (1, planes * EXPANSION), jnp.float32) * 0.1,
    }


def bottleneck_reference(x_nchw, params, matmul_dtype=jnp.float32):
    """Pure-JAX reference.  matmul_dtype lets us mirror the kernel's bf16 MXU
    operands for a tight correctness check (BN / residual stay f32)."""
    x = jnp.transpose(x_nchw, (0, 2, 3, 1))
    cd = matmul_dtype

    def bn(h, g, b, relu=True):
        m = jnp.mean(h, axis=(0, 1, 2), keepdims=True)
        v = jnp.mean((h - m) ** 2, axis=(0, 1, 2), keepdims=True)
        y = (h - m) * lax.rsqrt(v + BN_EPS) * g.reshape(1, 1, 1, -1) + b.reshape(1, 1, 1, -1)
        return jnp.maximum(y, 0.0) if relu else y

    h1 = jnp.einsum("nhwc,cp->nhwp", x.astype(cd), params["w1"].astype(cd),
                    preferred_element_type=jnp.float32)
    h1 = bn(h1, params["g1"], params["b1"])
    h2 = lax.conv_general_dilated(
        h1.astype(cd), params["w2"].astype(cd), window_strides=(1, 1), padding="SAME",
        dimension_numbers=("NHWC", "HWIO", "NHWC"),
        preferred_element_type=jnp.float32)
    h2 = bn(h2, params["g2"], params["b2"])
    h3 = jnp.einsum("nhwp,pq->nhwq", h2.astype(cd), params["w3"].astype(cd),
                    preferred_element_type=jnp.float32)
    h3 = bn(h3, params["g3"], params["b3"], relu=False)
    out = jnp.maximum(h3 + x, 0.0)
    return jnp.transpose(out, (0, 3, 1, 2))


if __name__ == "__main__":
    # small shapes consistent with the module: planes=4 -> inplanes = 4*4 = 16
    N, planes, H, W = 2, 4, 16, 16
    inplanes = planes * EXPANSION

    key = jax.random.PRNGKey(0)
    kx, kp = jax.random.split(key)
    x = jax.random.normal(kx, (N, inplanes, H, W), jnp.float32)
    params = make_params(kp, inplanes, planes)

    # block_rows=128 -> row grid of 4 tiles (exercises the tiled pipeline).
    out = bottleneck_forward(x, params, block_rows=128)
    out = jax.block_until_ready(out)
    assert out.shape == (N, inplanes, H, W)

    # Tight check vs a reference using the same bf16 matmul operands.
    ref_bf16 = bottleneck_reference(x, params, matmul_dtype=COMPUTE_DTYPE)
    assert jnp.allclose(out, ref_bf16, atol=2e-2, rtol=2e-2), \
        "mismatch vs bf16-matched reference"

    # Loose sanity check vs the full-f32 reference (difference is bf16 MXU rounding).
    ref_f32 = bottleneck_reference(x, params, matmul_dtype=jnp.float32)
    assert jnp.allclose(out, ref_f32, atol=1e-1, rtol=1e-1), \
        "mismatch vs f32 reference"

    print("KERNEL_OK")
</pallas_src>

<mosaic_0001>
module attributes {stable_mosaic.version = 11 : i64} {
  func.func @_conv1_kernel(%arg0: i32, %arg1: memref<128x16xf32, #tpu.memory_space<vmem>>, %arg2: memref<16x4xbf16, #tpu.memory_space<vmem>>, %arg3: memref<128x4xf32, #tpu.memory_space<vmem>>, %arg4: memref<1x2x4xf32, #tpu.memory_space<vmem>>) attributes {dimension_semantics = [#tpu.dimension_semantics<parallel>], iteration_bounds = array<i64: 4>, scalar_prefetch = 0 : i64, scratch_operands = 0 : i64, tpu.core_type = #tpu.core_type<tc>, window_params = [{transform_indices = @transform_0, window_bounds = array<i64: 128, 16>}, {pipeline_mode = #tpu.pipeline_mode<synchronous>, transform_indices = @transform_1, window_bounds = array<i64: 16, 4>}, {transform_indices = @transform_2, window_bounds = array<i64: 128, 4>}, {transform_indices = @transform_3, window_bounds = array<i64: 1, 2, 4>}]} {
    %c0 = arith.constant 0 : index
    %c0_0 = arith.constant 0 : index
    %0 = vector.load %arg1[%c0, %c0_0] : memref<128x16xf32, #tpu.memory_space<vmem>>, vector<128x16xf32>
    %1 = arith.truncf %0 : vector<128x16xf32> to vector<128x16xbf16>
    %c0_1 = arith.constant 0 : index
    %c0_2 = arith.constant 0 : index
    %2 = vector.load %arg2[%c0_1, %c0_2] : memref<16x4xbf16, #tpu.memory_space<vmem>>, vector<16x4xbf16>
    %cst = arith.constant dense<0.000000e+00> : vector<128x4xf32>
    %3 = tpu.matmul %1, %2, %cst {dimension_numbers = #tpu.dot_dimension_numbers<[1], [0], [0], [1], [0, 0, 1, 1], [], []>} : vector<128x16xbf16>, vector<16x4xbf16>, vector<128x4xf32> -> vector<128x4xf32>
    %c0_3 = arith.constant 0 : index
    %c0_4 = arith.constant 0 : index
    %4 = vector.load %arg3[%c0_3, %c0_4] : memref<128x4xf32, #tpu.memory_space<vmem>>, vector<128x4xf32>
    tpu.vector_store %arg3[%c0_3, %c0_4], %3 {strides = array<i32>} : memref<128x4xf32, #tpu.memory_space<vmem>>, vector<128x4xf32>,
    %cst_5 = arith.constant dense<0.000000e+00> : vector<4xf32>
    %5 = vector.multi_reduction <add>, %3, %cst_5 [0] : vector<128x4xf32> to vector<4xf32>
    %6 = vector.shape_cast %5 : vector<4xf32> to vector<1x4xf32>
    %7 = arith.mulf %3, %3 : vector<128x4xf32>
    %cst_6 = arith.constant dense<0.000000e+00> : vector<4xf32>
    %8 = vector.multi_reduction <add>, %7, %cst_6 [0] : vector<128x4xf32> to vector<4xf32>
    %9 = vector.shape_cast %8 : vector<4xf32> to vector<1x4xf32>
    %10 = tpu.concatenate %6, %9 in 0 : vector<1x4xf32>, vector<1x4xf32> -> vector<2x4xf32>
    %c0_7 = arith.constant 0 : index
    %c0_8 = arith.constant 0 : index
    %c0_9 = arith.constant 0 : index
    %11 = vector.load %arg4[%c0_7, %c0_8, %c0_9] : memref<1x2x4xf32, #tpu.memory_space<vmem>>, vector<1x2x4xf32>
    %12 = vector.shape_cast %11 : vector<1x2x4xf32> to vector<2x4xf32>
    %13 = vector.shape_cast %10 : vector<2x4xf32> to vector<1x2x4xf32>
    tpu.vector_store %arg4[%c0_7, %c0_8, %c0_9], %13 {strides = array<i32>} : memref<1x2x4xf32, #tpu.memory_space<vmem>>, vector<1x2x4xf32>,
    return
  }
  func.func @transform_0(%arg0: i32) -> (i32, i32) {
    %c0_i32 = arith.constant 0 : i32
    %c0_i32_0 = arith.constant 0 : i32
    return %arg0, %c0_i32 : i32, i32
  }
  func.func @transform_1(%arg0: i32) -> (i32, i32) {
    %c0_i32 = arith.constant 0 : i32
    %c0_i32_0 = arith.constant 0 : i32
    %c0_i32_1 = arith.constant 0 : i32
    return %c0_i32, %c0_i32_0 : i32, i32
  }
  func.func @transform_2(%arg0: i32) -> (i32, i32) {
    %c0_i32 = arith.constant 0 : i32
    %c0_i32_0 = arith.constant 0 : i32
    return %arg0, %c0_i32 : i32, i32
  }
  func.func @transform_3(%arg0: i32) -> (i32, i32, i32) {
    %c0_i32 = arith.constant 0 : i32
    %c0_i32_0 = arith.constant 0 : i32
    %c0_i32_1 = arith.constant 0 : i32
    return %arg0, %c0_i32, %c0_i32_0 : i32, i32, i32
  }
}

module attributes {stable_mosaic.version = 11 : i64} {
  func.func @_conv3x3_kernel(%arg0: i32, %arg1: memref<1x256x4xf32, #tpu.memory_space<vmem>>, %arg2: memref<1x4xf32, #tpu.memory_space<vmem>>, %arg3: memref<1x4xf32, #tpu.memory_space<vmem>>, %arg4: memref<36x4xbf16, #tpu.memory_space<vmem>>, %arg5: memref<1x256x4xf32, #tpu.memory_space<vmem>>, %arg6: memref<1x2x4xf32, #tpu.memory_space<vmem>>, %arg7: memref<18x18x4xbf16, #tpu.memory_space<vmem>>) attributes {dimension_semantics = [#tpu.dimension_semantics<parallel>], iteration_bounds = array<i64: 2>, scalar_prefetch = 0 : i64, scratch_operands = 1 : i64, tpu.core_type = #tpu.core_type<tc>, window_params = [{transform_indices = @transform_0, window_bounds = array<i64: 1, 256, 4>}, {pipeline_mode = #tpu.pipeline_mode<synchronous>, transform_indices = @transform_1, window_bounds = array<i64: 1, 4>}, {pipeline_mode = #tpu.pipeline_mode<synchronous>, transform_indices = @transform_2, window_bounds = array<i64: 1, 4>}, {pipeline_mode = #tpu.pipeline_mode<synchronous>, transform_indices = @transform_3, window_bounds = array<i64: 36, 4>}, {transform_indices = @transform_4, window_bounds = array<i64: 1, 256, 4>}, {transform_indices = @transform_5, window_bounds = array<i64: 1, 2, 4>}]} {
    %cst = arith.constant 0.000000e+00 : bf16
    %0 = vector.broadcast %cst : bf16 to vector<1x18x4xbf16>
    %c0 = arith.constant 0 : index
    %c0_0 = arith.constant 0 : index
    %c0_1 = arith.constant 0 : index
    %1 = vector.load %arg7[%c0, %c0_0, %c0_1] : memref<18x18x4xbf16, #tpu.memory_space<vmem>>, vector<1x18x4xbf16>
    tpu.vector_store %arg7[%c0, %c0_0, %c0_1], %0 {strides = array<i32>} : memref<18x18x4xbf16, #tpu.memory_space<vmem>>, vector<1x18x4xbf16>,
    %cst_2 = arith.constant 0.000000e+00 : bf16
    %2 = vector.broadcast %cst_2 : bf16 to vector<1x18x4xbf16>
    %c17 = arith.constant 17 : index
    %c0_3 = arith.constant 0 : index
    %c0_4 = arith.constant 0 : index
    %3 = vector.load %arg7[%c17, %c0_3, %c0_4] : memref<18x18x4xbf16, #tpu.memory_space<vmem>>, vector<1x18x4xbf16>
    tpu.vector_store %arg7[%c17, %c0_3, %c0_4], %2 {strides = array<i32>} : memref<18x18x4xbf16, #tpu.memory_space<vmem>>, vector<1x18x4xbf16>,
    %cst_5 = arith.constant 0.000000e+00 : bf16
    %4 = vector.broadcast %cst_5 : bf16 to vector<18x1x4xbf16>
    %c0_6 = arith.constant 0 : index
    %c0_7 = arith.constant 0 : index
    %c0_8 = arith.constant 0 : index
    %5 = vector.load %arg7[%c0_6, %c0_7, %c0_8] : memref<18x18x4xbf16, #tpu.memory_space<vmem>>, vector<18x1x4xbf16>
    tpu.vector_store %arg7[%c0_6, %c0_7, %c0_8], %4 {strides = array<i32>} : memref<18x18x4xbf16, #tpu.memory_space<vmem>>, vector<18x1x4xbf16>,
    %cst_9 = arith.constant 0.000000e+00 : bf16
    %6 = vector.broadcast %cst_9 : bf16 to vector<18x1x4xbf16>
    %c0_10 = arith.constant 0 : index
    %c17_11 = arith.constant 17 : index
    %c0_12 = arith.constant 0 : index
    %7 = vector.load %arg7[%c0_10, %c17_11, %c0_12] : memref<18x18x4xbf16, #tpu.memory_space<vmem>>, vector<18x1x4xbf16>
    tpu.vector_store %arg7[%c0_10, %c17_11, %c0_12], %6 {strides = array<i32>} : memref<18x18x4xbf16, #tpu.memory_space<vmem>>, vector<18x1x4xbf16>,
    %c0_13 = arith.constant 0 : index
    %c0_14 = arith.constant 0 : index
    %c0_15 = arith.constant 0 : index
    %8 = vector.load %arg1[%c0_13, %c0_14, %c0_15] : memref<1x256x4xf32, #tpu.memory_space<vmem>>, vector<1x256x4xf32>
    %9 = vector.shape_cast %8 : vector<1x256x4xf32> to vector<256x4xf32>
    %c0_16 = arith.constant 0 : index
    %c0_17 = arith.constant 0 : index
    %10 = vector.load %arg2[%c0_16, %c0_17] : memref<1x4xf32, #tpu.memory_space<vmem>>, vector<1x4xf32>
    %11 = vector.broadcast %10 : vector<1x4xf32> to vector<256x4xf32>
    %12 = arith.mulf %9, %11 : vector<256x4xf32>
    %c0_18 = arith.constant 0 : index
    %c0_19 = arith.constant 0 : index
    %13 = vector.load %arg3[%c0_18, %c0_19] : memref<1x4xf32, #tpu.memory_space<vmem>>, vector<1x4xf32>
    %14 = vector.broadcast %13 : vector<1x4xf32> to vector<256x4xf32>
    %15 = arith.addf %12, %14 : vector<256x4xf32>
    %cst_20 = arith.constant 0.000000e+00 : f32
    %16 = vector.broadcast %cst_20 : f32 to vector<256x4xf32>
    %17 = arith.maximumf %15, %16 : vector<256x4xf32>
    %18 = arith.truncf %17 : vector<256x4xf32> to vector<256x4xbf16>
    %19 = vector.shape_cast %18 : vector<256x4xbf16> to vector<16x16x4xbf16>
    %c1 = arith.constant 1 : index
    %c1_21 = arith.constant 1 : index
    %c0_22 = arith.constant 0 : index
    %20 = vector.load %arg7[%c1, %c1_21, %c0_22] : memref<18x18x4xbf16, #tpu.memory_space<vmem>>, vector<16x16x4xbf16>
    tpu.vector_store %arg7[%c1, %c1_21, %c0_22], %19 {strides = array<i32>} : memref<18x18x4xbf16, #tpu.memory_space<vmem>>, vector<16x16x4xbf16>,
    %c0_23 = arith.constant 0 : index
    %c0_24 = arith.constant 0 : index
    %c0_25 = arith.constant 0 : index
    %21 = vector.load %arg7[%c0_23, %c0_24, %c0_25] : memref<18x18x4xbf16, #tpu.memory_space<vmem>>, vector<16x16x4xbf16>
    %22 = vector.shape_cast %21 : vector<16x16x4xbf16> to vector<256x4xbf16>
    %c0_26 = arith.constant 0 : index
    %c1_27 = arith.constant 1 : index
    %c0_28 = arith.constant 0 : index
    %23 = vector.load %arg7[%c0_26, %c1_27, %c0_28] : memref<18x18x4xbf16, #tpu.memory_space<vmem>>, vector<16x16x4xbf16>
    %24 = vector.shape_cast %23 : vector<16x16x4xbf16> to vector<256x4xbf16>
    %c0_29 = arith.constant 0 : index
    %c2 = arith.constant 2 : index
    %c0_30 = arith.constant 0 : index
    %25 = vector.load %arg7[%c0_29, %c2, %c0_30] : memref<18x18x4xbf16, #tpu.memory_space<vmem>>, vector<16x16x4xbf16>
    %26 = vector.shape_cast %25 : vector<16x16x4xbf16> to vector<256x4xbf16>
    %c1_31 = arith.constant 1 : index
    %c0_32 = arith.constant 0 : index
    %c0_33 = arith.constant 0 : index
    %27 = vector.load %arg7[%c1_31, %c0_32, %c0_33] : memref<18x18x4xbf16, #tpu.memory_space<vmem>>, vector<16x16x4xbf16>
    %28 = vector.shape_cast %27 : vector<16x16x4xbf16> to vector<256x4xbf16>
    %c1_34 = arith.constant 1 : index
    %c1_35 = arith.constant 1 : index
    %c0_36 = arith.constant 0 : index
    %29 = vector.load %arg7[%c1_34, %c1_35, %c0_36] : memref<18x18x4xbf16, #tpu.memory_space<vmem>>, vector<16x16x4xbf16>
    %30 = vector.shape_cast %29 : vector<16x16x4xbf16> to vector<256x4xbf16>
    %c1_37 = arith.constant 1 : index
    %c2_38 = arith.constant 2 : index
    %c0_39 = arith.constant 0 : index
    %31 = vector.load %arg7[%c1_37, %c2_38, %c0_39] : memref<18x18x4xbf16, #tpu.memory_space<vmem>>, vector<16x16x4xbf16>
    %32 = vector.shape_cast %31 : vector<16x16x4xbf16> to vector<256x4xbf16>
    %c2_40 = arith.constant 2 : index
    %c0_41 = arith.constant 0 : index
    %c0_42 = arith.constant 0 : index
    %33 = vector.load %arg7[%c2_40, %c0_41, %c0_42] : memref<18x18x4xbf16, #tpu.memory_space<vmem>>, vector<16x16x4xbf16>
    %34 = vector.shape_cast %33 : vector<16x16x4xbf16> to vector<256x4xbf16>
    %c2_43 = arith.constant 2 : index
    %c1_44 = arith.constant 1 : index
    %c0_45 = arith.constant 0 : index
    %35 = vector.load %arg7[%c2_43, %c1_44, %c0_45] : memref<18x18x4xbf16, #tpu.memory_space<vmem>>, vector<16x16x4xbf16>
    %36 = vector.shape_cast %35 : vector<16x16x4xbf16> to vector<256x4xbf16>
    %c2_46 = arith.constant 2 : index
    %c2_47 = arith.constant 2 : index
    %c0_48 = arith.constant 0 : index
    %37 = vector.load %arg7[%c2_46, %c2_47, %c0_48] : memref<18x18x4xbf16, #tpu.memory_space<vmem>>, vector<16x16x4xbf16>
    %38 = vector.shape_cast %37 : vector<16x16x4xbf16> to vector<256x4xbf16>
    %39 = tpu.concatenate %22, %24, %26, %28, %30, %32, %34, %36, %38 in 1 : vector<256x4xbf16>, vector<256x4xbf16>, vector<256x4xbf16>, vector<256x4xbf16>, vector<256x4xbf16>, vector<256x4xbf16>, vector<256x4xbf16>, vector<256x4xbf16>, vector<256x4xbf16> -> vector<256x36xbf16>
    %c0_49 = arith.constant 0 : index
    %c0_50 = arith.constant 0 : index
    %40 = vector.load %arg4[%c0_49, %c0_50] : memref<36x4xbf16, #tpu.memory_space<vmem>>, vector<36x4xbf16>
    %cst_51 = arith.constant dense<0.000000e+00> : vector<256x4xf32>
    %41 = tpu.matmul %39, %40, %cst_51 {dimension_numbers = #tpu.dot_dimension_numbers<[1], [0], [0], [1], [0, 0, 1, 1], [], []>} : vector<256x36xbf16>, vector<36x4xbf16>, vector<256x4xf32> -> vector<256x4xf32>
    %c0_52 = arith.constant 0 : index
    %c0_53 = arith.constant 0 : index
    %c0_54 = arith.constant 0 : index
    %42 = vector.load %arg5[%c0_52, %c0_53, %c0_54] : memref<1x256x4xf32, #tpu.memory_space<vmem>>, vector<1x256x4xf32>
    %43 = vector.shape_cast %42 : vector<1x256x4xf32> to vector<256x4xf32>
    %44 = vector.shape_cast %41 : vector<256x4xf32> to vector<1x256x4xf32>
    tpu.vector_store %arg5[%c0_52, %c0_53, %c0_54], %44 {strides = array<i32>} : memref<1x256x4xf32, #tpu.memory_space<vmem>>, vector<1x256x4xf32>,
    %cst_55 = arith.constant dense<0.000000e+00> : vector<4xf32>
    %45 = vector.multi_reduction <add>, %41, %cst_55 [0] : vector<256x4xf32> to vector<4xf32>
    %46 = vector.shape_cast %45 : vector<4xf32> to vector<1x4xf32>
    %47 = arith.mulf %41, %41 : vector<256x4xf32>
    %cst_56 = arith.constant dense<0.000000e+00> : vector<4xf32>
    %48 = vector.multi_reduction <add>, %47, %cst_56 [0] : vector<256x4xf32> to vector<4xf32>
    %49 = vector.shape_cast %48 : vector<4xf32> to vector<1x4xf32>
    %50 = tpu.concatenate %46, %49 in 0 : vector<1x4xf32>, vector<1x4xf32> -> vector<2x4xf32>
    %c0_57 = arith.constant 0 : index
    %c0_58 = arith.constant 0 : index
    %c0_59 = arith.constant 0 : index
    %51 = vector.load %arg6[%c0_57, %c0_58, %c0_59] : memref<1x2x4xf32, #tpu.memory_space<vmem>>, vector<1x2x4xf32>
    %52 = vector.shape_cast %51 : vector<1x2x4xf32> to vector<2x4xf32>
    %53 = vector.shape_cast %50 : vector<2x4xf32> to vector<1x2x4xf32>
    tpu.vector_store %arg6[%c0_57, %c0_58, %c0_59], %53 {strides = array<i32>} : memref<1x2x4xf32, #tpu.memory_space<vmem>>, vector<1x2x4xf32>,
    return
  }
  func.func @transform_0(%arg0: i32) -> (i32, i32, i32) {
    %c0_i32 = arith.constant 0 : i32
    %c0_i32_0 = arith.constant 0 : i32
    %c0_i32_1 = arith.constant 0 : i32
    return %arg0, %c0_i32, %c0_i32_0 : i32, i32, i32
  }
  func.func @transform_1(%arg0: i32) -> (i32, i32) {
    %c0_i32 = arith.constant 0 : i32
    %c0_i32_0 = arith.constant 0 : i32
    %c0_i32_1 = arith.constant 0 : i32
    return %c0_i32, %c0_i32_0 : i32, i32
  }
  func.func @transform_2(%arg0: i32) -> (i32, i32) {
    %c0_i32 = arith.constant 0 : i32
    %c0_i32_0 = arith.constant 0 : i32
    %c0_i32_1 = arith.constant 0 : i32
    return %c0_i32, %c0_i32_0 : i32, i32
  }
  func.func @transform_3(%arg0: i32) -> (i32, i32) {
    %c0_i32 = arith.constant 0 : i32
    %c0_i32_0 = arith.constant 0 : i32
    %c0_i32_1 = arith.constant 0 : i32
    return %c0_i32, %c0_i32_0 : i32, i32
  }
  func.func @transform_4(%arg0: i32) -> (i32, i32, i32) {
    %c0_i32 = arith.constant 0 : i32
    %c0_i32_0 = arith.constant 0 : i32
    %c0_i32_1 = arith.constant 0 : i32
    return %arg0, %c0_i32, %c0_i32_0 : i32, i32, i32
  }
  func.func @transform_5(%arg0: i32) -> (i32, i32, i32) {
    %c0_i32 = arith.constant 0 : i32
    %c0_i32_0 = arith.constant 0 : i32
    %c0_i32_1 = arith.constant 0 : i32
    return %arg0, %c0_i32, %c0_i32_0 : i32, i32, i32
  }
}

module attributes {stable_mosaic.version = 11 : i64} {
  func.func @_conv3_kernel(%arg0: i32, %arg1: memref<128x4xf32, #tpu.memory_space<vmem>>, %arg2: memref<1x4xf32, #tpu.memory_space<vmem>>, %arg3: memref<1x4xf32, #tpu.memory_space<vmem>>, %arg4: memref<4x16xbf16, #tpu.memory_space<vmem>>, %arg5: memref<128x16xf32, #tpu.memory_space<vmem>>, %arg6: memref<1x2x16xf32, #tpu.memory_space<vmem>>) attributes {dimension_semantics = [#tpu.dimension_semantics<parallel>], iteration_bounds = array<i64: 4>, scalar_prefetch = 0 : i64, scratch_operands = 0 : i64, tpu.core_type = #tpu.core_type<tc>, window_params = [{transform_indices = @transform_0, window_bounds = array<i64: 128, 4>}, {pipeline_mode = #tpu.pipeline_mode<synchronous>, transform_indices = @transform_1, window_bounds = array<i64: 1, 4>}, {pipeline_mode = #tpu.pipeline_mode<synchronous>, transform_indices = @transform_2, window_bounds = array<i64: 1, 4>}, {pipeline_mode = #tpu.pipeline_mode<synchronous>, transform_indices = @transform_3, window_bounds = array<i64: 4, 16>}, {transform_indices = @transform_4, window_bounds = array<i64: 128, 16>}, {transform_indices = @transform_5, window_bounds = array<i64: 1, 2, 16>}]} {
    %c0 = arith.constant 0 : index
    %c0_0 = arith.constant 0 : index
    %0 = vector.load %arg1[%c0, %c0_0] : memref<128x4xf32, #tpu.memory_space<vmem>>, vector<128x4xf32>
    %c0_1 = arith.constant 0 : index
    %c0_2 = arith.constant 0 : index
    %1 = vector.load %arg2[%c0_1, %c0_2] : memref<1x4xf32, #tpu.memory_space<vmem>>, vector<1x4xf32>
    %2 = vector.broadcast %1 : vector<1x4xf32> to vector<128x4xf32>
    %3 = arith.mulf %0, %2 : vector<128x4xf32>
    %c0_3 = arith.constant 0 : index
    %c0_4 = arith.constant 0 : index
    %4 = vector.load %arg3[%c0_3, %c0_4] : memref<1x4xf32, #tpu.memory_space<vmem>>, vector<1x4xf32>
    %5 = vector.broadcast %4 : vector<1x4xf32> to vector<128x4xf32>
    %6 = arith.addf %3, %5 : vector<128x4xf32>
    %cst = arith.constant 0.000000e+00 : f32
    %7 = vector.broadcast %cst : f32 to vector<128x4xf32>
    %8 = arith.maximumf %6, %7 : vector<128x4xf32>
    %9 = arith.truncf %8 : vector<128x4xf32> to vector<128x4xbf16>
    %c0_5 = arith.constant 0 : index
    %c0_6 = arith.constant 0 : index
    %10 = vector.load %arg4[%c0_5, %c0_6] : memref<4x16xbf16, #tpu.memory_space<vmem>>, vector<4x16xbf16>
    %cst_7 = arith.constant dense<0.000000e+00> : vector<128x16xf32>
    %11 = tpu.matmul %9, %10, %cst_7 {dimension_numbers = #tpu.dot_dimension_numbers<[1], [0], [0], [1], [0, 0, 1, 1], [], []>} : vector<128x4xbf16>, vector<4x16xbf16>, vector<128x16xf32> -> vector<128x16xf32>
    %c0_8 = arith.constant 0 : index
    %c0_9 = arith.constant 0 : index
    %12 = vector.load %arg5[%c0_8, %c0_9] : memref<128x16xf32, #tpu.memory_space<vmem>>, vector<128x16xf32>
    tpu.vector_store %arg5[%c0_8, %c0_9], %11 {strides = array<i32>} : memref<128x16xf32, #tpu.memory_space<vmem>>, vector<128x16xf32>,
    %cst_10 = arith.constant dense<0.000000e+00> : vector<16xf32>
    %13 = vector.multi_reduction <add>, %11, %cst_10 [0] : vector<128x16xf32> to vector<16xf32>
    %14 = vector.shape_cast %13 : vector<16xf32> to vector<1x16xf32>
    %15 = arith.mulf %11, %11 : vector<128x16xf32>
    %cst_11 = arith.constant dense<0.000000e+00> : vector<16xf32>
    %16 = vector.multi_reduction <add>, %15, %cst_11 [0] : vector<128x16xf32> to vector<16xf32>
    %17 = vector.shape_cast %16 : vector<16xf32> to vector<1x16xf32>
    %18 = tpu.concatenate %14, %17 in 0 : vector<1x16xf32>, vector<1x16xf32> -> vector<2x16xf32>
    %c0_12 = arith.constant 0 : index
    %c0_13 = arith.constant 0 : index
    %c0_14 = arith.constant 0 : index
    %19 = vector.load %arg6[%c0_12, %c0_13, %c0_14] : memref<1x2x16xf32, #tpu.memory_space<vmem>>, vector<1x2x16xf32>
    %20 = vector.shape_cast %19 : vector<1x2x16xf32> to vector<2x16xf32>
    %21 = vector.shape_cast %18 : vector<2x16xf32> to vector<1x2x16xf32>
    tpu.vector_store %arg6[%c0_12, %c0_13, %c0_14], %21 {strides = array<i32>} : memref<1x2x16xf32, #tpu.memory_space<vmem>>, vector<1x2x16xf32>,
    return
  }
  func.func @transform_0(%arg0: i32) -> (i32, i32) {
    %c0_i32 = arith.constant 0 : i32
    %c0_i32_0 = arith.constant 0 : i32
    return %arg0, %c0_i32 : i32, i32
  }
  func.func @transform_1(%arg0: i32) -> (i32, i32) {
    %c0_i32 = arith.constant 0 : i32
    %c0_i32_0 = arith.constant 0 : i32
    %c0_i32_1 = arith.constant 0 : i32
    return %c0_i32, %c0_i32_0 : i32, i32
  }
  func.func @transform_2(%arg0: i32) -> (i32, i32) {
    %c0_i32 = arith.constant 0 : i32
    %c0_i32_0 = arith.constant 0 : i32
    %c0_i32_1 = arith.constant 0 : i32
    return %c0_i32, %c0_i32_0 : i32, i32
  }
  func.func @transform_3(%arg0: i32) -> (i32, i32) {
    %c0_i32 = arith.constant 0 : i32
    %c0_i32_0 = arith.constant 0 : i32
    %c0_i32_1 = arith.constant 0 : i32
    return %c0_i32, %c0_i32_0 : i32, i32
  }
  func.func @transform_4(%arg0: i32) -> (i32, i32) {
    %c0_i32 = arith.constant 0 : i32
    %c0_i32_0 = arith.constant 0 : i32
    return %arg0, %c0_i32 : i32, i32
  }
  func.func @transform_5(%arg0: i32) -> (i32, i32, i32) {
    %c0_i32 = arith.constant 0 : i32
    %c0_i32_0 = arith.constant 0 : i32
    %c0_i32_1 = arith.constant 0 : i32
    return %arg0, %c0_i32, %c0_i32_0 : i32, i32, i32
  }
}

module attributes {stable_mosaic.version = 11 : i64} {
  func.func @_bn_add_relu_kernel(%arg0: i32, %arg1: memref<128x16xf32, #tpu.memory_space<vmem>>, %arg2: memref<128x16xf32, #tpu.memory_space<vmem>>, %arg3: memref<1x16xf32, #tpu.memory_space<vmem>>, %arg4: memref<1x16xf32, #tpu.memory_space<vmem>>, %arg5: memref<128x16xf32, #tpu.memory_space<vmem>>) attributes {dimension_semantics = [#tpu.dimension_semantics<parallel>], iteration_bounds = array<i64: 4>, scalar_prefetch = 0 : i64, scratch_operands = 0 : i64, tpu.core_type = #tpu.core_type<tc>, window_params = [{transform_indices = @transform_0, window_bounds = array<i64: 128, 16>}, {transform_indices = @transform_1, window_bounds = array<i64: 128, 16>}, {pipeline_mode = #tpu.pipeline_mode<synchronous>, transform_indices = @transform_2, window_bounds = array<i64: 1, 16>}, {pipeline_mode = #tpu.pipeline_mode<synchronous>, transform_indices = @transform_3, window_bounds = array<i64: 1, 16>}, {transform_indices = @transform_4, window_bounds = array<i64: 128, 16>}]} {
    %c0 = arith.constant 0 : index
    %c0_0 = arith.constant 0 : index
    %0 = vector.load %arg1[%c0, %c0_0] : memref<128x16xf32, #tpu.memory_space<vmem>>, vector<128x16xf32>
    %c0_1 = arith.constant 0 : index
    %c0_2 = arith.constant 0 : index
    %1 = vector.load %arg3[%c0_1, %c0_2] : memref<1x16xf32, #tpu.memory_space<vmem>>, vector<1x16xf32>
    %2 = vector.broadcast %1 : vector<1x16xf32> to vector<128x16xf32>
    %3 = arith.mulf %0, %2 : vector<128x16xf32>
    %c0_3 = arith.constant 0 : index
    %c0_4 = arith.constant 0 : index
    %4 = vector.load %arg4[%c0_3, %c0_4] : memref<1x16xf32, #tpu.memory_space<vmem>>, vector<1x16xf32>
    %5 = vector.broadcast %4 : vector<1x16xf32> to vector<128x16xf32>
    %6 = arith.addf %3, %5 : vector<128x16xf32>
    %c0_5 = arith.constant 0 : index
    %c0_6 = arith.constant 0 : index
    %7 = vector.load %arg2[%c0_5, %c0_6] : memref<128x16xf32, #tpu.memory_space<vmem>>, vector<128x16xf32>
    %8 = arith.addf %6, %7 : vector<128x16xf32>
    %cst = arith.constant 0.000000e+00 : f32
    %9 = vector.broadcast %cst : f32 to vector<128x16xf32>
    %10 = arith.maximumf %8, %9 : vector<128x16xf32>
    %c0_7 = arith.constant 0 : index
    %c0_8 = arith.constant 0 : index
    %11 = vector.load %arg5[%c0_7, %c0_8] : memref<128x16xf32, #tpu.memory_space<vmem>>, vector<128x16xf32>
    tpu.vector_store %arg5[%c0_7, %c0_8], %10 {strides = array<i32>} : memref<128x16xf32, #tpu.memory_space<vmem>>, vector<128x16xf32>,
    return
  }
  func.func @transform_0(%arg0: i32) -> (i32, i32) {
    %c0_i32 = arith.constant 0 : i32
    %c0_i32_0 = arith.constant 0 : i32
    return %arg0, %c0_i32 : i32, i32
  }
  func.func @transform_1(%arg0: i32) -> (i32, i32) {
    %c0_i32 = arith.constant 0 : i32
    %c0_i32_0 = arith.constant 0 : i32
    return %arg0, %c0_i32 : i32, i32
  }
  func.func @transform_2(%arg0: i32) -> (i32, i32) {
    %c0_i32 = arith.constant 0 : i32
    %c0_i32_0 = arith.constant 0 : i32
    %c0_i32_1 = arith.constant 0 : i32
    return %c0_i32, %c0_i32_0 : i32, i32
  }
  func.func @transform_3(%arg0: i32) -> (i32, i32) {
    %c0_i32 = arith.constant 0 : i32
    %c0_i32_0 = arith.constant 0 : i32
    %c0_i32_1 = arith.constant 0 : i32
    return %c0_i32, %c0_i32_0 : i32, i32
  }
  func.func @transform_4(%arg0: i32) -> (i32, i32) {
    %c0_i32 = arith.constant 0 : i32
    %c0_i32_0 = arith.constant 0 : i32
    return %arg0, %c0_i32 : i32, i32
  }
}

</mosaic_0001>

<bundles_post_ra>
// kernel: bottleneck_forward_nhwc.7
= control target key start
LH: loop header
LB: loop body
LE: loop exit
PB: predicated region body
PF: predicated region fallthrough
CT: control target
= control target key end

     0   :  { %s474_s15 = smov 0   ;;  %s575_s0 = inlined_call_operand.vmem [shape: f32[512,16], index: 0, kind: input, shape index: {}, may-alias: {0,4}]   ;;  %s576_s1 = inlined_call_operand.vmem [shape: f32[512,16], index: 1, kind: input, shape index: {}]   ;;  %s577_s2 = inlined_call_operand.vmem [shape: f32[1,16], index: 2, kind: input, shape index: {}]   ;;  %s578_s3 = inlined_call_operand.vmem [shape: f32[1,16], index: 3, kind: input, shape index: {}]   ;;  %s579_s4 = inlined_call_operand.vmem [shape: f32[512,16], index: 4, kind: output, shape index: {}, may-alias: {0,4}]  }
   0x1 LB: > { %s418_s16 = sadd.s32 4294967295, %s447_s15   ;;  %p422_p0 = scmp.ge.s32.totalorder %s447_s15, 1  ;;  %s447_s15 = sphi %s474_s15, %s14_s15  }
   0x2   : > { %p174_p1 = scmp.lt.s32.totalorder %s447_s15, 5 }
   0x4   : > { %p175_p2 = pnand %p422_p0, %p174_p1 }
   0x5   : > { %s423_s17 = sshll.u32 (!%p175_p2), %s418_s16, 4  ;;  %v429_v0 = vld [vmem:[%s577_s2] ss:$0 sm:$0xff] (!%p175_p2)  ;;  %vm333_vm0 = vcmask (!%p175_p2), 130048  }
   0x6   : > { %178 = sbr.rel (%p175_p2) target bundleno = 39 (0x27), region = 36  ;;  %p206_p3 = scmp.lt.s32.totalorder (!%p175_p2), %s423_s17, 63  ;;  %v430_v1 = vld [vmem:[%s578_s3] ss:$0 sm:$0xff] (!%p175_p2) }
   0xd   : > { %s581_s17 = smov (!%p206_p3, %s423_s17), 63 }
   0xe   : > { %s482_s18 = sshll.u32 %s581_s17, 3 }
   0xf   : > { %s491_s23 = scalar_lea.vmem %s575_s0, %s482_s18  ;;  %s506_s28 = scalar_lea.vmem %s576_s1, %s482_s18 }
  0x10   : > { %v223_v2 = vld [vmem:[%s491_s23] sm:$0xff]  ;;  %v224_v3 = vld [vmem:[%s491_s23 + $0x8] sm:$0xff]  ;;  %v225_v4 = vld [vmem:[%s491_s23 + $0x10] sm:$0xff]  ;;  %s538_s5 = scalar_lea.vmem %s579_s4, %s482_s18 }
  0x11   : > { %v226_v5 = vld [vmem:[%s491_s23 + $0x18] sm:$0xff]  ;;  %v227_v6 = vld [vmem:[%s491_s23 + $0x20] sm:$0xff]  ;;  %v228_v7 = vld [vmem:[%s491_s23 + $0x28] sm:$0xff]  ;;  %v246_v8 = vmul.f32 %v429_v0, %v223_v2  ;;  %v247_v9 = vmul.f32 %v429_v0, %v224_v3  ;;  %v248_v10 = vmul.f32 %v429_v0, %v225_v4 }
  0x12   : > { %v229_v11 = vld [vmem:[%s491_s23 + $0x30] sm:$0xff]  ;;  %v230_v12 = vld [vmem:[%s491_s23 + $0x38] sm:$0xff]  ;;  %v231_v13 = vld [vmem:[%s491_s23 + $0x40] sm:$0xff]  ;;  %v249_v14 = vmul.f32 %v429_v0, %v226_v5  ;;  %v250_v15 = vmul.f32 %v429_v0, %v227_v6  ;;  %v251_v16 = vmul.f32 %v429_v0, %v228_v7 }
  0x13   : > { %v232_v17 = vld [vmem:[%s491_s23 + $0x48] sm:$0xff]  ;;  %v233_v18 = vld [vmem:[%s491_s23 + $0x50] sm:$0xff]  ;;  %v234_v19 = vld [vmem:[%s491_s23 + $0x58] sm:$0xff]  ;;  %v252_v20 = vmul.f32 %v429_v0, %v229_v11  ;;  %v253_v21 = vmul.f32 %v429_v0, %v230_v12  ;;  %v254_v22 = vmul.f32 %v429_v0, %v231_v13  ;;  %v269_v23 = vadd.f32 %v430_v1, %v246_v8 }
  0x14   : > { %v235_v24 = vld [vmem:[%s491_s23 + $0x60] sm:$0xff]  ;;  %v236_v25 = vld [vmem:[%s491_s23 + $0x68] sm:$0xff]  ;;  %v237_v26 = vld [vmem:[%s491_s23 + $0x70] sm:$0xff]  ;;  %v255_v27 = vmul.f32 %v429_v0, %v232_v17  ;;  %v256_v28 = vmul.f32 %v429_v0, %v233_v18  ;;  %v257_v29 = vmul.f32 %v429_v0, %v234_v19  ;;  %v270_v30 = vadd.f32 %v430_v1, %v247_v9 }
  0x15   : > { %v238_v31 = vld [vmem:[%s491_s23 + $0x78] sm:$0xff]  ;;  %v258_v32 = vmul.f32 %v429_v0, %v235_v24  ;;  %v259_v33 = vmul.f32 %v429_v0, %v236_v25  ;;  %v260_v34 = vmul.f32 %v429_v0, %v237_v26  ;;  %v271_v35 = vadd.f32 %v430_v1, %v248_v10  ;;  %v285_v36 = vld [vmem:[%s506_s28] sm:$0xff]  ;;  %v286_v37 = vld [vmem:[%s506_s28 + $0x8] sm:$0xff] }
  0x16   : > { %v261_v38 = vmul.f32 %v429_v0, %v238_v31  ;;  %v272_v39 = vadd.f32 %v430_v1, %v249_v14  ;;  %v273_v40 = vadd.f32 %v430_v1, %v250_v15  ;;  %v274_v41 = vadd.f32 %v430_v1, %v251_v16  ;;  %v287_v42 = vld [vmem:[%s506_s28 + $0x10] sm:$0xff]  ;;  %v288_v43 = vld [vmem:[%s506_s28 + $0x18] sm:$0xff]  ;;  %v289_v44 = vld [vmem:[%s506_s28 + $0x20] sm:$0xff] }
  0x17   : > { %v275_v45 = vadd.f32 %v430_v1, %v252_v20  ;;  %v276_v46 = vadd.f32 %v430_v1, %v253_v21  ;;  %v277_v47 = vadd.f32 %v430_v1, %v254_v22  ;;  %v278_v48 = vadd.f32 %v430_v1, %v255_v27  ;;  %v290_v49 = vld [vmem:[%s506_s28 + $0x28] sm:$0xff]  ;;  %v291_v50 = vld [vmem:[%s506_s28 + $0x30] sm:$0xff]  ;;  %v292_v51 = vld [vmem:[%s506_s28 + $0x38] sm:$0xff] }
  0x18   : > { %v279_v52 = vadd.f32 %v430_v1, %v256_v28  ;;  %v280_v53 = vadd.f32 %v430_v1, %v257_v29  ;;  %v281_v54 = vadd.f32 %v430_v1, %v258_v32  ;;  %v282_v55 = vadd.f32 %v430_v1, %v259_v33  ;;  %v293_v56 = vld [vmem:[%s506_s28 + $0x40] sm:$0xff]  ;;  %v294_v57 = vld [vmem:[%s506_s28 + $0x48] sm:$0xff]  ;;  %v295_v58 = vld [vmem:[%s506_s28 + $0x50] sm:$0xff] }
  0x19   : > { %v283_v59 = vadd.f32 %v430_v1, %v260_v34  ;;  %v284_v60 = vadd.f32 %v430_v1, %v261_v38  ;;  %v296_v61 = vld [vmem:[%s506_s28 + $0x58] sm:$0xff]  ;;  %v297_v62 = vld [vmem:[%s506_s28 + $0x60] sm:$0xff]  ;;  %v298_v63 = vld [vmem:[%s506_s28 + $0x68] sm:$0xff]  ;;  %v301_v0 = vadd.f32 %v285_v36, %v269_v23  ;;  %v302_v2 = vadd.f32 %v286_v37, %v270_v30 }
  0x1a   : > { %v299_v3 = vld [vmem:[%s506_s28 + $0x70] sm:$0xff]  ;;  %v300_v4 = vld [vmem:[%s506_s28 + $0x78] sm:$0xff]  ;;  %v303_v5 = vadd.f32 %v287_v42, %v271_v35  ;;  %v304_v6 = vadd.f32 %v288_v43, %v272_v39  ;;  %v305_v7 = vadd.f32 %v289_v44, %v273_v40  ;;  %v306_v8 = vadd.f32 %v290_v49, %v274_v41 }
  0x1b   : > { %v307_v9 = vadd.f32 %v291_v50, %v275_v45  ;;  %v308_v10 = vadd.f32 %v292_v51, %v276_v46  ;;  %v309_v11 = vadd.f32 %v293_v56, %v277_v47  ;;  %v310_v12 = vadd.f32 %v294_v57, %v278_v48 }
  0x1c   : > { %v311_v1 = vadd.f32 %v295_v58, %v279_v52  ;;  %v312_v13 = vadd.f32 %v296_v61, %v280_v53  ;;  %v313_v14 = vadd.f32 %v297_v62, %v281_v54  ;;  %v314_v15 = vadd.f32 %v298_v63, %v282_v55 }
  0x1d   : > { %v315_v16 = vadd.f32 %v299_v3, %v283_v59  ;;  %v316_v17 = vadd.f32 %v300_v4, %v284_v60  ;;  %v317_v18 = vmax.f32 %v301_v0, 0.0  ;;  %v318_v19 = vmax.f32 %v302_v2, 0.0 }
  0x1e   : > { %v319_v20 = vmax.f32 %v303_v5, 0.0  ;;  %v320_v21 = vmax.f32 %v304_v6, 0.0  ;;  %v321_v22 = vmax.f32 %v305_v7, 0.0  ;;  %v322_v23 = vmax.f32 %v306_v8, 0.0 }
  0x1f   : > { %v323_v24 = vmax.f32 %v307_v9, 0.0  ;;  %v324_v25 = vmax.f32 %v308_v10, 0.0  ;;  %v325_v26 = vmax.f32 %v309_v11, 0.0  ;;  %v326_v27 = vmax.f32 %v310_v12, 0.0  ;;  %334 = vst.msk [vmem:[%s538_s5] sm:$0xff] %vm333_vm0, %v317_v18  ;;  %335 = vst.msk [vmem:[%s538_s5 + $0x8] sm:$0xff] %vm333_vm0, %v318_v19 }
  0x20   : > { %v327_v28 = vmax.f32 %v311_v1, 0.0  ;;  %v328_v29 = vmax.f32 %v312_v13, 0.0  ;;  %v329_v30 = vmax.f32 %v313_v14, 0.0  ;;  %v330_v31 = vmax.f32 %v314_v15, 0.0  ;;  %336 = vst.msk [vmem:[%s538_s5 + $0x10] sm:$0xff] %vm333_vm0, %v319_v20  ;;  %337 = vst.msk [vmem:[%s538_s5 + $0x18] sm:$0xff] %vm333_vm0, %v320_v21 }
  0x21   : > { %338 = vst.msk [vmem:[%s538_s5 + $0x20] sm:$0xff] %vm333_vm0, %v321_v22  ;;  %339 = vst.msk [vmem:[%s538_s5 + $0x28] sm:$0xff] %vm333_vm0, %v322_v23  ;;  %v331_v32 = vmax.f32 %v315_v16, 0.0  ;;  %v332_v33 = vmax.f32 %v316_v17, 0.0 }
  0x22   : > { %340 = vst.msk [vmem:[%s538_s5 + $0x30] sm:$0xff] %vm333_vm0, %v323_v24  ;;  %341 = vst.msk [vmem:[%s538_s5 + $0x38] sm:$0xff] %vm333_vm0, %v324_v25 }
  0x23   : > { %342 = vst.msk [vmem:[%s538_s5 + $0x40] sm:$0xff] %vm333_vm0, %v325_v26  ;;  %343 = vst.msk [vmem:[%s538_s5 + $0x48] sm:$0xff] %vm333_vm0, %v326_v27 }
  0x24   : > { %344 = vst.msk [vmem:[%s538_s5 + $0x50] sm:$0xff] %vm333_vm0, %v327_v28  ;;  %345 = vst.msk [vmem:[%s538_s5 + $0x58] sm:$0xff] %vm333_vm0, %v328_v29 }
  0x25   : > { %346 = vst.msk [vmem:[%s538_s5 + $0x60] sm:$0xff] %vm333_vm0, %v329_v30  ;;  %347 = vst.msk [vmem:[%s538_s5 + $0x68] sm:$0xff] %vm333_vm0, %v330_v31 }
  0x26   : > { %348 = vst.msk [vmem:[%s538_s5 + $0x70] sm:$0xff] %vm333_vm0, %v331_v32  ;;  %349 = vst.msk [vmem:[%s538_s5 + $0x78] sm:$0xff] %vm333_vm0, %v332_v33 }
  0x27 PF: > { %s14_s15 = sadd.s32 1, %s447_s15  }
  0x28   : > { %p11_p4 = scmp.ge.s32.totalorder %s14_s15, 6  }
  0x2a   :  { %13 = sbr.rel (!%p11_p4) target bundleno = 1 (0x1), region = 69 }

// kernel: bottleneck_forward_nhwc.4
= control target key start
LH: loop header
LB: loop body
LE: loop exit
PB: predicated region body
PF: predicated region fallthrough
CT: control target
= control target key end

     0   :  { %9 = vsyncpa [#allocation3], 0  ;;  %s971_s0 = inlined_call_operand.hbm [shape: f32[512,16], index: 0, kind: input, shape index: {}]   ;;  %s972_s1 = inlined_call_operand.vmem [shape: bf16[16,4], index: 1, kind: input, shape index: {}]   ;;  %s973_s2 = inlined_call_operand.vmem [shape: f32[512,4], index: 2, kind: output, shape index: {0}]   ;;  %s974_s3 = inlined_call_operand.vmem [shape: f32[4,2,4], index: 3, kind: output, shape index: {1}]  }
   0x1   :  { %11 = vsyncpa [#allocation3 + $0x1], 0  ;;  %s752_s12 = smov 0   ;;  %s754_s13 = smov 0  }
   0x2   :  { %s756_s14 = smov 0   ;;  %s758_s15 = smov 0  }
   0x3 LB: > { %s771_s16 = sadd.s32 4294967295, %s727_s15   ;;  %s774_s17 = sadd.s32 1, %s727_s15   ;;  %s727_s15 = sphi %s758_s15, %s981_s15   ;;  %s723_s14 = sphi %s756_s14, %s980_s14   ;;  %s719_s13 = sphi %s754_s13, %s979_s13   ;;  %s715_s12 = sphi %s752_s12, %s978_s12  }
   0x4   : > { %s21_s18 = ssub.s32 %s727_s15, %s774_s17  ;;  %s24_s19 = sadd.s32 1, %s723_s14 }
   0x5   : > { %p22_p0 = scmp.eq.s32.totalorder %s21_s18, 0  ;;  %p31_p1 = scmp.ne.s32.totalorder %s723_s14, %s719_s13 }
   0x6   : > { %p32_p2 = scmp.eq.s32.totalorder %s727_s15, 0  ;;  %p37_p3 = scmp.ne.s32.totalorder %s719_s13, %s715_s12 }
   0x7   : > { %s784_s20 = scalar_select %p22_p0, %s723_s14, %s24_s19  }
   0x8   : > { %p33_p4 = por %p32_p2, %p31_p1  ;;  %p38_p5 = scmp.eq.s32.totalorder %s771_s16, 0 }
   0x9   : > { %p627_p6 = scmp.lt.s32.totalorder %s727_s15, 4  ;;  %s137_s22 = sand.u32 1, %s723_s14  }
   0xa   : > { %p788_p7 = por %p38_p5, %p37_p3  ;;  %s572_s23 = sshll.u32 %s137_s22, 7 }
   0xb   : > { %s591_s24 = sshll.u32 %s727_s15, 11  ;;  %s141_s28 = scalar_lea.vmem [#allocation2], %s572_s23 }
   0xc   : > { %s797_s27 = scalar_lea.hbm %s971_s0, %s591_s24  ;;  %s148_s29 = sshll.u32 %s141_s28, 4  ;;  %s799_s29 = int_to_ptr.vmem [resolvable:$true] %s148_s29 }
   0xd   : > { %p801_p8 = pnand %p627_p6, %p33_p4  ;;  %s806_s4 = scalar_lea.sflag [#allocation3], %s137_s22 }
   0xe   : > { %s663_s5 = scalar_lea.hbm %s797_s27, 2048  ;;  %s668_s8 = scalar_lea.hbm %s971_s0, 8192 }
   0xf   : > { %p664_p10 = scmp.ne.s32.totalorder %s797_s27, %s663_s5  ;;  %p665_p11 = pneg %p801_p8 }
  0x10   : > { %p669_p0 = scmp.lt.u32.totalorder %s797_s27, %s971_s0  ;;  %p670_p1 = scmp.lt.u32.totalorder %s668_s8, %s663_s5 }
  0x11   : > { %p666_p12 = pnand %p665_p11, %p664_p10  ;;  %p672_p3 = scmp.lt.u32.totalorder %s663_s5, %s797_s27 }
  0x12   : > { %p671_p2 = por %p670_p1, %p669_p0 }
  0x13   : > { %p667_p13 = pneg %p666_p12 }
  0x14   : > { %p673_p4 = por %p672_p3, %p671_p2 }
  0x16   : > { %p674_p5 = pnand %p673_p4, %p667_p13 }
  0x18   : > { %677 = shalt.err (!%p674_p5)
}
  0x19   : > { %s678_s11 = scalar_lea.vmem %s799_s29, 2048  ;;  %s729_s12 = smov [#allocation2]  }
  0x1a   : > { %p679_p6 = scmp.ne.s32.totalorder %s799_s29, %s678_s11  ;;  %s683_s18 = sshll.u32 %s729_s12, 4  ;;  %s684_s18 = int_to_ptr.vmem [resolvable:$false] %s683_s18 }
  0x1b   : > { %s685_s19 = scalar_lea.vmem %s684_s18, 4096  ;;  %p686_p9 = scmp.lt.s32.totalorder %s799_s29, %s684_s18 }
  0x1c   : > { %p681_p10 = pnand %p679_p6, %p665_p11  ;;  %p687_p0 = scmp.lt.s32.totalorder %s685_s19, %s678_s11 }
  0x1e   : > { %p682_p12 = pneg %p681_p10  ;;  %p688_p1 = por %p687_p0, %p686_p9 }
  0x20   : > { %p689_p2 = pnand %p688_p1, %p682_p12 }
  0x22   : > { %692 = shalt.err (!%p689_p2)
}
  0x23   : > { %s730_s22 = smov 128   ;;  %s731_s23 = smov 8  }
  0x24   : > { %626 = dma.hbm_to_vmem [thread:$0]  (!%p801_p8), %s797_s27, 2048, %s799_s29, %s806_s4, %s730_s22, %s730_s22, %s731_s23  }
  0x25   : > { %p156_p11 = scmp.lt.s32.totalorder %s727_s15, 5  ;;  %p977_p13 = scmp.ge.s32.totalorder %s727_s15, 1 }
  0x27   : > { %p157_p3 = pnand %p977_p13, %p156_p11 }
  0x28   : > { %s162_s24 = sand.u32 (!%p157_p3), 1, %s719_s13  }
  0x29   : > { %160 = sbr.rel (%p157_p3) target bundleno = 316 (0x13c), region = 28  ;;  %s576_s25 = sshll.u32 (!%p157_p3), %s162_s24, 7 }
  0x2a   : > { %s163_s26 = scalar_lea.sflag (!%p157_p3), [#allocation3], %s162_s24  ;;  %s838_s28 = scalar_lea.vmem (!%p157_p3), [#allocation2], %s576_s25 }
  0x30   : > { %710 = dma.done.wait (%p788_p7), %s163_s26, 2048  }
  0x31   : > { %712 = vsyncadd (%p788_p7), %s163_s26, 4294965248  ;;  %v662_v0 = vld [vmem:[%s972_s1] sm:$0xff]   ;;  %v206_v2 = vld [vmem:[%s838_s28 + $0x8] sm:$0xff]  ;;  %vm237_vm0 = vcmask 130048   ;;  %s577_s15 = sshll.u32 %s771_s16, 4  ;;  %vm359_vm1 = vcmask 31744  }
  0x32   : > { %v205_v1 = vld [vmem:[%s838_s28] sm:$0xff]  ;;  %v207_v3 = vld [vmem:[%s838_s28 + $0x10] sm:$0xff]  ;;  %601 = vmatprep.subr.bf16.mxu0 %v662_v0  ;;  %v208_v5 = vld [vmem:[%s838_s28 + $0x18] sm:$0xff]  ;;  %619 = vmatprep.subr.bf16.mxu1 %v662_v0  ;;  %p195_p7 = scmp.lt.s32.totalorder %s577_s15, 63  ;;  %p200_p8 = scmp.lt.s32.totalorder %s771_s16, 3  ;;  %vm466_vm2 = vcmask 1040384  }
  0x33   : > { %v221_v4 = vpack.c.bf16 %v206_v2, %v205_v1  ;;  %v209_v6 = vld [vmem:[%s838_s28 + $0x20] sm:$0xff]  ;;  %v210_v7 = vld [vmem:[%s838_s28 + $0x28] sm:$0xff]  ;;  %602 = vmatpush3.bf16.msra.mxu0 %v662_v0  ;;  %v222_v8 = vpack.c.bf16 %v208_v5, %v207_v3  ;;  %620 = vmatpush3.bf16.msra.mxu1 %v662_v0  ;;  %v215_v12 = vld [vmem:[%s838_s28 + $0x50] sm:$0xff]  ;;  %vm468_vm3 = vcmask 25600  }
  0x34   : > { %v223_v9 = vpack.c.bf16 %v210_v7, %v209_v6  ;;  %v213_v10 = vld [vmem:[%s838_s28 + $0x40] sm:$0xff]  ;;  %v214_v11 = vld [vmem:[%s838_s28 + $0x48] sm:$0xff]  ;;  %v216_v13 = vld [vmem:[%s838_s28 + $0x58] sm:$0xff]  ;;  %s983_s15 = smov (!%p195_p7, %s577_s15), 63  ;;  %s985_s16 = smov (!%p200_p8, %s771_s16), 3 }
  0x35   : > { %603 = vmatprep.mubr.msk.bf16.mxu0 %vm237_vm0, %v221_v4  ;;  %v225_v14 = vpack.c.bf16 %v214_v11, %v213_v10  ;;  %v226_v15 = vpack.c.bf16 %v216_v13, %v215_v12  ;;  %v217_v16 = vld [vmem:[%s838_s28 + $0x60] sm:$0xff]  ;;  %v218_v17 = vld [vmem:[%s838_s28 + $0x68] sm:$0xff]  ;;  %v211_v19 = vld [vmem:[%s838_s28 + $0x30] sm:$0xff]  ;;  %s578_s21 = sshll.u32 %s983_s15, 3  ;;  %s579_s4 = sshll.u32 %s985_s16, 1 }
  0x36   : > { %604 = vmatmul.mubr.msk.bf16.vlgmr.msra.gmra.mrb[0].mxu0 %vm237_vm0, %v222_v8  ;;  %v227_v18 = vpack.c.bf16 %v218_v17, %v217_v16  ;;  %v212_v20 = vld [vmem:[%s838_s28 + $0x38] sm:$0xff]  ;;  %v219_v21 = vld [vmem:[%s838_s28 + $0x70] sm:$0xff]  ;;  %s875_s30 = scalar_lea.vmem %s973_s2, %s578_s21  ;;  %s203_s9 = scalar_lea.vmem %s974_s3, %s579_s4 }
  0x37   : > { %607 = vmatprep.mubr.msk.bf16.mxu0 %vm237_vm0, %v223_v9  ;;  %611 = vmatprep.mubr.msk.bf16.mxu1 %vm237_vm0, %v225_v14  ;;  %v220_v22 = vld [vmem:[%s838_s28 + $0x78] sm:$0xff]  ;;  %v224_v23 = vpack.c.bf16 %v212_v20, %v211_v19 }
  0x38   : > { %612 = vmatmul.mubr.msk.bf16.vlgmr.msra.gmra.mrb[0].mxu1 %vm237_vm0, %v226_v15  ;;  %v228_v24 = vpack.c.bf16 %v220_v22, %v219_v21 }
  0x39   : > { %615 = vmatprep.mubr.msk.bf16.mxu1 %vm237_vm0, %v227_v18 }
  0x3e   : > { %608 = vmatmul.mubr.msk.bf16.gmra.mrb[4].mxu0 %vm237_vm0, %v224_v23 }
  0x40   : > { %616 = vmatmul.mubr.msk.bf16.gmra.mrb[4].mxu1 %vm237_vm0, %v228_v24 }
 0x109   : > { %v605_v25 = vpop.f32.mrb[0].mxu0 }
 0x10a   : > { %362 = vst.msk [vmem:[%s875_s30 + $0x10] sm:$0xff] %vm359_vm1, %v605_v25  ;;  %v296_v26 = vpop.f32.mrb[1].mxu0  ;;  %v415_v32 = vmul.f32 %v605_v25, %v605_v25  ;;  %v379_v39 = vsel %vm359_vm1, %v605_v25, 0.0 }
 0x10b   : > { %360 = vst.msk [vmem:[%s875_s30] sm:$0xff] %vm359_vm1, %v296_v26  ;;  %v413_v27 = vmul.f32 %v296_v26, %v296_v26  ;;  %v606_v28 = vpop.f32.mrb[2].mxu0  ;;  %v881_v29 = vpop.f32.mrb[0].mxu1  ;;  %v376_v33 = vsel %vm359_vm1, %v296_v26, 0.0 }
 0x10c   : > { %363 = vst.msk [vmem:[%s875_s30 + $0x18] sm:$0xff] %vm359_vm1, %v606_v28  ;;  %v299_v30 = vpop.f32.mrb[3].mxu0  ;;  %370 = vst.msk [vmem:[%s875_s30 + $0x50] sm:$0xff] %vm359_vm1, %v881_v29  ;;  %v328_v31 = vpop.f32.mrb[1].mxu1  ;;  %v416_v41 = vmul.f32 %v606_v28, %v606_v28  ;;  %v432_v45 = vsel %vm359_vm1, %v415_v32, 0.0  ;;  %v381_v46 = vsel %vm359_vm1, %v606_v28, 0.0  ;;  %v423_v20 = vmul.f32 %v881_v29, %v881_v29 }
 0x10d   : > { %361 = vst.msk [vmem:[%s875_s30 + $0x8] sm:$0xff] %vm359_vm1, %v299_v30  ;;  %v377_v34 = vsel %vm359_vm1, %v299_v30, 0.0  ;;  %v414_v35 = vmul.f32 %v299_v30, %v299_v30  ;;  %368 = vst.msk [vmem:[%s875_s30 + $0x40] sm:$0xff] %vm359_vm1, %v328_v31  ;;  %v894_v36 = vpop.f32.mrb[2].mxu1  ;;  %v429_v40 = vsel %vm359_vm1, %v413_v27, 0.0  ;;  %v421_v7 = vmul.f32 %v328_v31, %v328_v31 }
 0x10e   : > { %v378_v37 = vadd.f32 %v377_v34, %v376_v33  ;;  %371 = vst.msk [vmem:[%s875_s30 + $0x58] sm:$0xff] %vm359_vm1, %v894_v36  ;;  %v331_v38 = vpop.f32.mrb[3].mxu1  ;;  %v434_v51 = vsel %vm359_vm1, %v416_v41, 0.0  ;;  %v391_v12 = vsel %vm359_vm1, %v328_v31, 0.0  ;;  %v395_v24 = vsel %vm359_vm1, %v881_v29, 0.0 }
 0x10f   : > { %v430_v42 = vsel %vm359_vm1, %v414_v35, 0.0  ;;  %369 = vst.msk [vmem:[%s875_s30 + $0x48] sm:$0xff] %vm359_vm1, %v331_v38  ;;  %v444_v16 = vsel %vm359_vm1, %v421_v7, 0.0  ;;  %v422_v17 = vmul.f32 %v331_v38, %v331_v38  ;;  %v393_v21 = vsel %vm359_vm1, %v331_v38, 0.0 }
 0x110   : > { %v380_v43 = vadd.f32 %v379_v39, %v378_v37  ;;  %v431_v44 = vadd.f32 %v430_v42, %v429_v40  ;;  %v424_v25 = vmul.f32 %v894_v36, %v894_v36  ;;  %v448_v31 = vsel %vm359_vm1, %v423_v20, 0.0 }
 0x111   : > { %v609_v47 = vpop.f32.mrb[4].mxu0  ;;  %v446_v26 = vsel %vm359_vm1, %v422_v17, 0.0  ;;  %v397_v32 = vsel %vm359_vm1, %v894_v36, 0.0 }
 0x112   : > { %v433_v48 = vadd.f32 %v432_v45, %v431_v44  ;;  %366 = vst.msk [vmem:[%s875_s30 + $0x30] sm:$0xff] %vm359_vm1, %v609_v47  ;;  %v312_v49 = vpop.f32.mrb[5].mxu0  ;;  %v382_v50 = vadd.f32 %v381_v46, %v380_v43  ;;  %v419_v60 = vmul.f32 %v609_v47, %v609_v47  ;;  %v387_v4 = vsel %vm359_vm1, %v609_v47, 0.0 }
 0x113   : > { %364 = vst.msk [vmem:[%s875_s30 + $0x20] sm:$0xff] %vm359_vm1, %v312_v49  ;;  %v383_v52 = vsel %vm359_vm1, %v312_v49, 0.0  ;;  %v417_v53 = vmul.f32 %v312_v49, %v312_v49  ;;  %v610_v54 = vpop.f32.mrb[6].mxu0  ;;  %v617_v55 = vpop.f32.mrb[4].mxu1  ;;  %v450_v37 = vsel %vm359_vm1, %v424_v25, 0.0 }
 0x114   : > { %v384_v56 = vadd.f32 %v383_v52, %v382_v50  ;;  %v435_v57 = vadd.f32 %v434_v51, %v433_v48  ;;  %367 = vst.msk [vmem:[%s875_s30 + $0x38] sm:$0xff] %vm359_vm1, %v610_v54  ;;  %v315_v58 = vpop.f32.mrb[7].mxu0  ;;  %374 = vst.msk [vmem:[%s875_s30 + $0x70] sm:$0xff] %vm359_vm1, %v617_v55  ;;  %v344_v59 = vpop.f32.mrb[5].mxu1  ;;  %v420_v5 = vmul.f32 %v610_v54, %v610_v54  ;;  %v440_v10 = vsel %vm359_vm1, %v419_v60, 0.0 }
 0x115   : > { %v436_v61 = vsel %vm359_vm1, %v417_v53, 0.0  ;;  %365 = vst.msk [vmem:[%s875_s30 + $0x28] sm:$0xff] %vm359_vm1, %v315_v58  ;;  %v385_v62 = vsel %vm359_vm1, %v315_v58, 0.0  ;;  %v418_v63 = vmul.f32 %v315_v58, %v315_v58  ;;  %372 = vst.msk [vmem:[%s875_s30 + $0x60] sm:$0xff] %vm359_vm1, %v344_v59  ;;  %v618_v0 = vpop.f32.mrb[6].mxu1  ;;  %v389_v11 = vsel %vm359_vm1, %v610_v54, 0.0 }
 0x116   : > { %v437_v1 = vadd.f32 %v436_v61, %v435_v57  ;;  %v386_v2 = vadd.f32 %v385_v62, %v384_v56  ;;  %375 = vst.msk [vmem:[%s875_s30 + $0x78] sm:$0xff] %vm359_vm1, %v618_v0  ;;  %v347_v3 = vpop.f32.mrb[7].mxu1  ;;  %v442_v15 = vsel %vm359_vm1, %v420_v5, 0.0  ;;  %v425_v27 = vmul.f32 %v344_v59, %v344_v59 }
 0x117   : > { %v438_v6 = vsel %vm359_vm1, %v418_v63, 0.0  ;;  %373 = vst.msk [vmem:[%s875_s30 + $0x68] sm:$0xff] %vm359_vm1, %v347_v3  ;;  %v399_v33 = vsel %vm359_vm1, %v344_v59, 0.0  ;;  %v426_v38 = vmul.f32 %v347_v3, %v347_v3  ;;  %v427_v41 = vmul.f32 %v617_v55, %v617_v55 }
 0x118   : > { %v388_v8 = vadd.f32 %v387_v4, %v386_v2  ;;  %v439_v9 = vadd.f32 %v438_v6, %v437_v1  ;;  %v452_v29 = vsel %vm359_vm1, %v425_v27, 0.0  ;;  %v401_v42 = vsel %vm359_vm1, %v347_v3, 0.0 }
 0x119   : > { %v403_v45 = vsel %vm359_vm1, %v617_v55, 0.0  ;;  %v428_v36 = vmul.f32 %v618_v0, %v618_v0  ;;  %v454_v46 = vsel %vm359_vm1, %v426_v38, 0.0  ;;  %v456_v49 = vsel %vm359_vm1, %v427_v41, 0.0 }
 0x11a   : > { %v441_v13 = vadd.f32 %v440_v10, %v439_v9  ;;  %v390_v14 = vadd.f32 %v389_v11, %v388_v8  ;;  %v405_v50 = vsel %vm359_vm1, %v618_v0, 0.0 }
 0x11b   : > { %v458_v53 = vsel %vm359_vm1, %v428_v36, 0.0 }
 0x11c   : > { %v392_v18 = vadd.f32 %v391_v12, %v390_v14  ;;  %v443_v19 = vadd.f32 %v442_v15, %v441_v13 }
 0x11e   : > { %v445_v22 = vadd.f32 %v444_v16, %v443_v19  ;;  %v394_v23 = vadd.f32 %v393_v21, %v392_v18 }
 0x120   : > { %v396_v28 = vadd.f32 %v395_v24, %v394_v23  ;;  %v447_v30 = vadd.f32 %v446_v26, %v445_v22 }
 0x122   : > { %v449_v34 = vadd.f32 %v448_v31, %v447_v30  ;;  %v398_v35 = vadd.f32 %v397_v32, %v396_v28 }
 0x124   : > { %v400_v39 = vadd.f32 %v399_v33, %v398_v35  ;;  %v451_v40 = vadd.f32 %v450_v37, %v449_v34 }
 0x126   : > { %v453_v43 = vadd.f32 %v452_v29, %v451_v40  ;;  %v402_v44 = vadd.f32 %v401_v42, %v400_v39 }
 0x128   : > { %v404_v47 = vadd.f32 %v403_v45, %v402_v44  ;;  %v455_v48 = vadd.f32 %v454_v46, %v453_v43 }
 0x12a   : > { %v406_v51 = vadd.f32 %v405_v50, %v404_v47  ;;  %v457_v52 = vadd.f32 %v456_v49, %v455_v48 }
 0x12c   : > { %v407_v54 = vrot.slane %v406_v51, 4  ;;  %v459_v56 = vadd.f32 %v458_v53, %v457_v52 }
 0x12e   : > { %v408_v57 = vadd.f32 %v407_v54, %v406_v51  ;;  %v460_v58 = vrot.slane %v459_v56, 4 }
 0x130   : > { %v409_v55 = vrot.slane %v408_v57, 2  ;;  %v461_v59 = vadd.f32 %v460_v58, %v459_v56 }
 0x132   : > { %v410_v60 = vadd.f32 %v409_v55, %v408_v57  ;;  %v462_v61 = vrot.slane %v461_v59, 2 }
 0x134   : > { %v411_v62 = vrot.slane %v410_v60, 1  ;;  %v463_v63 = vadd.f32 %v462_v61, %v461_v59 }
 0x136   : > { %v464_v1 = vrot.slane %v463_v63, 1  ;;  %v412_v0 = vadd.f32 %v411_v62, %v410_v60 }
 0x138   : > { %v465_v2 = vadd.f32 %v464_v1, %v463_v63 }
 0x13a   : > { %v467_v3 = vsel %vm466_vm2, %v412_v0, %v465_v2 }
 0x13b   : > { %469 = vst.msk [vmem:[%s203_s9] sm:$0x3] %vm468_vm3, %v467_v3 }
 0x13c PF: > { %p14_p9 = scmp.ge.s32.totalorder %s774_s17, 6   ;;  %s978_s12 = smov %s719_s13 }
 0x13d   : > { %s979_s13 = smov %s723_s14  ;;  %s980_s14 = smov %s784_s20 }
 0x13e   : > { %s981_s15 = smov %s774_s17  ;;  %16 = sbr.rel (!%p14_p9) target bundleno = 3 (0x3), region = 80 }
 0x145   :  { %506 = vsyncpa [#allocation3], 1 }
 0x146   :  { %508 = vsyncpa [#allocation3 + $0x1], 1 }

// kernel: bottleneck_forward_nhwc.6
= control target key start
LH: loop header
LB: loop body
LE: loop exit
PB: predicated region body
PF: predicated region fallthrough
CT: control target
= control target key end

     0   :  { %s750_s18 = smov 0   ;;  %s919_s0 = inlined_call_operand.vmem [shape: f32[512,4], index: 0, kind: input, shape index: {}]   ;;  %s920_s1 = inlined_call_operand.vmem [shape: f32[1,4], index: 1, kind: input, shape index: {}]   ;;  %s921_s2 = inlined_call_operand.vmem [shape: f32[1,4], index: 2, kind: input, shape index: {}]   ;;  %s922_s3 = inlined_call_operand.vmem [shape: bf16[4,16], index: 3, kind: input, shape index: {}]   ;;  %s923_s4 = inlined_call_operand.vmem [shape: f32[512,16], index: 4, kind: output, shape index: {0}]   ;;  %s924_s5 = inlined_call_operand.vmem [shape: f32[4,2,16], index: 5, kind: output, shape index: {1}]  }
   0x1 LB: > { %s756_s19 = sadd.s32 4294967295, %s718_s18   ;;  %p655_p0 = scmp.ge.s32.totalorder %s718_s18, 1  ;;  %s718_s18 = sphi %s750_s18, %s16_s18  }
   0x2   : > { %p191_p1 = scmp.lt.s32.totalorder %s718_s18, 5 }
   0x4   : > { %p192_p2 = pnand %p655_p0, %p191_p1 }
   0x5   : > { %v326_v0 = vld [vmem:[%s922_s3] sm:$0x3] (!%p192_p2)  ;;  %vm352_vm0 = vcmask (!%p192_p2), 1041408   ;;  %s656_s22 = sshll.u32 (!%p192_p2), %s756_s19, 4  ;;  %vm327_vm1 = vcmask (!%p192_p2), 31744   ;;  %vm453_vm2 = vcmask (!%p192_p2), 130048  }
   0x6   : > { %195 = sbr.rel (%p192_p2) target bundleno = 288 (0x120), region = 36  ;;  %702 = vmatprep.subr.msk.bf16.mxu0 (!%p192_p2), %vm352_vm0, %v326_v0  ;;  %v354_v1 = vsel (!%p192_p2), %vm352_vm0, %v326_v0, 0  ;;  %p224_p3 = scmp.lt.s32.totalorder (!%p192_p2), %s656_s22, 63  ;;  %703 = vmatprep.subr.msk.bf16.mxu1 (!%p192_p2), %vm352_vm0, %v326_v0  ;;  %v770_v2 = vld [vmem:[%s920_s1] ss:$0 sm:$0xff] (!%p192_p2)  ;;  %vm560_vm3 = vcmask (!%p192_p2), 1040384  }
   0x7   : > { %683 = vmatpush3.bf16.msra.mxu0 (!%p192_p2), %v354_v1  ;;  %701 = vmatpush3.bf16.msra.mxu1 (!%p192_p2), %v354_v1  ;;  %v782_v3 = vld [vmem:[%s921_s2] ss:$0 sm:$0xff] (!%p192_p2)  ;;  %p235_p4 = scmp.lt.s32.totalorder (!%p192_p2), %s756_s19, 3  ;;  %vm562_vm4 = vcmask (!%p192_p2), 123904  }
   0xd   : > { %s926_s22 = smov (!%p224_p3, %s656_s22), 63  ;;  %s928_s19 = smov (!%p235_p4, %s756_s19), 3 }
   0xe   : > { %s657_s23 = sshll.u32 %s926_s22, 3  ;;  %s660_s9 = sshll.u32 %s928_s19, 1 }
   0xf   : > { %s777_s28 = scalar_lea.vmem %s919_s0, %s657_s23  ;;  %s845_s8 = scalar_lea.vmem %s923_s4, %s657_s23 }
  0x10   : > { %v240_v4 = vld [vmem:[%s777_s28] sm:$0xff]  ;;  %v241_v5 = vld [vmem:[%s777_s28 + $0x8] sm:$0xff]  ;;  %v242_v6 = vld [vmem:[%s777_s28 + $0x10] sm:$0xff]  ;;  %s238_s12 = scalar_lea.vmem %s924_s5, %s660_s9 }
  0x11   : > { %v263_v7 = vmul.f32 %v770_v2, %v240_v4  ;;  %v264_v8 = vmul.f32 %v770_v2, %v241_v5  ;;  %v243_v9 = vld [vmem:[%s777_s28 + $0x18] sm:$0xff]  ;;  %v265_v10 = vmul.f32 %v770_v2, %v242_v6  ;;  %v244_v11 = vld [vmem:[%s777_s28 + $0x20] sm:$0xff]  ;;  %v245_v12 = vld [vmem:[%s777_s28 + $0x28] sm:$0xff] }
  0x12   : > { %v266_v13 = vmul.f32 %v770_v2, %v243_v9  ;;  %v267_v14 = vmul.f32 %v770_v2, %v244_v11  ;;  %v268_v15 = vmul.f32 %v770_v2, %v245_v12  ;;  %v246_v16 = vld [vmem:[%s777_s28 + $0x30] sm:$0xff]  ;;  %v247_v17 = vld [vmem:[%s777_s28 + $0x38] sm:$0xff]  ;;  %v248_v26 = vld [vmem:[%s777_s28 + $0x40] sm:$0xff] }
  0x13   : > { %v286_v18 = vadd.f32 %v782_v3, %v263_v7  ;;  %v287_v19 = vadd.f32 %v782_v3, %v264_v8  ;;  %v288_v20 = vadd.f32 %v782_v3, %v265_v10  ;;  %v269_v21 = vmul.f32 %v770_v2, %v246_v16  ;;  %v249_v27 = vld [vmem:[%s777_s28 + $0x48] sm:$0xff]  ;;  %v250_v32 = vld [vmem:[%s777_s28 + $0x50] sm:$0xff]  ;;  %v251_v37 = vld [vmem:[%s777_s28 + $0x58] sm:$0xff] }
  0x14   : > { %v289_v22 = vadd.f32 %v782_v3, %v266_v13  ;;  %v290_v23 = vadd.f32 %v782_v3, %v267_v14  ;;  %v291_v24 = vadd.f32 %v782_v3, %v268_v15  ;;  %v270_v25 = vmul.f32 %v770_v2, %v247_v17  ;;  %v252_v38 = vld [vmem:[%s777_s28 + $0x60] sm:$0xff]  ;;  %v253_v42 = vld [vmem:[%s777_s28 + $0x68] sm:$0xff]  ;;  %v254_v43 = vld [vmem:[%s777_s28 + $0x70] sm:$0xff] }
  0x15   : > { %v302_v28 = vmax.f32 %v286_v18, 0.0  ;;  %v303_v29 = vmax.f32 %v287_v19, 0.0  ;;  %v304_v30 = vmax.f32 %v288_v20, 0.0  ;;  %v292_v31 = vadd.f32 %v782_v3, %v269_v21  ;;  %v255_v52 = vld [vmem:[%s777_s28 + $0x78] sm:$0xff] }
  0x16   : > { %v305_v33 = vmax.f32 %v289_v22, 0.0  ;;  %v306_v34 = vmax.f32 %v290_v23, 0.0  ;;  %v307_v35 = vmax.f32 %v291_v24, 0.0  ;;  %v293_v36 = vadd.f32 %v782_v3, %v270_v25 }
  0x17   : > { %v318_v39 = vpack.c.bf16 %v303_v29, %v302_v28  ;;  %v271_v40 = vmul.f32 %v770_v2, %v248_v26  ;;  %v272_v41 = vmul.f32 %v770_v2, %v249_v27  ;;  %v308_v46 = vmax.f32 %v292_v31, 0.0 }
  0x18   : > { %v319_v44 = vpack.c.bf16 %v305_v33, %v304_v30  ;;  %v320_v45 = vpack.c.bf16 %v307_v35, %v306_v34  ;;  %v273_v47 = vmul.f32 %v770_v2, %v250_v32  ;;  %v274_v50 = vmul.f32 %v770_v2, %v251_v37 }
  0x19   : > { %684 = vmatprep.mubr.msk.bf16.mxu0 %vm327_vm1, %v318_v39  ;;  %v294_v48 = vadd.f32 %v782_v3, %v271_v40  ;;  %v295_v49 = vadd.f32 %v782_v3, %v272_v41  ;;  %v275_v51 = vmul.f32 %v770_v2, %v252_v38  ;;  %v309_v53 = vmax.f32 %v293_v36, 0.0 }
  0x1a   : > { %685 = vmatmul.mubr.msk.bf16.vlgmr.msra.gmra.mrb[0].mxu0 %vm327_vm1, %v319_v44  ;;  %v296_v54 = vadd.f32 %v782_v3, %v273_v47  ;;  %v276_v55 = vmul.f32 %v770_v2, %v253_v42  ;;  %v277_v56 = vmul.f32 %v770_v2, %v254_v43  ;;  %v297_v59 = vadd.f32 %v782_v3, %v274_v50 }
  0x1b   : > { %688 = vmatprep.mubr.msk.bf16.mxu0 %vm327_vm1, %v320_v45  ;;  %v310_v57 = vmax.f32 %v294_v48, 0.0  ;;  %v311_v58 = vmax.f32 %v295_v49, 0.0  ;;  %v298_v60 = vadd.f32 %v782_v3, %v275_v51  ;;  %v278_v63 = vmul.f32 %v770_v2, %v255_v52 }
  0x1c   : > { %v312_v61 = vmax.f32 %v296_v54, 0.0  ;;  %v299_v62 = vadd.f32 %v782_v3, %v276_v55  ;;  %v313_v1 = vmax.f32 %v297_v59, 0.0  ;;  %v300_v5 = vadd.f32 %v782_v3, %v277_v56 }
  0x1d   : > { %v322_v0 = vpack.c.bf16 %v311_v58, %v310_v57  ;;  %v314_v4 = vmax.f32 %v298_v60, 0.0  ;;  %v321_v6 = vpack.c.bf16 %v309_v53, %v308_v46  ;;  %v301_v8 = vadd.f32 %v782_v3, %v278_v63 }
  0x1e   : > { %v315_v7 = vmax.f32 %v299_v62, 0.0  ;;  %v323_v9 = vpack.c.bf16 %v313_v1, %v312_v61  ;;  %v316_v11 = vmax.f32 %v300_v5, 0.0 }
  0x1f   : > { %692 = vmatprep.mubr.msk.bf16.mxu1 %vm327_vm1, %v322_v0  ;;  %v317_v12 = vmax.f32 %v301_v8, 0.0 }
  0x20   : > { %v324_v10 = vpack.c.bf16 %v315_v7, %v314_v4  ;;  %693 = vmatmul.mubr.msk.bf16.vlgmr.msra.gmra.mrb[0].mxu1 %vm327_vm1, %v323_v9 }
  0x21   : > { %v325_v2 = vpack.c.bf16 %v317_v12, %v316_v11 }
  0x22   : > { %689 = vmatmul.mubr.msk.bf16.gmra.mrb[4].mxu0 %vm327_vm1, %v321_v6  ;;  %696 = vmatprep.mubr.msk.bf16.mxu1 %vm327_vm1, %v324_v10 }
  0x28   : > { %697 = vmatmul.mubr.msk.bf16.gmra.mrb[4].mxu1 %vm327_vm1, %v325_v2 }
  0xed   : > { %v686_v3 = vpop.f32.mrb[0].mxu0 }
  0xee   : > { %456 = vst.msk [vmem:[%s845_s8 + $0x10] sm:$0xff] %vm453_vm2, %v686_v3  ;;  %v390_v13 = vpop.f32.mrb[1].mxu0  ;;  %v509_v17 = vmul.f32 %v686_v3, %v686_v3  ;;  %v473_v22 = vsel %vm453_vm2, %v686_v3, 0.0 }
  0xef   : > { %454 = vst.msk [vmem:[%s845_s8] sm:$0xff] %vm453_vm2, %v390_v13  ;;  %v507_v14 = vmul.f32 %v390_v13, %v390_v13  ;;  %v687_v15 = vpop.f32.mrb[2].mxu0  ;;  %v470_v18 = vsel %vm453_vm2, %v390_v13, 0.0 }
  0xf0   : > { %457 = vst.msk [vmem:[%s845_s8 + $0x18] sm:$0xff] %vm453_vm2, %v687_v15  ;;  %v393_v16 = vpop.f32.mrb[3].mxu0  ;;  %v510_v24 = vmul.f32 %v687_v15, %v687_v15  ;;  %v526_v29 = vsel %vm453_vm2, %v509_v17, 0.0  ;;  %v475_v30 = vsel %vm453_vm2, %v687_v15, 0.0 }
  0xf1   : > { %455 = vst.msk [vmem:[%s845_s8 + $0x8] sm:$0xff] %vm453_vm2, %v393_v16  ;;  %v471_v19 = vsel %vm453_vm2, %v393_v16, 0.0  ;;  %v508_v20 = vmul.f32 %v393_v16, %v393_v16  ;;  %v523_v23 = vsel %vm453_vm2, %v507_v14, 0.0 }
  0xf2   : > { %v472_v21 = vadd.f32 %v471_v19, %v470_v18  ;;  %v528_v37 = vsel %vm453_vm2, %v510_v24, 0.0 }
  0xf3   : > { %v524_v25 = vsel %vm453_vm2, %v508_v20, 0.0  ;;  %v694_v28 = vpop.f32.mrb[0].mxu1 }
  0xf4   : > { %v474_v26 = vadd.f32 %v473_v22, %v472_v21  ;;  %v525_v27 = vadd.f32 %v524_v25, %v523_v23  ;;  %464 = vst.msk [vmem:[%s845_s8 + $0x50] sm:$0xff] %vm453_vm2, %v694_v28  ;;  %v422_v32 = vpop.f32.mrb[1].mxu1  ;;  %v517_v9 = vmul.f32 %v694_v28, %v694_v28  ;;  %v489_v2 = vsel %vm453_vm2, %v694_v28, 0.0 }
  0xf5   : > { %v690_v31 = vpop.f32.mrb[4].mxu0  ;;  %462 = vst.msk [vmem:[%s845_s8 + $0x40] sm:$0xff] %vm453_vm2, %v422_v32  ;;  %v695_v36 = vpop.f32.mrb[2].mxu1  ;;  %v515_v54 = vmul.f32 %v422_v32, %v422_v32  ;;  %v485_v60 = vsel %vm453_vm2, %v422_v32, 0.0 }
  0xf6   : > { %v527_v33 = vadd.f32 %v526_v29, %v525_v27  ;;  %460 = vst.msk [vmem:[%s845_s8 + $0x30] sm:$0xff] %vm453_vm2, %v690_v31  ;;  %v406_v34 = vpop.f32.mrb[5].mxu0  ;;  %v476_v35 = vadd.f32 %v475_v30, %v474_v26  ;;  %465 = vst.msk [vmem:[%s845_s8 + $0x58] sm:$0xff] %vm453_vm2, %v695_v36  ;;  %v425_v41 = vpop.f32.mrb[3].mxu1  ;;  %v513_v45 = vmul.f32 %v690_v31, %v690_v31  ;;  %v481_v51 = vsel %vm453_vm2, %v690_v31, 0.0 }
  0xf7   : > { %458 = vst.msk [vmem:[%s845_s8 + $0x20] sm:$0xff] %vm453_vm2, %v406_v34  ;;  %v477_v38 = vsel %vm453_vm2, %v406_v34, 0.0  ;;  %v511_v39 = vmul.f32 %v406_v34, %v406_v34  ;;  %v691_v40 = vpop.f32.mrb[6].mxu0  ;;  %463 = vst.msk [vmem:[%s845_s8 + $0x48] sm:$0xff] %vm453_vm2, %v425_v41  ;;  %v538_v4 = vsel %vm453_vm2, %v515_v54, 0.0  ;;  %v516_v5 = vmul.f32 %v425_v41, %v425_v41 }
  0xf8   : > { %v478_v42 = vadd.f32 %v477_v38, %v476_v35  ;;  %v529_v43 = vadd.f32 %v528_v37, %v527_v33  ;;  %461 = vst.msk [vmem:[%s845_s8 + $0x38] sm:$0xff] %vm453_vm2, %v691_v40  ;;  %v409_v44 = vpop.f32.mrb[7].mxu0  ;;  %v514_v52 = vmul.f32 %v691_v40, %v691_v40  ;;  %v534_v58 = vsel %vm453_vm2, %v513_v45, 0.0 }
  0xf9   : > { %v530_v46 = vsel %vm453_vm2, %v511_v39, 0.0  ;;  %459 = vst.msk [vmem:[%s845_s8 + $0x28] sm:$0xff] %vm453_vm2, %v409_v44  ;;  %v479_v47 = vsel %vm453_vm2, %v409_v44, 0.0  ;;  %v512_v48 = vmul.f32 %v409_v44, %v409_v44  ;;  %v483_v59 = vsel %vm453_vm2, %v691_v40, 0.0 }
  0xfa   : > { %v531_v49 = vadd.f32 %v530_v46, %v529_v43  ;;  %v480_v50 = vadd.f32 %v479_v47, %v478_v42  ;;  %v536_v1 = vsel %vm453_vm2, %v514_v52, 0.0  ;;  %v487_v10 = vsel %vm453_vm2, %v425_v41, 0.0 }
  0xfb   : > { %v532_v53 = vsel %vm453_vm2, %v512_v48, 0.0  ;;  %v698_v57 = vpop.f32.mrb[4].mxu1  ;;  %v518_v3 = vmul.f32 %v695_v36, %v695_v36  ;;  %v540_v13 = vsel %vm453_vm2, %v516_v5, 0.0  ;;  %v542_v17 = vsel %vm453_vm2, %v517_v9, 0.0 }
  0xfc   : > { %v482_v55 = vadd.f32 %v481_v51, %v480_v50  ;;  %v533_v56 = vadd.f32 %v532_v53, %v531_v49  ;;  %468 = vst.msk [vmem:[%s845_s8 + $0x70] sm:$0xff] %vm453_vm2, %v698_v57  ;;  %v438_v61 = vpop.f32.mrb[5].mxu1  ;;  %v491_v18 = vsel %vm453_vm2, %v695_v36, 0.0  ;;  %v521_v27 = vmul.f32 %v698_v57, %v698_v57 }
  0xfd   : > { %466 = vst.msk [vmem:[%s845_s8 + $0x60] sm:$0xff] %vm453_vm2, %v438_v61  ;;  %v699_v0 = vpop.f32.mrb[6].mxu1  ;;  %v519_v14 = vmul.f32 %v438_v61, %v438_v61  ;;  %v493_v19 = vsel %vm453_vm2, %v438_v61, 0.0  ;;  %v544_v22 = vsel %vm453_vm2, %v518_v3, 0.0  ;;  %v497_v31 = vsel %vm453_vm2, %v698_v57, 0.0 }
  0xfe   : > { %v535_v62 = vadd.f32 %v534_v58, %v533_v56  ;;  %v484_v63 = vadd.f32 %v483_v59, %v482_v55  ;;  %469 = vst.msk [vmem:[%s845_s8 + $0x78] sm:$0xff] %vm453_vm2, %v699_v0  ;;  %v441_v6 = vpop.f32.mrb[7].mxu1  ;;  %v522_v32 = vmul.f32 %v699_v0, %v699_v0  ;;  %v550_v36 = vsel %vm453_vm2, %v521_v27, 0.0 }
  0xff   : > { %467 = vst.msk [vmem:[%s845_s8 + $0x68] sm:$0xff] %vm453_vm2, %v441_v6  ;;  %v546_v23 = vsel %vm453_vm2, %v519_v14, 0.0  ;;  %v520_v24 = vmul.f32 %v441_v6, %v441_v6  ;;  %v495_v28 = vsel %vm453_vm2, %v441_v6, 0.0  ;;  %v499_v37 = vsel %vm453_vm2, %v699_v0, 0.0 }
 0x100   : > { %v486_v7 = vadd.f32 %v485_v60, %v484_v63  ;;  %v537_v8 = vadd.f32 %v536_v1, %v535_v62  ;;  %v552_v40 = vsel %vm453_vm2, %v522_v32, 0.0 }
 0x101   : > { %v548_v33 = vsel %vm453_vm2, %v520_v24, 0.0 }
 0x102   : > { %v539_v11 = vadd.f32 %v538_v4, %v537_v8  ;;  %v488_v12 = vadd.f32 %v487_v10, %v486_v7 }
 0x104   : > { %v490_v15 = vadd.f32 %v489_v2, %v488_v12  ;;  %v541_v16 = vadd.f32 %v540_v13, %v539_v11 }
 0x106   : > { %v543_v20 = vadd.f32 %v542_v17, %v541_v16  ;;  %v492_v21 = vadd.f32 %v491_v18, %v490_v15 }
 0x108   : > { %v494_v25 = vadd.f32 %v493_v19, %v492_v21  ;;  %v545_v26 = vadd.f32 %v544_v22, %v543_v20 }
 0x10a   : > { %v547_v29 = vadd.f32 %v546_v23, %v545_v26  ;;  %v496_v30 = vadd.f32 %v495_v28, %v494_v25 }
 0x10c   : > { %v498_v34 = vadd.f32 %v497_v31, %v496_v30  ;;  %v549_v35 = vadd.f32 %v548_v33, %v547_v29 }
 0x10e   : > { %v500_v38 = vadd.f32 %v499_v37, %v498_v34  ;;  %v551_v39 = vadd.f32 %v550_v36, %v549_v35 }
 0x110   : > { %v501_v41 = vrot.slane %v500_v38, 4  ;;  %v553_v42 = vadd.f32 %v552_v40, %v551_v39 }
 0x112   : > { %v502_v43 = vadd.f32 %v501_v41, %v500_v38  ;;  %v554_v44 = vrot.slane %v553_v42, 4 }
 0x114   : > { %v503_v45 = vrot.slane %v502_v43, 2  ;;  %v555_v46 = vadd.f32 %v554_v44, %v553_v42 }
 0x116   : > { %v504_v47 = vadd.f32 %v503_v45, %v502_v43  ;;  %v556_v48 = vrot.slane %v555_v46, 2 }
 0x118   : > { %v505_v49 = vrot.slane %v504_v47, 1  ;;  %v557_v50 = vadd.f32 %v556_v48, %v555_v46 }
 0x11a   : > { %v558_v51 = vrot.slane %v557_v50, 1  ;;  %v506_v52 = vadd.f32 %v505_v49, %v504_v47 }
 0x11c   : > { %v559_v53 = vadd.f32 %v558_v51, %v557_v50 }
 0x11e   : > { %v561_v54 = vsel %vm560_vm3, %v506_v52, %v559_v53 }
 0x11f   : > { %563 = vst.msk [vmem:[%s238_s12] sm:$0x3] %vm562_vm4, %v561_v54 }
 0x120 PF: > { %s16_s18 = sadd.s32 1, %s718_s18  }
 0x121   : > { %p13_p5 = scmp.ge.s32.totalorder %s16_s18, 6  }
 0x123   :  { %15 = sbr.rel (!%p13_p5) target bundleno = 1 (0x1), region = 78 }

// kernel: bottleneck_forward_nhwc.5
= control target key start
LH: loop header
LB: loop body
LE: loop exit
PB: predicated region body
PF: predicated region fallthrough
CT: control target
= control target key end

     0   :  { %s4880_s18 = smov 0   ;;  %s6904_s0 = inlined_call_operand.vmem [shape: f32[2,256,4], index: 0, kind: input, shape index: {}]   ;;  %s6905_s1 = inlined_call_operand.vmem [shape: f32[1,4], index: 1, kind: input, shape index: {}]   ;;  %s6906_s2 = inlined_call_operand.vmem [shape: f32[1,4], index: 2, kind: input, shape index: {}]   ;;  %s6907_s3 = inlined_call_operand.vmem [shape: bf16[36,4], index: 3, kind: input, shape index: {}]   ;;  %s6908_s4 = inlined_call_operand.vmem [shape: f32[2,256,4], index: 4, kind: output, shape index: {0}]   ;;  %s6909_s5 = inlined_call_operand.vmem [shape: f32[2,2,4], index: 5, kind: output, shape index: {1}]  }
   0x1 LB: > { %s4391_s19 = sadd.s32 4294967295, %s4839_s18   ;;  %p4395_p0 = scmp.ge.s32.totalorder %s4839_s18, 1  ;;  %s4839_s18 = sphi %s4880_s18, %s16_s18  }
   0x2   : > { %p190_p1 = scmp.lt.s32.totalorder %s4839_s18, 3 }
   0x4   : > { %p191_p2 = pnand %p4395_p0, %p190_p1 }
   0x5   : > { %vm237_vm0 = vcmask (!%p191_p2), 27648   ;;  %vm240_vm1 = vcmask (!%p191_p2), 24576   ;;  %vm247_vm2 = vsmask.f32 (!%p191_p2), 256  ;;  %v4841_v0 = vmov (!%p191_p2), 0   ;;  %p222_p3 = scmp.lt.s32.totalorder (!%p191_p2), %s4391_s19, 1 }
   0x6   : > { %194 = sbr.rel (%p191_p2) target bundleno = 803 (0x323), region = 36  ;;  %238 = vst.msk [vmem:[#allocation2] sm:$0xf] (!%p191_p2), %vm237_vm0, %v4841_v0  ;;  %239 = vst.msk [vmem:[#allocation2 + $0x4] sm:$0xf] (!%p191_p2), %vm237_vm0, %v4841_v0  ;;  %vm1533_vm5 = vcmask (!%p191_p2), 1042432  }
   0x7   : > { %241 = vst.msk [vmem:[#allocation2 + $0x8] sm:$0x1] (!%p191_p2), %vm240_vm1, %v4841_v0  ;;  %245 = vst.msk [vmem:[#allocation2 + $0xd4] sm:$0x1] (!%p191_p2), %vm240_vm1, %v4841_v0  ;;  %v255_v2 = vld [vmem:[#allocation2 + $0x18] sm:$0x1] (!%p191_p2) }
   0x8   : > { %243 = vst.msk [vmem:[#allocation2 + $0xcc] sm:$0xf] (!%p191_p2), %vm237_vm0, %v4841_v0  ;;  %244 = vst.msk [vmem:[#allocation2 + $0xd0] sm:$0xf] (!%p191_p2), %vm237_vm0, %v4841_v0  ;;  %vm303_vm4 = vsmask.f32 (!%p191_p2), 7938 }
   0x9   : > { %vm4896_vm3 = vmand (!%p191_p2), %vm240_vm1, %vm247_vm2  ;;  %vm1534_vm6 = vcmask (!%p191_p2), 1046532   ;;  %v252_v4 = vld [vmem:[#allocation2 + $0xc] sm:$0x1] (!%p191_p2)  ;;  %v258_v6 = vld [vmem:[#allocation2 + $0x24] sm:$0x1] (!%p191_p2)  ;;  %s4842_s28 = smov (!%p191_p2), 8  }
   0xa   : > { %v256_v3 = vsel (!%p191_p2), %vm4896_vm3, 0, %v255_v2  ;;  %v253_v5 = vsel (!%p191_p2), %vm4896_vm3, 0, %v252_v4  ;;  %v261_v7 = vld [vmem:[#allocation2 + $0x30] sm:$0x1] (!%p191_p2)  ;;  %vm4908_vm7 = vmand (!%p191_p2), %vm240_vm1, %vm303_vm4  ;;  %v259_v9 = vsel (!%p191_p2), %vm4896_vm3, 0, %v258_v6  ;;  %s4843_s29 = smov (!%p191_p2), 4  }
   0xb   : > { %257 = vst [vmem:[#allocation2 + $0x18] sm:$0x1] (!%p191_p2), %v256_v3  ;;  %254 = vst [vmem:[#allocation2 + $0xc] sm:$0x1] (!%p191_p2), %v253_v5  ;;  %v262_v10 = vsel (!%p191_p2), %vm4896_vm3, 0, %v261_v7  ;;  %s4844_s30 = smov (!%p191_p2), 12  }
   0xc   : > { %v308_v11 = vld [vmem:[#allocation2 + $0x14] sm:$0x1] (!%p191_p2)  ;;  %vm4917_vm8 = vmor (!%p191_p2), %vm1533_vm5, %vm1534_vm6  ;;  %v4931_v13 = vld [vmem:[%s6905_s1] ss:$0 sm:$0xff] (!%p191_p2)  ;;  %260 = vst [vmem:[#allocation2 + $0x24] sm:$0x1] (!%p191_p2), %v259_v9 }
   0xd   : > { %s6926_s19 = smov (!%p222_p3, %s4391_s19), 1  ;;  %263 = vst [vmem:[#allocation2 + $0x30] sm:$0x1] %v262_v10  ;;  %v309_v14 = vsel %vm4908_vm7, 0, %v308_v11  ;;  %v311_v15 = vld [vmem:[#allocation2 + $0x20] sm:$0x1]  ;;  %vm4988_vm13 = vmand %vm237_vm0, %vm303_vm4 }
   0xe   : > { %s4648_s20 = sshll.u32 %s6926_s19, 8  ;;  %v305_v16 = vld [vmem:[#allocation2 + $0x8] sm:$0x1]  ;;  %v1035_v17 = vld [vmem:[#allocation2 + $0x4] sm:$0xf]  ;;  %v312_v30 = vsel %vm4908_vm7, 0, %v311_v15 }
   0xf   : > { %s4926_s23 = scalar_lea.vmem %s6904_s0, %s4648_s20  ;;  %v1469_v18 = vld [vmem:[#allocation2] sm:$0xe]  ;;  %vm1082_vm9 = vsmask.f32 3328  ;;  %vm1083_vm10 = vsmask.f32 7440 }
  0x10   : > { %v4938_v19 = vld [vmem:[%s6906_s2] ss:$0 sm:$0xff]  ;;  %310 = vst [vmem:[#allocation2 + $0x14] sm:$0x1] %v309_v14  ;;  %v306_v20 = vsel %vm4908_vm7, 0, %v305_v16  ;;  %v4435_v21 = vrot.slane %v1469_v18, 9  ;;  %vm4980_vm12 = vmor %vm1082_vm9, %vm1083_vm10 }
  0x11   : > { %v1538_v22 = vrot.slane %v1035_v17, 5  ;;  %v249_v23 = vld [vmem:[#allocation2] sm:$0x1]  ;;  %v1095_v24 = vshll.u32 %v1035_v17, 16  ;;  %307 = vst [vmem:[#allocation2 + $0x8] sm:$0x1] %v306_v20 }
  0x12   : > { %v250_v25 = vsel %vm4896_vm3, 0, %v249_v23  ;;  %v1099_v26 = vshrl.u32 %v1035_v17, 16  ;;  %v361_v27 = vld [vmem:[%s4926_s23 + $0x10] sm:$0xff]  ;;  %v362_v28 = vld [vmem:[%s4926_s23 + $0x18] sm:$0xff]  ;;  %v359_v29 = vld [vmem:[%s4926_s23] sm:$0xff]  ;;  %s4845_s6 = smov 24  }
  0x13   : > { %v1539_v31 = vsel %vm4917_vm8, %v4435_v21, %v1538_v22  ;;  %v1540_v32 = vrot.slane %v1538_v22, 4  ;;  %251 = vst [vmem:[#allocation2] sm:$0x1] %v250_v25  ;;  %v4951_v33 = vrot.slane %v1095_v24, 5  ;;  %v400_v34 = vmul.f32 %v4931_v13, %v361_v27  ;;  %v360_v35 = vld [vmem:[%s4926_s23 + $0x8] sm:$0xff]  ;;  %v363_v36 = vld [vmem:[%s4926_s23 + $0x20] sm:$0xff] }
  0x14   : > { %313 = vst [vmem:[#allocation2 + $0x20] sm:$0x1] %v312_v30  ;;  %v1101_v37 = vrot.slane %v1099_v26, 4  ;;  %v401_v38 = vmul.f32 %v4931_v13, %v362_v28  ;;  %vm597_vm11 = vsmask.f32 4368  ;;  %v398_v39 = vmul.f32 %v4931_v13, %v359_v29  ;;  %v364_v41 = vld [vmem:[%s4926_s23 + $0x28] sm:$0xff] }
  0x15   : > { %v399_v40 = vmul.f32 %v4931_v13, %v360_v35  ;;  %v365_v42 = vld [vmem:[%s4926_s23 + $0x30] sm:$0xff]  ;;  %v366_v43 = vld [vmem:[%s4926_s23 + $0x38] sm:$0xff]  ;;  %v439_v44 = vadd.f32 %v4938_v19, %v400_v34  ;;  %v402_v45 = vmul.f32 %v4931_v13, %v363_v36  ;;  %v403_v46 = vmul.f32 %v4931_v13, %v364_v41  ;;  %vm4997_vm14 = vmor %vm247_vm2, %vm597_vm11  ;;  %s4846_s7 = smov 20   ;;  %s4847_s8 = smov 32  }
  0x16   : > { %v404_v47 = vmul.f32 %v4931_v13, %v365_v42  ;;  %v1102_v48 = vor.u32 %v1101_v37, %v4951_v33  ;;  %v440_v49 = vadd.f32 %v4938_v19, %v401_v38  ;;  %v437_v50 = vadd.f32 %v4938_v19, %v398_v39  ;;  %v929_v24 = vld [vmem:[#allocation2 + $0x18] sm:$0xf]  ;;  %s4848_s9 = smov 16   ;;  %s4849_s10 = smov 28  }
  0x17   : > { %v438_v51 = vadd.f32 %v4938_v19, %v399_v40  ;;  %v471_v52 = vmax.f32 %v439_v44, 0.0  ;;  %v441_v53 = vadd.f32 %v4938_v19, %v402_v45  ;;  %v442_v54 = vadd.f32 %v4938_v19, %v403_v46 }
  0x18   : > { %v4973_v55 = vmul.f32 %v4931_v13, %v366_v43  ;;  %v1103_v56 = vrot.slane %v1102_v48, 4  ;;  %v472_v57 = vmax.f32 %v440_v49, 0.0  ;;  %v469_v58 = vmax.f32 %v437_v50, 0.0  ;;  %v1066_v60 = vld [vmem:[#allocation2 + $0x8] sm:$0x1] }
  0x19   : > { %v470_v59 = vmax.f32 %v438_v51, 0.0  ;;  %v4652_v61 = vpack.c.bf16 %v471_v52, %v471_v52  ;;  %v473_v62 = vmax.f32 %v441_v53, 0.0  ;;  %v474_v63 = vmax.f32 %v442_v54, 0.0  ;;  %v922_v43 = vld [vmem:[#allocation2 + $0xc] sm:$0xf] }
  0x1a   : > { %v4976_v0 = vadd.f32 %v4938_v19, %v404_v47  ;;  %v1541_v2 = vrot.slane %v1066_v60, 5  ;;  %v1034_v3 = vld [vmem:[#allocation2] sm:$0xf]  ;;  %v1105_v4 = vshll.u32 %v1066_v60, 16  ;;  %v4653_v5 = vpack.c.bf16 %v472_v57, %v472_v57  ;;  %v926_v53 = vld [vmem:[#allocation2 + $0x14] sm:$0x1] }
  0x1b   : > { %v4650_v6 = vpack.c.bf16 %v469_v58, %v469_v58  ;;  %v1086_v9 = vshrl.u32 %v1034_v3, 16  ;;  %v1089_v10 = vshll.u32 %v1034_v3, 16  ;;  %v617_v11 = vshrl.u32 %v4652_v61, 16  ;;  %v933_v54 = vld [vmem:[#allocation2 + $0x20] sm:$0x1] }
  0x1c   : > { %v620_v14 = vshll.u32 %v4652_v61, 16  ;;  %v1542_v15 = vsel %vm4917_vm8, %v1540_v32, %v1541_v2  ;;  %v1107_v16 = vrot.slane %v1105_v4, 5  ;;  %v625_v17 = vshrl.u32 %v4653_v5, 16  ;;  %v314_v60 = vld [vmem:[#allocation2 + $0x2c] sm:$0x1] }
  0x1d   : > { %v628_v18 = vshll.u32 %v4653_v5, 16  ;;  %v4515_v20 = vcombine.low %v1539_v31, %v1542_v15  ;;  %v1088_v21 = vrot.slane %v1086_v9, 4  ;;  %v1091_v22 = vrot.slane %v1089_v10, 5  ;;  %v317_v61 = vld [vmem:[#allocation2 + $0x38] sm:$0x1] }
  0x1e   : > { %v619_v23 = vrot.slane %v617_v11, 7  ;;  %v1108_v26 = vsel %vm4980_vm12, %v1103_v56, %v1107_v16  ;;  %v627_v27 = vrot.slane %v625_v17, 7  ;;  %v4651_v28 = vpack.c.bf16 %v470_v59, %v470_v59  ;;  %v936_v5 = vld [vmem:[#allocation2 + $0x24] sm:$0xf]  ;;  %v368_v17 = vld [vmem:[%s4926_s23 + $0x48] sm:$0xff] }
  0x1f   : > { %v600_v29 = vshrl.u32 %v4650_v6, 16  ;;  %3057 = vrot.lane.b32.xlu1 %v4515_v20, %s4842_s28  ;;  %v1092_v30 = vor.u32 %v1091_v22, %v1088_v21  ;;  %v603_v35 = vshll.u32 %v4650_v6, 16  ;;  %v4654_v44 = vpack.c.bf16 %v473_v62, %v473_v62  ;;  %v367_v16 = vld [vmem:[%s4926_s23 + $0x40] sm:$0xff] }
  0x20   : > { %v622_v32 = vor.u32 %v620_v14, %v619_v23  ;;  %v623_v34 = vrot.slane %v619_v23, 4  ;;  %v630_v36 = vor.u32 %v628_v18, %v627_v27  ;;  %v632_v37 = vrot.slane %v627_v27, 4 }
  0x21   : > { %v602_v38 = vrot.slane %v600_v29, 7  ;;  %v608_v39 = vshrl.u32 %v4651_v28, 16  ;;  %v1093_v40 = vrot.slane %v1092_v30, 4  ;;  %v611_v42 = vshll.u32 %v4651_v28, 16 }
  0x22   : > { %v930_v41 = vsel %vm4988_vm13, %v622_v32, %v929_v24  ;;  %v631_v45 = vsel %vm4997_vm14, %v623_v34, %v630_v36  ;;  %v4655_v50 = vpack.c.bf16 %v474_v63, %v474_v63  ;;  %v634_v51 = vshrl.u32 %v4654_v44, 16  ;;  %v264_v63 = vld [vmem:[#allocation2 + $0x3c] sm:$0x1] }
  0x23   : > { %931 = vst [vmem:[#allocation2 + $0x18] sm:$0xf] %v930_v41  ;;  %v605_v46 = vor.u32 %v603_v35, %v602_v38  ;;  %v606_v47 = vrot.slane %v602_v38, 4  ;;  %v610_v48 = vrot.slane %v608_v39, 7  ;;  %v1098_v49 = vsel %vm4980_vm12, %v1093_v40, %v4951_v33  ;;  %932 = vst.msk [vmem:[#allocation2 + $0x1c] sm:$0xf] %vm237_vm0, %v631_v45 }
  0x24   : > { %v637_v52 = vshll.u32 %v4654_v44, 16  ;;  %v4499_v56 = vcombine.low %v1098_v49, %v1108_v26  ;;  %v636_v62 = vrot.slane %v634_v51, 7  ;;  %v642_v2 = vshrl.u32 %v4655_v50, 16 }
  0x25   : > { %v613_v57 = vor.u32 %v611_v42, %v610_v48  ;;  %v615_v58 = vrot.slane %v610_v48, 4  ;;  %v923_v59 = vsel %vm4988_vm13, %v605_v46, %v922_v43  ;;  %v645_v3 = vshll.u32 %v4655_v50, 16 }
  0x26   : > { %924 = vst [vmem:[#allocation2 + $0xc] sm:$0xf] %v923_v59  ;;  %v444_v33 = vadd.f32 %v4938_v19, %v4973_v55  ;;  %2977 = vrot.lane.b32.xlu0 %v4499_v56, %s4843_s29  ;;  %v475_v6 = vmax.f32 %v4976_v0, 0.0  ;;  %v934_v10 = vsel %vm4896_vm3, %v632_v37, %v933_v54  ;;  %v639_v55 = vor.u32 %v637_v52, %v636_v62 }
  0x27   : > { %v614_v4 = vsel %vm4997_vm14, %v606_v47, %v613_v57  ;;  %v927_v9 = vsel %vm4896_vm3, %v615_v58, %v926_v53  ;;  %v640_v11 = vrot.slane %v636_v62, 4  ;;  %v5022_v14 = vrot.slane %v642_v2, 7  ;;  %935 = vst [vmem:[#allocation2 + $0x20] sm:$0x1] %v934_v10 }
  0x28   : > { %925 = vst.msk [vmem:[#allocation2 + $0x10] sm:$0xf] %vm237_vm0, %v614_v4  ;;  %v476_v15 = vmax.f32 %v444_v33, 0.0  ;;  %928 = vst [vmem:[#allocation2 + $0x14] sm:$0x1] %v927_v9  ;;  %v5026_v18 = vpack.c.bf16 %v475_v6, %v475_v6  ;;  %v315_v0 = vsel %vm4908_vm7, 0, %v314_v60  ;;  %v937_v26 = vsel %vm4988_vm13, %v639_v55, %v936_v5 }
  0x29   : > { %v318_v20 = vsel %vm4908_vm7, 0, %v317_v61  ;;  %v265_v21 = vsel %vm4896_vm3, 0, %v264_v63  ;;  %v647_v23 = vor.u32 %v645_v3, %v5022_v14  ;;  %v649_v24 = vrot.slane %v5022_v14, 4  ;;  %316 = vst [vmem:[#allocation2 + $0x2c] sm:$0x1] %v315_v0 }
  0x2a   : > { %v1650_v22 = vld [vmem:[#allocation2 + $0x18] sm:$0xf]  ;;  %v4657_v28 = vpack.c.bf16 %v476_v15, %v476_v15  ;;  %319 = vst [vmem:[#allocation2 + $0x38] sm:$0x1] %v318_v20  ;;  %266 = vst [vmem:[#allocation2 + $0x3c] sm:$0x1] %v265_v21  ;;  %v5045_v35 = vmul.f32 %v4931_v13, %v367_v16  ;;  %v5048_v36 = vmul.f32 %v4931_v13, %v368_v17 }
  0x2b   : > { %v5038_v27 = vld [vmem:[#allocation2 + $0x18] sm:$0xf]  ;;  %v5040_v29 = vld [vmem:[#allocation2 + $0x1c] sm:$0xf]  ;;  %v1721_v30 = vshrl.u32 %v1650_v22, 16  ;;  %v1724_v32 = vshll.u32 %v1650_v22, 16  ;;  %v648_v39 = vsel %vm4997_vm14, %v640_v11, %v647_v23 }
  0x2c   : > { %938 = vst [vmem:[#allocation2 + $0x24] sm:$0xf] %v937_v26  ;;  %v5042_v34 = vld [vmem:[#allocation2 + $0x1c] sm:$0xf]  ;;  %v1734_v37 = vshrl.u32 %v5040_v29, 16  ;;  %v4532_v38 = vcombine.low %v1650_v22, %v5040_v29  ;;  %v2306_v40 = vshrl.u32 %v5038_v27, 16 }
  0x2d   : > { %v5055_v41 = vrot.slane %v1721_v30, 4  ;;  %v5057_v42 = vrot.slane %v1724_v32, 5  ;;  %v1648_v43 = vld [vmem:[#allocation2 + $0xc] sm:$0xf]  ;;  %939 = vst.msk [vmem:[#allocation2 + $0x28] sm:$0xf] %vm237_vm0, %v648_v39  ;;  %v4579_v48 = vcombine.low %v5038_v27, %v5042_v34 }
  0x2e   : > { %v2309_v44 = vshll.u32 %v5038_v27, 16  ;;  %v2319_v13 = vshrl.u32 %v5042_v34, 16  ;;  %3155 = vrot.lane.b32.xlu1 %v4532_v38, %s4844_s30  ;;  %v1697_v45 = vshrl.u32 %v1648_v43, 16  ;;  %v1700_v46 = vshll.u32 %v1648_v43, 16  ;;  %v1470_v49 = vld [vmem:[#allocation2 + $0xc] sm:$0xe] }
  0x2f   : > { %v5063_v47 = vrot.slane %v2306_v40, 4  ;;  %v5067_v50 = vld [vmem:[#allocation2 + $0x10] sm:$0xf]  ;;  %v651_v52 = vshrl.u32 %v5026_v18, 16  ;;  %v654_v53 = vshll.u32 %v5026_v18, 16  ;;  %v659_v54 = vshrl.u32 %v4657_v28, 16 }
  0x30   : > { %v5069_v51 = vrot.slane %v2309_v44, 5  ;;  %v1710_v56 = vshrl.u32 %v5067_v50, 16  ;;  %v4531_v57 = vcombine.low %v1648_v43, %v5067_v50  ;;  %v5075_v58 = vrot.slane %v1697_v45, 4  ;;  %v5079_v60 = vld [vmem:[#allocation2 + $0x10] sm:$0xf] }
  0x31   : > { %v5077_v59 = vrot.slane %v1700_v46, 5  ;;  %v653_v61 = vrot.slane %v651_v52, 7  ;;  %v5081_v62 = vrot.slane %v659_v54, 7  ;;  %v662_v2 = vshll.u32 %v4657_v28, 16  ;;  %v943_v3 = vld [vmem:[#allocation2 + $0x30] sm:$0xf] }
  0x32   : > { %v5083_v33 = vld [vmem:[#allocation2 + $0x14] sm:$0x1]  ;;  %v4436_v63 = vrot.slane %v1470_v49, 9  ;;  %3153 = vrot.lane.b32.xlu0 %v4531_v57, %s4844_s30  ;;  %v1545_v6 = vrot.slane %v5079_v60, 5  ;;  %v1727_v10 = vor.u32 %v5057_v42, %v5055_v41  ;;  %v2081_v0 = vld [vmem:[#allocation2 + $0x18] sm:$0xe] }
  0x33   : > { %v2259_v4 = vld [vmem:[#allocation2 + $0x24] sm:$0xf]  ;;  %v1548_v9 = vrot.slane %v5083_v33, 5  ;;  %v1703_v55 = vor.u32 %v5077_v59, %v5075_v58  ;;  %v656_v16 = vor.u32 %v654_v53, %v653_v61  ;;  %v657_v17 = vrot.slane %v653_v61, 4  ;;  %v5092_v18 = vld [vmem:[#allocation2 + $0x14] sm:$0x1] }
  0x34   : > { %v1652_v5 = vld [vmem:[#allocation2 + $0x24] sm:$0xf]  ;;  %v2330_v11 = vshrl.u32 %v2259_v4, 16  ;;  %v2333_v15 = vshll.u32 %v2259_v4, 16  ;;  %v5094_v20 = vld [vmem:[#allocation2 + $0x28] sm:$0xf]  ;;  %v664_v21 = vor.u32 %v662_v2, %v5081_v62  ;;  %v5102_v27 = vsel %vm4917_vm8, %v4436_v63, %v1545_v6 }
  0x35   : > { %v5098_v23 = vld [vmem:[#allocation2 + $0x28] sm:$0xf]  ;;  %v1745_v26 = vshrl.u32 %v1652_v5, 16  ;;  %v2343_v32 = vshrl.u32 %v5094_v20, 16  ;;  %v4580_v38 = vcombine.low %v2259_v4, %v5094_v20  ;;  %v2080_v39 = vld [vmem:[#allocation2 + $0xc] sm:$0xe]  ;;  %v944_v43 = vsel %vm4988_vm13, %v656_v16, %v943_v3 }
  0x36   : > { %v5104_v28 = vrot.slane %v2330_v11, 4  ;;  %v5106_v30 = vrot.slane %v2333_v15, 5  ;;  %3409 = vrot.lane.b32.xlu0 %v4579_v48, %s4845_s6  ;;  %v665_v40 = vsel %vm4997_vm14, %v657_v17, %v664_v21  ;;  %v1748_v45 = vshll.u32 %v1652_v5, 16  ;;  %v5117_v46 = vld [vmem:[#allocation2 + $0x20] sm:$0x1] }
  0x37   : > { %v5115_v44 = vrot.slane %v1745_v26, 4  ;;  %v2689_v49 = vld [vmem:[#allocation2 + $0x18] sm:$0xe]  ;;  %3411 = vrot.lane.b32.xlu1 %v4580_v38, %s4845_s6  ;;  %945 = vst [vmem:[#allocation2 + $0x30] sm:$0xf] %v944_v43  ;;  %v4533_v48 = vcombine.low %v1652_v5, %v5098_v23  ;;  %v1547_v53 = vrot.slane %v1545_v6, 4 }
  0x38   : > { %946 = vst.msk [vmem:[#allocation2 + $0x34] sm:$0xf] %vm237_vm0, %v665_v40  ;;  %v4451_v54 = vrot.slane %v2080_v39, 9  ;;  %v5123_v57 = vld [vmem:[#allocation2 + $0x20] sm:$0x1]  ;;  %v5125_v61 = vrot.slane %v1748_v45, 5 }
  0x39   : > { %v2146_v2 = vrot.slane %v5067_v50, 5  ;;  %v2149_v3 = vrot.slane %v5092_v18, 5  ;;  %v4452_v63 = vrot.slane %v2081_v0, 9  ;;  %v940_v4 = vld [vmem:[#allocation2 + $0x2c] sm:$0x1]  ;;  %v5131_v11 = vsel %vm4917_vm8, %v1547_v53, %v1548_v9 }
  0x3a   : > { %v2153_v15 = vrot.slane %v5040_v29, 5  ;;  %v2156_v5 = vrot.slane %v5117_v46, 5  ;;  %v4467_v6 = vrot.slane %v2689_v49, 9  ;;  %v1472_v16 = vld [vmem:[#allocation2 + $0x24] sm:$0xe]  ;;  %3157 = vrot.lane.b32.xlu0 %v4533_v48, %s4844_s30  ;;  %v4516_v17 = vcombine.low %v5102_v27, %v5131_v11 }
  0x3b   : > { %v2147_v21 = vsel %vm4917_vm8, %v4451_v54, %v2146_v2  ;;  %v2148_v0 = vrot.slane %v2146_v2, 4  ;;  %v2755_v26 = vrot.slane %v5042_v34, 5  ;;  %v5141_v38 = vld [vmem:[#allocation2 + $0x28] sm:$0xf]  ;;  %v2690_v9 = vld [vmem:[#allocation2 + $0x24] sm:$0xe]  ;;  %v941_v27 = vsel %vm4896_vm3, %v649_v24, %v940_v4 }
  0x3c   : > { %v5145_v39 = vsel %vm4917_vm8, %v4452_v63, %v2153_v15  ;;  %v2155_v40 = vrot.slane %v2153_v15, 4  ;;  %v2758_v43 = vrot.slane %v5123_v57, 5  ;;  %942 = vst [vmem:[#allocation2 + $0x2c] sm:$0x1] %v941_v27  ;;  %v4438_v53 = vrot.slane %v1472_v16, 9 }
  0x3d   : > { %v2150_v45 = vsel %vm4917_vm8, %v2148_v0, %v2149_v3  ;;  %v2756_v49 = vsel %vm4917_vm8, %v4467_v6, %v2755_v26  ;;  %v2757_v48 = vrot.slane %v2755_v26, 4  ;;  %v1559_v63 = vrot.slane %v5141_v38, 5  ;;  %v5159_v14 = vld [vmem:[#allocation2 + $0x1c] sm:$0xf]  ;;  %v5177_v41 = vld [vmem:[#allocation2 + $0x20] sm:$0x1] }
  0x3e   : > { %v4563_v54 = vcombine.low %v2147_v21, %v2150_v45  ;;  %v2157_v2 = vsel %vm4917_vm8, %v2155_v40, %v2156_v5  ;;  %v4468_v11 = vrot.slane %v2690_v9, 9  ;;  %v1654_v15 = vld [vmem:[#allocation2 + $0x30] sm:$0xf]  ;;  %v2762_v6 = vrot.slane %v5094_v20, 5  ;;  %v1471_v9 = vld [vmem:[#allocation2 + $0x18] sm:$0xe] }
  0x3f   : > { %v5161_v24 = vld [vmem:[#allocation2 + $0x34] sm:$0xf]  ;;  %v4564_v3 = vcombine.low %v5145_v39, %v2157_v2  ;;  %v2759_v4 = vsel %vm4917_vm8, %v2757_v48, %v2758_v43  ;;  %v1728_v16 = vrot.slane %v1727_v10, 4  ;;  %v1769_v5 = vshrl.u32 %v1654_v15, 16  ;;  %v1036_v52 = vld [vmem:[#allocation2 + $0xc] sm:$0xf] }
  0x40   : > { %v1772_v21 = vshll.u32 %v1654_v15, 16  ;;  %v4534_v26 = vcombine.low %v1654_v15, %v5161_v24  ;;  %3313 = vrot.lane.b32.xlu0 %v4563_v54, %s4846_s7  ;;  %v4611_v39 = vcombine.low %v2756_v49, %v2759_v4  ;;  %v1560_v40 = vsel %vm4917_vm8, %v4438_v53, %v1559_v63 }
  0x41   : > { %v1561_v43 = vrot.slane %v1559_v63, 4  ;;  %v2763_v27 = vsel %vm4917_vm8, %v4468_v11, %v2762_v6  ;;  %v5179_v42 = vrot.slane %v1769_v5, 4  ;;  %v2764_v45 = vrot.slane %v2762_v6, 4 }
  0x42   : > { %v5181_v10 = vrot.slane %v1772_v21, 5  ;;  %3159 = vrot.lane.b32.xlu1 %v4534_v26, %s4844_s30  ;;  %v1730_v48 = vshll.u32 %v5040_v29, 16  ;;  %v1736_v49 = vrot.slane %v1734_v37, 4  ;;  %v1740_v53 = vshll.u32 %v5117_v46, 16 }
  0x43   : > { %v4437_v54 = vrot.slane %v1471_v9, 9  ;;  %v1552_v2 = vrot.slane %v5159_v14, 5  ;;  %v5190_v63 = vld [vmem:[#allocation2 + $0x2c] sm:$0x1]  ;;  %v1555_v4 = vrot.slane %v5177_v41, 5  ;;  %v2336_v6 = vor.u32 %v5106_v30, %v5104_v28 }
  0x44   : > { %3569 = vrot.lane.b32.xlu0 %v4611_v39, %s4847_s8  ;;  %v2290_v11 = vld [vmem:[#allocation2 + $0x2c] sm:$0x1]  ;;  %v1732_v15 = vrot.slane %v1730_v48, 5  ;;  %v2312_v29 = vor.u32 %v5069_v51, %v5063_v47  ;;  %v1562_v37 = vrot.slane %v5190_v63, 5  ;;  %v1742_v5 = vrot.slane %v1740_v53, 5 }
  0x45   : > { %v2765_v46 = vrot.slane %v2290_v11, 5  ;;  %v1553_v21 = vsel %vm4917_vm8, %v4437_v54, %v1552_v2  ;;  %v1554_v39 = vrot.slane %v1552_v2, 4  ;;  %v2337_v48 = vrot.slane %v2336_v6, 4 }
  0x46   : > { %3059 = vrot.lane.b32.xlu1 %v4516_v17, %s4842_s28  ;;  %v1733_v26 = vsel %vm4980_vm12, %v1728_v16, %v1732_v15  ;;  %v1737_v9 = vor.u32 %v1736_v49, %v1732_v15  ;;  %v1563_v28 = vsel %vm4917_vm8, %v1561_v43, %v1562_v37  ;;  %v2339_v53 = vshll.u32 %v5094_v20, 16 }
  0x47   : > { %v2766_v30 = vsel %vm4917_vm8, %v2764_v45, %v2765_v46  ;;  %v2345_v54 = vrot.slane %v2343_v32, 4  ;;  %v4518_v0 = vcombine.low %v1560_v40, %v1563_v28  ;;  %v1556_v16 = vsel %vm4917_vm8, %v1554_v39, %v1555_v4  ;;  %v1038_v40 = vld [vmem:[#allocation2 + $0x18] sm:$0xf] }
  0x48   : > { %v4612_v17 = vcombine.low %v2763_v27, %v2766_v30  ;;  %v1738_v22 = vrot.slane %v1737_v9, 4  ;;  %v4517_v49 = vcombine.low %v1553_v21, %v1556_v16  ;;  %v2341_v2 = vrot.slane %v2339_v53, 5 }
  0x49   : > { %v2349_v15 = vshll.u32 %v2290_v11, 16  ;;  %v1110_v6 = vshrl.u32 %v1036_v52, 16  ;;  %v1113_v45 = vshll.u32 %v1036_v52, 16  ;;  %v1119_v20 = vshll.u32 %v5079_v60, 16 }
  0x4a   : > { %3315 = vrot.lane.b32.xlu1 %v4564_v3, %s4846_s7  ;;  %3571 = vrot.lane.b32.xlu0 %v4612_v17, %s4847_s8  ;;  %v1743_v43 = vsel %vm4980_vm12, %v1738_v22, %v1742_v5  ;;  %v1123_v32 = vshrl.u32 %v5079_v60, 16  ;;  %v2342_v4 = vsel %vm4980_vm12, %v2337_v48, %v2341_v2  ;;  %v2346_v37 = vor.u32 %v2345_v54, %v2341_v2 }
  0x4b   : > { %v4548_v27 = vcombine.low %v1733_v26, %v1743_v43  ;;  %v2351_v11 = vrot.slane %v2349_v15, 5  ;;  %v1112_v46 = vrot.slane %v1110_v6, 4  ;;  %v1115_v21 = vrot.slane %v1113_v45, 5  ;;  %v1040_v45 = vld [vmem:[#allocation2 + $0x24] sm:$0xf] }
  0x4c   : > { %v1121_v3 = vrot.slane %v1119_v20, 5  ;;  %v1125_v9 = vrot.slane %v1123_v32, 4  ;;  %v2347_v39 = vrot.slane %v2346_v37, 4  ;;  %v1129_v28 = vshll.u32 %v5083_v33, 16 }
  0x4d   : > { %v1134_v22 = vshrl.u32 %v1038_v40, 16  ;;  %v1137_v52 = vshll.u32 %v1038_v40, 16  ;;  %v1116_v60 = vor.u32 %v1115_v21, %v1112_v46  ;;  %v1143_v26 = vshll.u32 %v5159_v14, 16 }
  0x4e   : > { %3063 = vrot.lane.b32.xlu1 %v4518_v0, %s4842_s28  ;;  %3061 = vrot.lane.b32.xlu0 %v4517_v49, %s4842_s28  ;;  %v1126_v5 = vor.u32 %v1125_v9, %v1121_v3  ;;  %v1147_v48 = vshrl.u32 %v5159_v14, 16  ;;  %v2352_v30 = vsel %vm4980_vm12, %v2347_v39, %v2351_v11  ;;  %v1131_v53 = vrot.slane %v1129_v28, 5 }
  0x4f   : > { %v1136_v54 = vrot.slane %v1134_v22, 4  ;;  %v1139_v17 = vrot.slane %v1137_v52, 5  ;;  %v4596_v16 = vcombine.low %v2342_v4, %v2352_v30  ;;  %v1117_v33 = vrot.slane %v1116_v60, 4 }
  0x50   : > { %v1127_v2 = vrot.slane %v1126_v5, 4  ;;  %v1145_v15 = vrot.slane %v1143_v26, 5  ;;  %v1149_v0 = vrot.slane %v1147_v48, 4  ;;  %v1153_v49 = vshll.u32 %v5177_v41, 16  ;;  %v947_v5 = vld [vmem:[#allocation2 + $0x38] sm:$0x1] }
  0x51   : > { %v1140_v6 = vor.u32 %v1139_v17, %v1136_v54  ;;  %v1704_v43 = vrot.slane %v1703_v55, 4  ;;  %v1122_v14 = vsel %vm4980_vm12, %v1117_v33, %v1121_v3  ;;  %v1706_v32 = vshll.u32 %v5067_v50, 16 }
  0x52   : > { %3235 = vrot.lane.b32.xlu1 %v4548_v27, %s4848_s9  ;;  %v1132_v20 = vsel %vm4980_vm12, %v1127_v2, %v1131_v53  ;;  %v1712_v40 = vrot.slane %v1710_v56, 4  ;;  %v1150_v37 = vor.u32 %v1149_v0, %v1145_v15  ;;  %v1155_v58 = vrot.slane %v1153_v49, 5 }
  0x53   : > { %v4500_v41 = vcombine.low %v1122_v14, %v1132_v20  ;;  %v1141_v4 = vrot.slane %v1140_v6, 4  ;;  %v1708_v59 = vrot.slane %v1706_v32, 5  ;;  %v1716_v55 = vshll.u32 %v5092_v18, 16 }
  0x54   : > { %v1158_v11 = vshrl.u32 %v1040_v45, 16  ;;  %v1161_v27 = vshll.u32 %v1040_v45, 16  ;;  %v1151_v21 = vrot.slane %v1150_v37, 4  ;;  %v1167_v3 = vshll.u32 %v5141_v38, 16 }
  0x55   : > { %2979 = vrot.lane.b32.xlu0 %v4500_v41, %s4843_s29  ;;  %v1146_v46 = vsel %vm4980_vm12, %v1141_v4, %v1145_v15  ;;  %v1171_v50 = vshrl.u32 %v5141_v38, 16  ;;  %v1709_v56 = vsel %vm4980_vm12, %v1704_v43, %v1708_v59  ;;  %v1713_v9 = vor.u32 %v1712_v40, %v1708_v59  ;;  %v2083_v40 = vld [vmem:[#allocation2 + $0x30] sm:$0xe] }
  0x56   : > { %3491 = vrot.lane.b32.xlu1 %v4596_v16, %s4849_s10  ;;  %v1718_v18 = vrot.slane %v1716_v55, 5  ;;  %v1160_v39 = vrot.slane %v1158_v11, 4  ;;  %v1156_v28 = vsel %vm4980_vm12, %v1151_v21, %v1155_v58  ;;  %v1163_v22 = vrot.slane %v1161_v27, 5  ;;  %v2082_v27 = vld [vmem:[#allocation2 + $0x24] sm:$0xe] }
  0x57   : > { %v1169_v52 = vrot.slane %v1167_v3, 5  ;;  %v1173_v60 = vrot.slane %v1171_v50, 4  ;;  %v4501_v26 = vcombine.low %v1146_v46, %v1156_v28  ;;  %v1714_v48 = vrot.slane %v1713_v9, 4 }
  0x58   : > { %v1177_v38 = vshll.u32 %v5190_v63, 16  ;;  %v2313_v30 = vrot.slane %v2312_v29, 4  ;;  %v1164_v53 = vor.u32 %v1163_v22, %v1160_v39  ;;  %v2315_v17 = vshll.u32 %v5042_v34, 16 }
  0x59   : > { %v1174_v54 = vor.u32 %v1173_v60, %v1169_v52  ;;  %v2321_v16 = vrot.slane %v2319_v13, 4  ;;  %v1719_v33 = vsel %vm4980_vm12, %v1714_v48, %v1718_v18  ;;  %v2325_v15 = vshll.u32 %v5123_v57, 16  ;;  %v1682_v57 = vld [vmem:[#allocation2 + $0x2c] sm:$0x1] }
  0x5a   : > { %2981 = vrot.lane.b32.xlu1 %v4501_v26, %s4843_s29  ;;  %v1179_v2 = vrot.slane %v1177_v38, 5  ;;  %v6922_v63 = vrot.slane %v5081_v62, 4  ;;  %v4547_v51 = vcombine.low %v1709_v56, %v1719_v33  ;;  %v1165_v29 = vrot.slane %v1164_v53, 4  ;;  %v5293_v38 = vld [vmem:[#allocation2 + $0x30] sm:$0xf] }
  0x5b   : > { %v1175_v6 = vrot.slane %v1174_v54, 4  ;;  %v2317_v0 = vrot.slane %v2315_v17, 5  ;;  %v2327_v34 = vrot.slane %v2325_v15, 5  ;;  %v1775_v13 = vor.u32 %v5181_v10, %v5179_v42 }
  0x5c   : > { %v948_v47 = vsel %vm4896_vm3, %v6922_v63, %v947_v5  ;;  %v1778_v49 = vshll.u32 %v5161_v24, 16  ;;  %v6923_v43 = vshrl.u32 %v5161_v24, 16  ;;  %3233 = vrot.lane.b32.xlu0 %v4547_v51, %s4848_s9  ;;  %v1170_v62 = vsel %vm4980_vm12, %v1165_v29, %v1169_v52  ;;  %v5304_v63 = vld [vmem:[#allocation2 + $0x34] sm:$0xf] }
  0x5d   : > { %949 = vst [vmem:[#allocation2 + $0x38] sm:$0x1] %v948_v47  ;;  %v1180_v14 = vsel %vm4980_vm12, %v1175_v6, %v1179_v2  ;;  %v2318_v20 = vsel %vm4980_vm12, %v2313_v30, %v2317_v0  ;;  %v2322_v32 = vor.u32 %v2321_v16, %v2317_v0  ;;  %v1776_v10 = vrot.slane %v1775_v13, 4 }
  0x5e   : > { %v1784_v45 = vrot.slane %v6923_v43, 4  ;;  %v4502_v42 = vcombine.low %v1170_v62, %v1180_v14  ;;  %v1780_v41 = vrot.slane %v1778_v49, 5  ;;  %v1751_v4 = vor.u32 %v5125_v61, %v5115_v44 }
  0x5f   : > { %v2323_v37 = vrot.slane %v2322_v32, 4  ;;  %v1754_v58 = vshll.u32 %v5098_v23, 16  ;;  %v6924_v59 = vshrl.u32 %v5098_v23, 16  ;;  %v1764_v11 = vshll.u32 %v1682_v57, 16 }
  0x60   : > { %2983 = vrot.lane.b32.xlu1 %v4502_v42, %s4843_s29  ;;  %v1781_v46 = vsel %vm4980_vm12, %v1776_v10, %v1780_v41  ;;  %v1785_v21 = vor.u32 %v1784_v45, %v1780_v41  ;;  %v1752_v3 = vrot.slane %v1751_v4, 4  ;;  %v4454_v50 = vrot.slane %v2083_v40, 9 }
  0x61   : > { %v1760_v55 = vrot.slane %v6924_v59, 4  ;;  %v2328_v56 = vsel %vm4980_vm12, %v2323_v37, %v2327_v34  ;;  %v1756_v44 = vrot.slane %v1754_v58, 5  ;;  %v1766_v61 = vrot.slane %v1764_v11, 5  ;;  %v320_v34 = vld [vmem:[#allocation2 + $0x44] sm:$0x1] }
  0x62   : > { %v2167_v9 = vrot.slane %v5161_v24, 5  ;;  %v4595_v18 = vcombine.low %v2318_v20, %v2328_v56  ;;  %v1786_v28 = vrot.slane %v1785_v21, 4  ;;  %v4453_v22 = vrot.slane %v2082_v27, 9  ;;  %v1042_v20 = vld [vmem:[#allocation2 + $0x30] sm:$0xf] }
  0x63   : > { %v2160_v52 = vrot.slane %v5098_v23, 5  ;;  %v1757_v5 = vsel %vm4980_vm12, %v1752_v3, %v1756_v44  ;;  %v1761_v26 = vor.u32 %v1760_v55, %v1756_v44  ;;  %v2163_v16 = vrot.slane %v1682_v57, 5  ;;  %v1043_v27 = vld [vmem:[#allocation2 + $0x34] sm:$0xf] }
  0x64   : > { %v1683_v39 = vld [vmem:[#allocation2 + $0x38] sm:$0x1]  ;;  %v2168_v48 = vsel %vm4917_vm8, %v4454_v50, %v2167_v9  ;;  %3489 = vrot.lane.b32.xlu0 %v4595_v18, %s4849_s10  ;;  %v2169_v30 = vrot.slane %v2167_v9, 4  ;;  %v445_v33 = vadd.f32 %v4938_v19, %v5045_v35  ;;  %v446_v15 = vadd.f32 %v4938_v19, %v5048_v36 }
  0x65   : > { %v1788_v60 = vshll.u32 %v1683_v39, 16  ;;  %v2170_v24 = vrot.slane %v1683_v39, 5  ;;  %v2161_v53 = vsel %vm4917_vm8, %v4453_v22, %v2160_v52  ;;  %v2162_v54 = vrot.slane %v2160_v52, 4  ;;  %v5314_v43 = vld [vmem:[#allocation2 + $0x38] sm:$0x1] }
  0x66   : > { %v1762_v23 = vrot.slane %v1761_v26, 4  ;;  %v2354_v47 = vshrl.u32 %v5293_v38, 16  ;;  %v2357_v51 = vshll.u32 %v5293_v38, 16  ;;  %v477_v36 = vmax.f32 %v445_v33, 0.0  ;;  %v1070_v52 = vld [vmem:[#allocation2 + $0x38] sm:$0x1] }
  0x67   : > { %v1790_v17 = vrot.slane %v1788_v60, 5  ;;  %v2171_v2 = vsel %vm4917_vm8, %v2169_v30, %v2170_v24  ;;  %v2164_v35 = vsel %vm4917_vm8, %v2162_v54, %v2163_v16  ;;  %v478_v45 = vmax.f32 %v446_v15, 0.0 }
  0x68   : > { %v1767_v6 = vsel %vm4980_vm12, %v1762_v23, %v1766_v61  ;;  %v4566_v0 = vcombine.low %v2168_v48, %v2171_v2  ;;  %v4565_v19 = vcombine.low %v2161_v53, %v2164_v35  ;;  %v2356_v57 = vrot.slane %v2354_v47, 4  ;;  %v950_v61 = vld [vmem:[#allocation2 + $0x3c] sm:$0xf]  ;;  %v2691_v23 = vld [vmem:[#allocation2 + $0x30] sm:$0xe] }
  0x69   : > { %v1791_v29 = vsel %vm4980_vm12, %v1786_v28, %v1790_v17  ;;  %v4549_v49 = vcombine.low %v1757_v5, %v1767_v6  ;;  %v2359_v62 = vrot.slane %v2357_v51, 5  ;;  %v2367_v14 = vshrl.u32 %v5304_v63, 16  ;;  %v1473_v51 = vld [vmem:[#allocation2 + $0x30] sm:$0xe] }
  0x6a   : > { %v4550_v13 = vcombine.low %v1781_v46, %v1791_v29  ;;  %v4658_v32 = vpack.c.bf16 %v477_v36, %v477_v36  ;;  %v4581_v40 = vcombine.low %v5293_v38, %v5304_v63  ;;  %v321_v42 = vsel %vm4908_vm7, 0, %v320_v34  ;;  %v267_v36 = vld [vmem:[#allocation2 + $0x48] sm:$0x1] }
  0x6b   : > { %3237 = vrot.lane.b32.xlu0 %v4549_v49, %s4848_s9  ;;  %v2363_v10 = vshll.u32 %v5304_v63, 16  ;;  %v4659_v41 = vpack.c.bf16 %v478_v45, %v478_v45  ;;  %322 = vst [vmem:[#allocation2 + $0x44] sm:$0x1] %v321_v42  ;;  %v2360_v4 = vor.u32 %v2359_v62, %v2356_v57  ;;  %v2369_v37 = vrot.slane %v2367_v14, 4 }
  0x6c   : > { %3239 = vrot.lane.b32.xlu1 %v4550_v13, %s4848_s9  ;;  %v2373_v58 = vshll.u32 %v5314_v43, 16  ;;  %v668_v59 = vshrl.u32 %v4658_v32, 16  ;;  %v671_v55 = vshll.u32 %v4658_v32, 16  ;;  %v1182_v46 = vshrl.u32 %v1042_v20, 16  ;;  %v370_v32 = vld [vmem:[%s4926_s23 + $0x58] sm:$0xff] }
  0x6d   : > { %v2365_v11 = vrot.slane %v2363_v10, 5  ;;  %v676_v21 = vshrl.u32 %v4659_v41, 16  ;;  %v679_v3 = vshll.u32 %v4659_v41, 16  ;;  %v2361_v50 = vrot.slane %v2360_v4, 4  ;;  %v323_v41 = vld [vmem:[#allocation2 + $0x50] sm:$0x1] }
  0x6e   : > { %v2375_v56 = vrot.slane %v2373_v58, 5  ;;  %v670_v44 = vrot.slane %v668_v59, 7  ;;  %v1184_v18 = vrot.slane %v1182_v46, 4  ;;  %v1185_v39 = vshll.u32 %v1042_v20, 16  ;;  %v369_v20 = vld [vmem:[%s4926_s23 + $0x50] sm:$0xff] }
  0x6f   : > { %3317 = vrot.lane.b32.xlu0 %v4565_v19, %s4846_s7  ;;  %v2370_v9 = vor.u32 %v2369_v37, %v2365_v11  ;;  %v678_v28 = vrot.slane %v676_v21, 7  ;;  %v2366_v22 = vsel %vm4980_vm12, %v2361_v50, %v2365_v11  ;;  %v1191_v60 = vshll.u32 %v1043_v27, 16  ;;  %v270_v4 = vld [vmem:[#allocation2 + $0x54] sm:$0x1]  ;;  %v5364_v46 = vld [vmem:[%s6905_s1] ss:$0 sm:$0xff] }
  0x70   : > { %3319 = vrot.lane.b32.xlu1 %v4566_v0, %s4846_s7  ;;  %v1195_v5 = vshrl.u32 %v1043_v27, 16  ;;  %v673_v26 = vor.u32 %v671_v55, %v670_v44  ;;  %v674_v48 = vrot.slane %v670_v44, 4  ;;  %v1187_v30 = vrot.slane %v1185_v39, 5  ;;  %v371_v55 = vld [vmem:[%s4926_s23 + $0x60] sm:$0xff]  ;;  %v372_v50 = vld [vmem:[%s4926_s23 + $0x68] sm:$0xff] }
  0x71   : > { %v2371_v38 = vrot.slane %v2370_v9, 4  ;;  %v681_v24 = vor.u32 %v679_v3, %v678_v28  ;;  %v683_v53 = vrot.slane %v678_v28, 4  ;;  %v1193_v54 = vrot.slane %v1191_v60, 5 }
  0x72   : > { %v1197_v17 = vrot.slane %v1195_v5, 4  ;;  %v951_v16 = vsel %vm4988_vm13, %v673_v26, %v950_v61  ;;  %v954_v33 = vld [vmem:[#allocation2 + $0x44] sm:$0x1]  ;;  %v1188_v15 = vor.u32 %v1187_v30, %v1184_v18  ;;  %v1201_v47 = vshll.u32 %v1070_v52, 16 }
  0x73   : > { %3413 = vrot.lane.b32.xlu0 %v4581_v40, %s4845_s6  ;;  %v2376_v2 = vsel %vm4980_vm12, %v2371_v38, %v2375_v56  ;;  %v682_v29 = vsel %vm4997_vm14, %v674_v48, %v681_v24  ;;  %952 = vst [vmem:[#allocation2 + $0x3c] sm:$0xf] %v951_v16  ;;  %v955_v6 = vsel %vm4896_vm3, %v683_v53, %v954_v33  ;;  %v4469_v49 = vrot.slane %v2691_v23, 9  ;;  %v373_v56 = vld [vmem:[%s4926_s23 + $0x70] sm:$0xff] }
  0x74   : > { %v4597_v0 = vcombine.low %v2366_v22, %v2376_v2  ;;  %v1198_v35 = vor.u32 %v1197_v17, %v1193_v54  ;;  %953 = vst.msk [vmem:[#allocation2 + $0x40] sm:$0xf] %vm237_vm0, %v682_v29  ;;  %956 = vst [vmem:[#allocation2 + $0x44] sm:$0x1] %v955_v6  ;;  %v1189_v34 = vrot.slane %v1188_v15, 4  ;;  %v1203_v13 = vrot.slane %v1201_v47, 5 }
  0x75   : > { %v2769_v19 = vrot.slane %v5304_v63, 5  ;;  %v2772_v57 = vrot.slane %v5314_v43, 5  ;;  %v4439_v62 = vrot.slane %v1473_v51, 9  ;;  %v1566_v14 = vrot.slane %v1043_v27, 5 }
  0x76   : > { %v1199_v45 = vrot.slane %v1198_v35, 4  ;;  %v1194_v40 = vsel %vm4980_vm12, %v1189_v34, %v1193_v54  ;;  %v1569_v63 = vrot.slane %v1070_v52, 5  ;;  %v268_v59 = vsel %vm4896_vm3, 0, %v267_v36  ;;  %v5383_v52 = vld [vmem:[%s6906_s2] ss:$0 sm:$0xff] }
  0x77   : > { %3493 = vrot.lane.b32.xlu0 %v4597_v0, %s4849_s10  ;;  %v2770_v42 = vsel %vm4917_vm8, %v4469_v49, %v2769_v19  ;;  %v2771_v10 = vrot.slane %v2769_v19, 4  ;;  %v5352_v37 = vsel %vm4917_vm8, %v4439_v62, %v1566_v14  ;;  %v1568_v58 = vrot.slane %v1566_v14, 4  ;;  %269 = vst [vmem:[#allocation2 + $0x48] sm:$0x1] %v268_v59 }
  0x78   : > { %v1204_v43 = vsel %vm4980_vm12, %v1199_v45, %v1203_v13  ;;  %v408_v21 = vmul.f32 %v5364_v46, %v369_v20  ;;  %v409_v3 = vmul.f32 %v5364_v46, %v370_v32  ;;  %v324_v9 = vsel %vm4908_vm7, 0, %v323_v41 }
  0x79   : > { %v5357_v11 = vcombine.low %v1194_v40, %v1204_v43  ;;  %v2773_v27 = vsel %vm4917_vm8, %v2771_v10, %v2772_v57  ;;  %v5372_v61 = vsel %vm4917_vm8, %v1568_v58, %v1569_v63  ;;  %v271_v18 = vsel %vm4896_vm3, 0, %v270_v4  ;;  %325 = vst [vmem:[#allocation2 + $0x50] sm:$0x1] %v324_v9 }
  0x7a   : > { %v4613_v44 = vcombine.low %v2770_v42, %v2773_v27  ;;  %v2263_v39 = vld [vmem:[#allocation2 + $0x3c] sm:$0xf]  ;;  %v4519_v22 = vcombine.low %v5352_v37, %v5372_v61  ;;  %v5386_v60 = vadd.f32 %v5383_v52, %v408_v21  ;;  %v5389_v5 = vadd.f32 %v5383_v52, %v409_v3  ;;  %272 = vst [vmem:[#allocation2 + $0x54] sm:$0x1] %v271_v18 }
  0x7b   : > { %v1044_v28 = vld [vmem:[#allocation2 + $0x3c] sm:$0xf]  ;;  %v5392_v26 = vmul.f32 %v5364_v46, %v371_v55  ;;  %v2264_v48 = vld [vmem:[#allocation2 + $0x40] sm:$0xf]  ;;  %v2378_v38 = vshrl.u32 %v2263_v39, 16  ;;  %v2381_v30 = vshll.u32 %v2263_v39, 16  ;;  %v5396_v54 = vmul.f32 %v5364_v46, %v372_v50 }
  0x7c   : > { %v2292_v24 = vld [vmem:[#allocation2 + $0x44] sm:$0x1]  ;;  %3573 = vrot.lane.b32.xlu0 %v4613_v44, %s4847_s8  ;;  %v2692_v53 = vld [vmem:[#allocation2 + $0x3c] sm:$0xe]  ;;  %v5399_v17 = vmul.f32 %v5364_v46, %v373_v56  ;;  %v2391_v23 = vshrl.u32 %v2264_v48, 16  ;;  %v4582_v16 = vcombine.low %v2263_v39, %v2264_v48  ;;  %v2387_v33 = vshll.u32 %v2264_v48, 16 }
  0x7d   : > { %v2397_v2 = vshll.u32 %v2292_v24, 16  ;;  %v1045_v15 = vld [vmem:[#allocation2 + $0x40] sm:$0xf]  ;;  %v2380_v47 = vrot.slane %v2378_v38, 4  ;;  %v2383_v51 = vrot.slane %v2381_v30, 5  ;;  %v1206_v6 = vshrl.u32 %v1044_v28, 16 }
  0x7e   : > { %v1071_v29 = vld [vmem:[#allocation2 + $0x44] sm:$0x1]  ;;  %v1209_v0 = vshll.u32 %v1044_v28, 16  ;;  %3415 = vrot.lane.b32.xlu1 %v4582_v16, %s4845_s6  ;;  %v2389_v35 = vrot.slane %v2387_v33, 5  ;;  %v2393_v34 = vrot.slane %v2391_v23, 4  ;;  %v1215_v49 = vshll.u32 %v1045_v15, 16 }
  0x7f   : > { %v2399_v13 = vrot.slane %v2397_v2, 5  ;;  %v2384_v19 = vor.u32 %v2383_v51, %v2380_v47  ;;  %v1208_v36 = vrot.slane %v1206_v6, 4  ;;  %v1219_v57 = vshrl.u32 %v1045_v15, 16  ;;  %v1474_v62 = vld [vmem:[#allocation2 + $0x3c] sm:$0xe] }
  0x80   : > { %v1211_v45 = vrot.slane %v1209_v0, 5  ;;  %v2394_v14 = vor.u32 %v2393_v34, %v2389_v35  ;;  %v1217_v20 = vrot.slane %v1215_v49, 5  ;;  %v1225_v32 = vshll.u32 %v1071_v29, 16  ;;  %v5408_v18 = vld [vmem:[#allocation2 + $0x3c] sm:$0xf] }
  0x81   : > { %v4470_v40 = vrot.slane %v2692_v53, 9  ;;  %v2385_v42 = vrot.slane %v2384_v19, 4  ;;  %v1221_v63 = vrot.slane %v1219_v57, 4  ;;  %v2776_v41 = vrot.slane %v2264_v48, 5  ;;  %v5429_v0 = vld [vmem:[#allocation2 + $0x44] sm:$0x1] }
  0x82   : > { %v1212_v10 = vor.u32 %v1211_v45, %v1208_v36  ;;  %v2395_v4 = vrot.slane %v2394_v14, 4  ;;  %v1227_v43 = vrot.slane %v1225_v32, 5  ;;  %v2779_v58 = vrot.slane %v2292_v24, 5  ;;  %v2084_v49 = vld [vmem:[#allocation2 + $0x3c] sm:$0xe] }
  0x83   : > { %v4440_v59 = vrot.slane %v1474_v62, 9  ;;  %v2390_v55 = vsel %vm4980_vm12, %v2385_v42, %v2389_v35  ;;  %v1222_v21 = vor.u32 %v1221_v63, %v1217_v20  ;;  %v2777_v3 = vsel %vm4917_vm8, %v4470_v40, %v2776_v41  ;;  %v957_v42 = vld [vmem:[#allocation2 + $0x48] sm:$0xf] }
  0x84   : > { %v1213_v27 = vrot.slane %v1212_v10, 4  ;;  %v2400_v50 = vsel %vm4980_vm12, %v2395_v4, %v2399_v13  ;;  %v2778_v56 = vrot.slane %v2776_v41, 4  ;;  %v1573_v44 = vrot.slane %v1045_v15, 5  ;;  %v1657_v15 = vld [vmem:[#allocation2 + $0x40] sm:$0xf] }
  0x85   : > { %v1576_v9 = vrot.slane %v1071_v29, 5  ;;  %v4598_v39 = vcombine.low %v2390_v55, %v2400_v50  ;;  %v1223_v48 = vrot.slane %v1222_v21, 4  ;;  %v479_v38 = vmax.f32 %v5386_v60, 0.0  ;;  %v4782_v55 = vld [vmem:[%s6907_s3] sm:$0xff]  }
  0x86   : > { %v1218_v28 = vsel %vm4980_vm12, %v1213_v27, %v1217_v20  ;;  %v2780_v30 = vsel %vm4917_vm8, %v2778_v56, %v2779_v58  ;;  %v5417_v24 = vsel %vm4917_vm8, %v4440_v59, %v1573_v44  ;;  %v1575_v53 = vrot.slane %v1573_v44, 4  ;;  %v326_v44 = vld [vmem:[#allocation2 + $0x5c] sm:$0x1]  ;;  %4701 = vmatprep.subr.bf16.mxu0 %v4782_v55  ;;  %4739 = vmatprep.subr.bf16.mxu1 %v4782_v55 }
  0x87   : > { %v480_v23 = vmax.f32 %v5389_v5, 0.0  ;;  %3495 = vrot.lane.b32.xlu1 %v4598_v39, %s4849_s10  ;;  %v1228_v16 = vsel %vm4980_vm12, %v1223_v48, %v1227_v43  ;;  %v4614_v33 = vcombine.low %v2777_v3, %v2780_v30  ;;  %v4660_v2 = vpack.c.bf16 %v479_v38, %v479_v38  ;;  %4702 = vmatpush3.bf16.msra.mxu0 %v4782_v55 }
  0x88   : > { %v1793_v60 = vshrl.u32 %v5408_v18, 16  ;;  %v4504_v47 = vcombine.low %v1218_v28, %v1228_v16  ;;  %v5426_v51 = vsel %vm4917_vm8, %v1575_v53, %v1576_v9  ;;  %v1796_v6 = vshll.u32 %v5408_v18, 16  ;;  %v273_v9 = vld [vmem:[#allocation2 + $0x60] sm:$0x1]  ;;  %4742 = vmatpush3.bf16.msra.mxu1 %v4782_v55 }
  0x89   : > { %v4661_v29 = vpack.c.bf16 %v480_v23, %v480_v23  ;;  %3575 = vrot.lane.b32.xlu0 %v4614_v33, %s4847_s8  ;;  %v4520_v5 = vcombine.low %v5417_v24, %v5426_v51  ;;  %v685_v35 = vshrl.u32 %v4660_v2, 16  ;;  %v688_v34 = vshll.u32 %v4660_v2, 16  ;;  %v4785_v23 = vld [vmem:[%s6907_s3 + $0x8] sm:$0xff]  }
  0x8a   : > { %v1795_v13 = vrot.slane %v1793_v60, 4  ;;  %v1798_v45 = vrot.slane %v1796_v6, 5  ;;  %v1806_v57 = vshrl.u32 %v1657_v15, 16  ;;  %v4535_v14 = vcombine.low %v5408_v18, %v1657_v15  ;;  %v374_v18 = vld [vmem:[%s4926_s23 + $0x78] sm:$0xff]  ;;  %4703 = vmatprep.subr.bf16.mxu0 %v4785_v23  ;;  %4740 = vmatprep.subr.bf16.mxu1 %v4785_v23 }
  0x8b   : > { %v693_v19 = vshrl.u32 %v4661_v29, 16  ;;  %v696_v36 = vshll.u32 %v4661_v29, 16  ;;  %2985 = vrot.lane.b32.xlu1 %v5357_v11, %s4843_s29  ;;  %v687_v62 = vrot.slane %v685_v35, 7  ;;  %v1802_v20 = vshll.u32 %v1657_v15, 16  ;;  %v961_v11 = vld [vmem:[#allocation2 + $0x50] sm:$0x1]  ;;  %4704 = vmatpush3.bf16.msra.mxu0 %v4785_v23 }
  0x8c   : > { %v1812_v32 = vshll.u32 %v5429_v0, 16  ;;  %v1799_v10 = vor.u32 %v1798_v45, %v1795_v13  ;;  %v1808_v63 = vrot.slane %v1806_v57, 4  ;;  %v4455_v41 = vrot.slane %v2084_v49, 9  ;;  %v375_v35 = vld [vmem:[%s4926_s23 + $0x80] sm:$0xff]  ;;  %4743 = vmatpush3.bf16.msra.mxu1 %v4785_v23 }
  0x8d   : > { %v695_v40 = vrot.slane %v693_v19, 7  ;;  %3065 = vrot.lane.b32.xlu0 %v4519_v22, %s4842_s28  ;;  %v690_v4 = vor.u32 %v688_v34, %v687_v62  ;;  %v691_v43 = vrot.slane %v687_v62, 4  ;;  %v1804_v58 = vrot.slane %v1802_v20, 5  ;;  %v376_v34 = vld [vmem:[%s4926_s23 + $0x88] sm:$0xff]  ;;  %v5493_v20 = vld [vmem:[#allocation2] sm:$0xf] }
  0x8e   : > { %v1814_v59 = vrot.slane %v1812_v32, 5  ;;  %v1800_v3 = vrot.slane %v1799_v10, 4  ;;  %v2174_v50 = vrot.slane %v1657_v15, 5  ;;  %v2177_v22 = vrot.slane %v5429_v0, 5 }
  0x8f   : > { %v698_v27 = vor.u32 %v696_v36, %v695_v40  ;;  %v700_v21 = vrot.slane %v695_v40, 4  ;;  %2987 = vrot.lane.b32.xlu1 %v4504_v47, %s4843_s29  ;;  %v958_v37 = vsel %vm4988_vm13, %v690_v4, %v957_v42  ;;  %v1809_v61 = vor.u32 %v1808_v63, %v1804_v58  ;;  %v377_v36 = vld [vmem:[%s4926_s23 + $0x90] sm:$0xff] }
  0x90   : > { %v449_v56 = vadd.f32 %v5383_v52, %v5392_v26  ;;  %959 = vst [vmem:[#allocation2 + $0x48] sm:$0xf] %v958_v37  ;;  %v1805_v48 = vsel %vm4980_vm12, %v1800_v3, %v1804_v58  ;;  %v5460_v38 = vsel %vm4917_vm8, %v4455_v41, %v2174_v50  ;;  %v2176_v30 = vrot.slane %v2174_v50, 4 }
  0x91   : > { %v699_v39 = vsel %vm4997_vm14, %v691_v43, %v698_v27  ;;  %v962_v28 = vsel %vm4896_vm3, %v700_v21, %v961_v11  ;;  %3161 = vrot.lane.b32.xlu0 %v4535_v14, %s4844_s30  ;;  %v1810_v26 = vrot.slane %v1809_v61, 4  ;;  %v450_v24 = vadd.f32 %v5383_v52, %v5396_v54  ;;  %v329_v54 = vld [vmem:[#allocation2 + $0x68] sm:$0x1]  ;;  %v5491_v14 = vld [vmem:[#allocation2 + $0x4] sm:$0xf] }
  0x92   : > { %960 = vst.msk [vmem:[#allocation2 + $0x4c] sm:$0xf] %vm237_vm0, %v699_v39  ;;  %963 = vst [vmem:[#allocation2 + $0x50] sm:$0x1] %v962_v28  ;;  %v481_v53 = vmax.f32 %v449_v56, 0.0  ;;  %v327_v16 = vsel %vm4908_vm7, 0, %v326_v44  ;;  %v413_v2 = vmul.f32 %v5364_v46, %v374_v18  ;;  %v451_v15 = vadd.f32 %v5383_v52, %v5399_v17 }
  0x93   : > { %v274_v33 = vsel %vm4896_vm3, 0, %v273_v9  ;;  %3067 = vrot.lane.b32.xlu1 %v4520_v5, %s4842_s28  ;;  %v1815_v60 = vsel %vm4980_vm12, %v1810_v26, %v1814_v59  ;;  %v2178_v47 = vsel %vm4917_vm8, %v2176_v30, %v2177_v22  ;;  %v482_v51 = vmax.f32 %v450_v24, 0.0  ;;  %328 = vst [vmem:[#allocation2 + $0x5c] sm:$0x1] %v327_v16  ;;  %v964_v9 = vld [vmem:[#allocation2 + $0x54] sm:$0xf] }
  0x94   : > { %v4662_v29 = vpack.c.bf16 %v481_v53, %v481_v53  ;;  %275 = vst [vmem:[#allocation2 + $0x60] sm:$0x1] %v274_v33  ;;  %v4551_v6 = vcombine.low %v1805_v48, %v1815_v60  ;;  %v452_v0 = vadd.f32 %v5383_v52, %v413_v2  ;;  %v483_v17 = vmax.f32 %v451_v15, 0.0 }
  0x95   : > { %v4567_v5 = vcombine.low %v5460_v38, %v2178_v47  ;;  %v4663_v13 = vpack.c.bf16 %v482_v51, %v482_v51  ;;  %v330_v19 = vsel %vm4908_vm7, 0, %v329_v54  ;;  %v4483_v32 = vcombine.low %v5493_v20, %v5491_v14 }
  0x96   : > { %v702_v49 = vshrl.u32 %v4662_v29, 16  ;;  %3241 = vrot.lane.b32.xlu0 %v4551_v6, %s4848_s9  ;;  %v705_v45 = vshll.u32 %v4662_v29, 16  ;;  %v484_v57 = vmax.f32 %v452_v0, 0.0  ;;  %v5489_v62 = vpack.c.bf16 %v483_v17, %v483_v17  ;;  %331 = vst [vmem:[#allocation2 + $0x68] sm:$0x1] %v330_v19 }
  0x97   : > { %v1658_v40 = vld [vmem:[#allocation2 + $0x48] sm:$0xf]  ;;  %v710_v63 = vshrl.u32 %v4663_v13, 16  ;;  %v5498_v41 = vmul.f32 %v5364_v46, %v375_v35  ;;  %v5501_v4 = vmul.f32 %v5364_v46, %v376_v34  ;;  %v5506_v27 = vmul.f32 %v5364_v46, %v377_v36 }
  0x98   : > { %v2085_v42 = vld [vmem:[#allocation2 + $0x48] sm:$0xe]  ;;  %v704_v10 = vrot.slane %v702_v49, 7  ;;  %v1817_v11 = vshrl.u32 %v1658_v40, 16  ;;  %v1820_v58 = vshll.u32 %v1658_v40, 16  ;;  %v5503_v55 = vpack.c.bf16 %v484_v57, %v484_v57 }
  0x99   : > { %v1659_v43 = vld [vmem:[#allocation2 + $0x4c] sm:$0xf]  ;;  %v1685_v59 = vld [vmem:[#allocation2 + $0x50] sm:$0x1]  ;;  %v4456_v56 = vrot.slane %v2085_v42, 9  ;;  %v712_v33 = vrot.slane %v710_v63, 7 }
  0x9a   : > { %v1830_v21 = vshrl.u32 %v1659_v43, 16  ;;  %v4536_v3 = vcombine.low %v1658_v40, %v1659_v43  ;;  %v1826_v50 = vshll.u32 %v1659_v43, 16  ;;  %v1836_v37 = vshll.u32 %v1685_v59, 16  ;;  %3321 = vrot.lane.b32.xlu0 %v4567_v5, %s4846_s7  ;;  %v2265_v38 = vld [vmem:[#allocation2 + $0x48] sm:$0xf] }
  0x9b   : > { %v1819_v61 = vrot.slane %v1817_v11, 4  ;;  %v1822_v22 = vrot.slane %v1820_v58, 5  ;;  %v2181_v44 = vrot.slane %v1659_v43, 5  ;;  %v2184_v48 = vrot.slane %v1685_v59, 5  ;;  %v5512_v15 = vld [vmem:[#allocation2 + $0x4c] sm:$0xf] }
  0x9c   : > { %3163 = vrot.lane.b32.xlu1 %v4536_v3, %s4844_s30  ;;  %v1828_v18 = vrot.slane %v1826_v50, 5  ;;  %v1832_v39 = vrot.slane %v1830_v21, 4  ;;  %v1838_v28 = vrot.slane %v1836_v37, 5  ;;  %v707_v53 = vor.u32 %v705_v45, %v704_v10  ;;  %v968_v29 = vld [vmem:[#allocation2 + $0x5c] sm:$0x1] }
  0x9d   : > { %v1823_v26 = vor.u32 %v1822_v22, %v1819_v61  ;;  %v2182_v30 = vsel %vm4917_vm8, %v4456_v56, %v2181_v44  ;;  %v2183_v24 = vrot.slane %v2181_v44, 4  ;;  %v708_v16 = vrot.slane %v704_v10, 4  ;;  %v5518_v34 = vld [vmem:[#allocation2 + $0x50] sm:$0x1]  ;;  %v1046_v5 = vld [vmem:[#allocation2 + $0x48] sm:$0xf] }
  0x9e   : > { %v1833_v23 = vor.u32 %v1832_v39, %v1828_v18  ;;  %v713_v2 = vshll.u32 %v4663_v13, 16  ;;  %v965_v47 = vsel %vm4988_vm13, %v707_v53, %v964_v9  ;;  %v2402_v51 = vshrl.u32 %v2265_v38, 16  ;;  %v5523_v45 = vld [vmem:[#allocation2 + $0x4c] sm:$0xf]  ;;  %v5532_v63 = vld [vmem:[#allocation2 + $0x50] sm:$0x1] }
  0x9f   : > { %v1824_v54 = vrot.slane %v1823_v26, 4  ;;  %v2185_v60 = vsel %vm4917_vm8, %v2183_v24, %v2184_v48  ;;  %vm3601_vm15 = vcmask 31744   ;;  %v717_v35 = vrot.slane %v712_v33, 4  ;;  %966 = vst [vmem:[#allocation2 + $0x54] sm:$0xf] %v965_v47 }
  0xa0   : > { %v1834_v6 = vrot.slane %v1833_v23, 4  ;;  %v4568_v0 = vcombine.low %v2182_v30, %v2185_v60  ;;  %v715_v17 = vor.u32 %v713_v2, %v712_v33  ;;  %v2404_v49 = vrot.slane %v2402_v51, 4  ;;  %v2693_v9 = vld [vmem:[#allocation2 + $0x48] sm:$0xe]  ;;  %v2978_v23 = vpop.permute.xlu0 %2977 }
  0xa1   : > { %v1829_v13 = vsel %vm4980_vm12, %v1824_v54, %v1828_v18  ;;  %v2405_v19 = vshll.u32 %v2265_v38, 16  ;;  %v2415_v36 = vshrl.u32 %v5512_v15, 16  ;;  %v4583_v42 = vcombine.low %v2265_v38, %v5512_v15 }
  0xa2   : > { %v1839_v57 = vsel %vm4980_vm12, %v1834_v6, %v1838_v28  ;;  %v716_v40 = vsel %vm4997_vm14, %v708_v16, %v715_v17  ;;  %v969_v10 = vsel %vm4896_vm3, %v717_v35, %v968_v29  ;;  %v2411_v58 = vshll.u32 %v5512_v15, 16 }
  0xa3   : > { %v4552_v43 = vcombine.low %v1829_v13, %v1839_v57  ;;  %967 = vst.msk [vmem:[#allocation2 + $0x58] sm:$0xf] %vm237_vm0, %v716_v40  ;;  %v2407_v11 = vrot.slane %v2405_v19, 5  ;;  %970 = vst [vmem:[#allocation2 + $0x5c] sm:$0x1] %v969_v10  ;;  %v2417_v59 = vrot.slane %v2415_v36, 4  ;;  %3417 = vrot.lane.b32.xlu0 %v4583_v42, %s4845_s6  ;;  %v5554_v13 = vsel %vm3601_vm15, %v4483_v32, %v2978_v23 }
  0xa4   : > { %v2421_v21 = vshll.u32 %v5518_v34, 16  ;;  %v1230_v3 = vshrl.u32 %v1046_v5, 16  ;;  %v1233_v50 = vshll.u32 %v1046_v5, 16  ;;  %v1239_v37 = vshll.u32 %v5523_v45, 16 }
  0xa5   : > { %3243 = vrot.lane.b32.xlu1 %v4552_v43, %s4848_s9  ;;  %v2408_v61 = vor.u32 %v2407_v11, %v2404_v49  ;;  %v2413_v22 = vrot.slane %v2411_v58, 5  ;;  %v1243_v56 = vshrl.u32 %v5523_v45, 16  ;;  %v1249_v44 = vshll.u32 %v5532_v63, 16 }
  0xa6   : > { %v2423_v18 = vrot.slane %v2421_v21, 5  ;;  %v1232_v39 = vrot.slane %v1230_v3, 4  ;;  %v1235_v28 = vrot.slane %v1233_v50, 5  ;;  %v1241_v48 = vrot.slane %v1239_v37, 5  ;;  %v2267_v38 = vld [vmem:[#allocation2 + $0x54] sm:$0xf] }
  0xa7   : > { %v2409_v26 = vrot.slane %v2408_v61, 4  ;;  %v2418_v30 = vor.u32 %v2417_v59, %v2413_v22  ;;  %v1245_v24 = vrot.slane %v1243_v56, 4  ;;  %v1251_v53 = vrot.slane %v1249_v44, 5  ;;  %v1048_v32 = vld [vmem:[#allocation2 + $0x54] sm:$0xf] }
  0xa8   : > { %v2426_v16 = vshrl.u32 %v2267_v38, 16  ;;  %v2429_v33 = vshll.u32 %v2267_v38, 16  ;;  %v1236_v2 = vor.u32 %v1235_v28, %v1232_v39  ;;  %v4471_v54 = vrot.slane %v2693_v9, 9  ;;  %v2694_v28 = vld [vmem:[#allocation2 + $0x54] sm:$0xe] }
  0xa9   : > { %3323 = vrot.lane.b32.xlu1 %v4568_v0, %s4846_s7  ;;  %v2414_v60 = vsel %vm4980_vm12, %v2409_v26, %v2413_v22  ;;  %v2419_v47 = vrot.slane %v2418_v30, 4  ;;  %v1246_v51 = vor.u32 %v1245_v24, %v1241_v48  ;;  %v2783_v29 = vrot.slane %v5512_v15, 5  ;;  %v5579_v24 = vpop.permute.xlu1 %3057 }
  0xaa   : > { %v5546_v6 = vld [vmem:[#allocation2 + $0x58] sm:$0xf]  ;;  %v2428_v17 = vrot.slane %v2426_v16, 4  ;;  %v2431_v35 = vrot.slane %v2429_v33, 5  ;;  %v5548_v5 = vld [vmem:[#allocation2 + $0x5c] sm:$0x1]  ;;  %v5558_v0 = vadd.f32 %v5383_v52, %v5498_v41 }
  0xab   : > { %v2439_v49 = vshrl.u32 %v5546_v6, 16  ;;  %v4584_v15 = vcombine.low %v2267_v38, %v5546_v6  ;;  %v2435_v19 = vshll.u32 %v5546_v6, 16  ;;  %v2445_v36 = vshll.u32 %v5548_v5, 16  ;;  %v1049_v11 = vld [vmem:[#allocation2 + $0x58] sm:$0xf] }
  0xac   : > { %v2432_v57 = vor.u32 %v2431_v35, %v2428_v17  ;;  %v2424_v40 = vsel %vm4980_vm12, %v2419_v47, %v2423_v18  ;;  %v1237_v14 = vrot.slane %v1236_v2, 4  ;;  %v1247_v20 = vrot.slane %v1246_v51, 4  ;;  %v1073_v50 = vld [vmem:[#allocation2 + $0x5c] sm:$0x1]  ;;  %v5581_v2 = vpop.permute.xlu0 %3153 }
  0xad   : > { %3419 = vrot.lane.b32.xlu1 %v4584_v15, %s4845_s6  ;;  %v2437_v42 = vrot.slane %v2435_v19, 5  ;;  %v2441_v41 = vrot.slane %v2439_v49, 4  ;;  %v2447_v10 = vrot.slane %v2445_v36, 5  ;;  %v4599_v43 = vcombine.low %v2414_v60, %v2424_v40 }
  0xae   : > { %v2433_v58 = vrot.slane %v2432_v57, 4  ;;  %v1242_v59 = vsel %vm4980_vm12, %v1237_v14, %v1241_v48  ;;  %v1252_v21 = vsel %vm4980_vm12, %v1247_v20, %v1251_v53  ;;  %v2784_v3 = vsel %vm4917_vm8, %v4471_v54, %v2783_v29 }
  0xaf   : > { %v2442_v37 = vor.u32 %v2441_v41, %v2437_v42  ;;  %3497 = vrot.lane.b32.xlu0 %v4599_v43, %s4849_s10  ;;  %v4505_v61 = vcombine.low %v1242_v59, %v1252_v21  ;;  %v2785_v22 = vrot.slane %v2783_v29, 4  ;;  %v2786_v56 = vrot.slane %v5518_v34, 5  ;;  %v1476_v34 = vld [vmem:[#allocation2 + $0x54] sm:$0xe]  ;;  %v1475_v29 = vld [vmem:[#allocation2 + $0x48] sm:$0xe] }
  0xb0   : > { %v2438_v44 = vsel %vm4980_vm12, %v2433_v58, %v2437_v42  ;;  %v1254_v9 = vshrl.u32 %v1048_v32, 16  ;;  %v1257_v18 = vshll.u32 %v1048_v32, 16  ;;  %v1263_v39 = vshll.u32 %v1049_v11, 16 }
  0xb1   : > { %v2443_v48 = vrot.slane %v2442_v37, 4  ;;  %v2787_v38 = vsel %vm4917_vm8, %v2785_v22, %v2786_v56  ;;  %v1267_v26 = vshrl.u32 %v1049_v11, 16  ;;  %v1273_v30 = vshll.u32 %v1073_v50, 16 }
  0xb2   : > { %v4615_v53 = vcombine.low %v2784_v3, %v2787_v38  ;;  %v1256_v23 = vrot.slane %v1254_v9, 4  ;;  %v1259_v16 = vrot.slane %v1257_v18, 5  ;;  %v1265_v33 = vrot.slane %v1263_v39, 5  ;;  %v1660_v3 = vld [vmem:[#allocation2 + $0x54] sm:$0xf] }
  0xb3   : > { %v2448_v54 = vsel %vm4980_vm12, %v2443_v48, %v2447_v10  ;;  %v1269_v60 = vrot.slane %v1267_v26, 4  ;;  %v1275_v47 = vrot.slane %v1273_v30, 5  ;;  %v4472_v51 = vrot.slane %v2694_v28, 9  ;;  %v971_v26 = vld [vmem:[#allocation2 + $0x60] sm:$0xf] }
  0xb4   : > { %v4600_v17 = vcombine.low %v2438_v44, %v2448_v54  ;;  %3577 = vrot.lane.b32.xlu0 %v4615_v53, %s4847_s8  ;;  %v1260_v35 = vor.u32 %v1259_v16, %v1256_v23  ;;  %v2790_v49 = vrot.slane %v5546_v6, 5  ;;  %v2793_v15 = vrot.slane %v5548_v5, 5  ;;  %v5594_v5 = vpop.permute.xlu1 %3155  ;;  %v1661_v44 = vld [vmem:[#allocation2 + $0x58] sm:$0xf] }
  0xb5   : > { %v1270_v19 = vor.u32 %v1269_v60, %v1265_v33  ;;  %v4442_v36 = vrot.slane %v1476_v34, 9  ;;  %v1587_v57 = vrot.slane %v1049_v11, 5  ;;  %v1590_v40 = vrot.slane %v1073_v50, 5  ;;  %v5602_v50 = vpop.permute.xlu0 %3409 }
  0xb6   : > { %3499 = vrot.lane.b32.xlu1 %v4600_v17, %s4849_s10  ;;  %v1261_v14 = vrot.slane %v1260_v35, 4  ;;  %v2791_v20 = vsel %vm4917_vm8, %v4472_v51, %v2790_v49  ;;  %v2792_v32 = vrot.slane %v2790_v49, 4  ;;  %v4441_v42 = vrot.slane %v1475_v29, 9  ;;  %v2086_v51 = vld [vmem:[#allocation2 + $0x54] sm:$0xe] }
  0xb7   : > { %v1271_v41 = vrot.slane %v1270_v19, 4  ;;  %v1588_v10 = vsel %vm4917_vm8, %v4442_v36, %v1587_v57  ;;  %v1589_v43 = vrot.slane %v1587_v57, 4  ;;  %v1580_v6 = vrot.slane %v5523_v45, 5  ;;  %v975_v17 = vld [vmem:[#allocation2 + $0x68] sm:$0x1] }
  0xb8   : > { %v1266_v11 = vsel %vm4980_vm12, %v1261_v14, %v1265_v33  ;;  %v2794_v58 = vsel %vm4917_vm8, %v2792_v32, %v2793_v15  ;;  %v1583_v59 = vrot.slane %v5532_v63, 5  ;;  %v719_v21 = vshrl.u32 %v5489_v62, 16  ;;  %v1686_v33 = vld [vmem:[#allocation2 + $0x5c] sm:$0x1]  ;;  %v5617_v29 = vpop.permute.xlu1 %3411 }
  0xb9   : > { %v1276_v37 = vsel %vm4980_vm12, %v1271_v41, %v1275_v47  ;;  %v4616_v22 = vcombine.low %v2791_v20, %v2794_v58  ;;  %v1591_v45 = vsel %vm4917_vm8, %v1589_v43, %v1590_v40  ;;  %v1581_v56 = vsel %vm4917_vm8, %v4441_v42, %v1580_v6  ;;  %v5620_v15 = vpop.permute.xlu0 %3157  ;;  %v276_v41 = vld [vmem:[#allocation2 + $0x6c] sm:$0x1] }
  0xba   : > { %2989 = vrot.lane.b32.xlu1 %v4505_v61, %s4843_s29  ;;  %v4506_v9 = vcombine.low %v1266_v11, %v1276_v37  ;;  %v4522_v63 = vcombine.low %v1588_v10, %v1591_v45  ;;  %v1582_v18 = vrot.slane %v1580_v6, 4  ;;  %v721_v39 = vrot.slane %v719_v21, 7  ;;  %v332_v37 = vld [vmem:[#allocation2 + $0x74] sm:$0x1] }
  0xbb   : > { %3579 = vrot.lane.b32.xlu0 %v4616_v22, %s4847_s8  ;;  %v722_v28 = vshll.u32 %v5489_v62, 16  ;;  %v727_v48 = vshrl.u32 %v5503_v55, 16  ;;  %v730_v38 = vshll.u32 %v5503_v55, 16  ;;  %v1841_v30 = vshrl.u32 %v1660_v3, 16 }
  0xbc   : > { %v1584_v53 = vsel %vm4917_vm8, %v1582_v18, %v1583_v59  ;;  %v725_v23 = vrot.slane %v721_v39, 4  ;;  %v1844_v16 = vshll.u32 %v1660_v3, 16  ;;  %v1854_v61 = vshrl.u32 %v1661_v44, 16 }
  0xbd   : > { %v4521_v34 = vcombine.low %v1581_v56, %v1584_v53  ;;  %v724_v54 = vor.u32 %v722_v28, %v721_v39  ;;  %v729_v60 = vrot.slane %v727_v48, 7  ;;  %v1843_v47 = vrot.slane %v1841_v30, 4  ;;  %v5650_v48 = vpop.permute.xlu0 %3313 }
  0xbe   : > { %2991 = vrot.lane.b32.xlu1 %v4506_v9, %s4843_s29  ;;  %v1846_v62 = vrot.slane %v1844_v16, 5  ;;  %v4537_v55 = vcombine.low %v1660_v3, %v1661_v44  ;;  %v1850_v35 = vshll.u32 %v1661_v44, 16  ;;  %v1856_v49 = vrot.slane %v1854_v61, 4  ;;  %v279_v9 = vld [vmem:[#allocation2 + $0x78] sm:$0x1] }
  0xbf   : > { %3069 = vrot.lane.b32.xlu0 %v4521_v34, %s4842_s28  ;;  %v732_v19 = vor.u32 %v730_v38, %v729_v60  ;;  %v734_v36 = vrot.slane %v729_v60, 4  ;;  %v972_v57 = vsel %vm4988_vm13, %v724_v54, %v971_v26  ;;  %v1860_v40 = vshll.u32 %v1686_v33, 16  ;;  %v378_v26 = vld [vmem:[%s4926_s23 + $0x98] sm:$0xff] }
  0xc0   : > { %973 = vst [vmem:[#allocation2 + $0x60] sm:$0xf] %v972_v57  ;;  %v1847_v14 = vor.u32 %v1846_v62, %v1843_v47  ;;  %v1852_v20 = vrot.slane %v1850_v35, 5  ;;  %v4457_v32 = vrot.slane %v2086_v51, 9  ;;  %v2188_v42 = vrot.slane %v1661_v44, 5  ;;  %v5641_v44 = vpop.permute.xlu1 %3159 }
  0xc1   : > { %v733_v10 = vsel %vm4997_vm14, %v725_v23, %v732_v19  ;;  %v976_v43 = vsel %vm4896_vm3, %v734_v36, %v975_v17  ;;  %v1862_v6 = vrot.slane %v1860_v40, 5  ;;  %v2191_v11 = vrot.slane %v1686_v33, 5  ;;  %v5674_v36 = vld [vmem:[#allocation2 + $0x10] sm:$0xf]  ;;  %v5676_v57 = vld [vmem:[#allocation2 + $0xc] sm:$0xf] }
  0xc2   : > { %3071 = vrot.lane.b32.xlu1 %v4522_v63, %s4842_s28  ;;  %974 = vst.msk [vmem:[#allocation2 + $0x64] sm:$0xf] %vm237_vm0, %v733_v10  ;;  %977 = vst [vmem:[#allocation2 + $0x68] sm:$0x1] %v976_v43  ;;  %v1848_v58 = vrot.slane %v1847_v14, 4  ;;  %v1857_v59 = vor.u32 %v1856_v49, %v1852_v20  ;;  %v5633_v21 = vsel %vm4917_vm8, %v4457_v32, %v2188_v42  ;;  %v2190_v3 = vrot.slane %v2188_v42, 4  ;;  %v5680_v42 = vpop.permute.xlu0 %3569 }
  0xc3   : > { %3165 = vrot.lane.b32.xlu0 %v4537_v55, %s4844_s30  ;;  %v277_v22 = vsel %vm4896_vm3, 0, %v276_v41  ;;  %v454_v45 = vadd.f32 %v5383_v52, %v5501_v4  ;;  %v485_v56 = vmax.f32 %v5558_v0, 0.0  ;;  %vm3650_vm1 = vcmask 64512  }
  0xc4   : > { %v1853_v63 = vsel %vm4980_vm12, %v1848_v58, %v1852_v20  ;;  %v1858_v18 = vrot.slane %v1857_v59, 4  ;;  %v2192_v39 = vsel %vm4917_vm8, %v2190_v3, %v2191_v11  ;;  %278 = vst [vmem:[#allocation2 + $0x6c] sm:$0x1] %v277_v22  ;;  %v3652_v28 = vsel %vm3650_vm1, %v5554_v13, %v5579_v24  ;;  %v5668_v49 = vpop.permute.xlu1 %3059 }
  0xc5   : > { %v4569_v4 = vcombine.low %v5633_v21, %v2192_v39  ;;  %v486_v0 = vmax.f32 %v454_v45, 0.0  ;;  %v4666_v38 = vpack.c.bf16 %v485_v56, %v485_v56  ;;  %vm3683_vm2 = vcmask 97280  }
  0xc6   : > { %v1863_v30 = vsel %vm4980_vm12, %v1858_v18, %v1862_v6  ;;  %v5658_v53 = vsel %vm3683_vm2, %v3652_v28, %v5581_v2  ;;  %v333_v23 = vsel %vm4908_vm7, 0, %v332_v37  ;;  %v280_v13 = vsel %vm4896_vm3, 0, %v279_v9 }
  0xc7   : > { %v1662_v24 = vld [vmem:[#allocation2 + $0x60] sm:$0xf]  ;;  %v4553_v16 = vcombine.low %v1853_v63, %v1863_v30  ;;  %v4667_v33 = vpack.c.bf16 %v486_v0, %v486_v0  ;;  %v736_v34 = vshrl.u32 %v4666_v38, 16  ;;  %v739_v54 = vshll.u32 %v4666_v38, 16  ;;  %334 = vst [vmem:[#allocation2 + $0x74] sm:$0x1] %v333_v23 }
  0xc8   : > { %v2087_v61 = vld [vmem:[#allocation2 + $0x60] sm:$0xe]  ;;  %281 = vst [vmem:[#allocation2 + $0x78] sm:$0x1] %v280_v13  ;;  %v1865_v60 = vshrl.u32 %v1662_v24, 16  ;;  %v1868_v47 = vshll.u32 %v1662_v24, 16  ;;  %v5665_v2 = vmul.f32 %v5364_v46, %v378_v26  ;;  %v5672_v19 = vadd.f32 %v5383_v52, %v5506_v27  ;;  %v5694_v23 = vpop.permute.xlu1 %3315 }
  0xc9   : > { %v4458_v51 = vrot.slane %v2087_v61, 9  ;;  %v1663_v62 = vld [vmem:[#allocation2 + $0x64] sm:$0xf]  ;;  %v1687_v55 = vld [vmem:[#allocation2 + $0x68] sm:$0x1]  ;;  %3245 = vrot.lane.b32.xlu0 %v4553_v16, %s4848_s9  ;;  %v738_v17 = vrot.slane %v736_v34, 7  ;;  %v4484_v46 = vcombine.low %v5676_v57, %v5674_v36 }
  0xca   : > { %v744_v35 = vshrl.u32 %v4667_v33, 16  ;;  %v1867_v40 = vrot.slane %v1865_v60, 4  ;;  %v1870_v14 = vrot.slane %v1868_v47, 5  ;;  %v1878_v20 = vshrl.u32 %v1663_v62, 16  ;;  %v2269_v21 = vld [vmem:[#allocation2 + $0x60] sm:$0xf] }
  0xcb   : > { %v4538_v32 = vcombine.low %v1662_v24, %v1663_v62  ;;  %v1874_v41 = vshll.u32 %v1663_v62, 16  ;;  %v1884_v10 = vshll.u32 %v1687_v55, 16  ;;  %v2195_v43 = vrot.slane %v1663_v62, 5  ;;  %v978_v11 = vld [vmem:[#allocation2 + $0x6c] sm:$0xf] }
  0xcc   : > { %v2198_v6 = vrot.slane %v1687_v55, 5  ;;  %v1871_v52 = vor.u32 %v1870_v14, %v1867_v40  ;;  %v1880_v27 = vrot.slane %v1878_v20, 4  ;;  %v741_v58 = vor.u32 %v739_v54, %v738_v17  ;;  %v5690_v39 = vld [vmem:[#allocation2 + $0x64] sm:$0xf]  ;;  %v5699_v61 = vld [vmem:[#allocation2 + $0x68] sm:$0x1] }
  0xcd   : > { %3167 = vrot.lane.b32.xlu1 %v4538_v32, %s4844_s30  ;;  %v742_v59 = vrot.slane %v738_v17, 4  ;;  %v1876_v3 = vrot.slane %v1874_v41, 5  ;;  %v1886_v37 = vrot.slane %v1884_v10, 5  ;;  %v5685_v22 = vsel %vm4917_vm8, %v4458_v51, %v2195_v43  ;;  %3325 = vrot.lane.b32.xlu0 %v4569_v4, %s4846_s7  ;;  %v1050_v51 = vld [vmem:[#allocation2 + $0x60] sm:$0xf] }
  0xce   : > { %v2197_v45 = vrot.slane %v2195_v43, 4  ;;  %v1872_v56 = vrot.slane %v1871_v52, 4  ;;  %v746_v9 = vrot.slane %v744_v35, 7  ;;  %v747_v63 = vshll.u32 %v4667_v33, 16  ;;  %v982_v30 = vld [vmem:[#allocation2 + $0x74] sm:$0x1]  ;;  %v5701_v33 = vpop.permute.xlu0 %3571 }
  0xcf   : > { %v979_v18 = vsel %vm4988_vm13, %v741_v58, %v978_v11  ;;  %v1881_v28 = vor.u32 %v1880_v27, %v1876_v3  ;;  %v2450_v38 = vshrl.u32 %v2269_v21, 16  ;;  %v2453_v26 = vshll.u32 %v2269_v21, 16  ;;  %v5710_v40 = vld [vmem:[#allocation2 + $0x64] sm:$0xf]  ;;  %v5716_v10 = vld [vmem:[#allocation2 + $0x68] sm:$0x1] }
  0xd0   : > { %v2199_v0 = vsel %vm4917_vm8, %v2197_v45, %v2198_v6  ;;  %980 = vst [vmem:[#allocation2 + $0x6c] sm:$0xf] %v979_v18  ;;  %v1877_v4 = vsel %vm4980_vm12, %v1872_v56, %v1876_v3  ;;  %v749_v24 = vor.u32 %v747_v63, %v746_v9  ;;  %v751_v16 = vrot.slane %v746_v9, 4  ;;  %v2695_v3 = vld [vmem:[#allocation2 + $0x60] sm:$0xe] }
  0xd1   : > { %v4570_v13 = vcombine.low %v5685_v22, %v2199_v0  ;;  %v1882_v34 = vrot.slane %v1881_v28, 4  ;;  %v2452_v54 = vrot.slane %v2450_v38, 4  ;;  %v2455_v60 = vrot.slane %v2453_v26, 5 }
  0xd2   : > { %v2463_v47 = vshrl.u32 %v5690_v39, 16  ;;  %v750_v62 = vsel %vm4997_vm14, %v742_v59, %v749_v24  ;;  %v4585_v55 = vcombine.low %v2269_v21, %v5690_v39  ;;  %v983_v17 = vsel %vm4896_vm3, %v751_v16, %v982_v30  ;;  %v5725_v18 = vpop.permute.xlu0 %3061 }
  0xd3   : > { %v2459_v35 = vshll.u32 %v5690_v39, 16  ;;  %v1887_v14 = vsel %vm4980_vm12, %v1882_v34, %v1886_v37  ;;  %981 = vst.msk [vmem:[#allocation2 + $0x70] sm:$0xf] %vm237_vm0, %v750_v62  ;;  %984 = vst [vmem:[#allocation2 + $0x74] sm:$0x1] %v983_v17  ;;  %v2456_v20 = vor.u32 %v2455_v60, %v2452_v54  ;;  %v2469_v41 = vshll.u32 %v5699_v61, 16  ;;  %v5721_v37 = vpop.permute.xlu1 %3063 }
  0xd4   : > { %v2465_v32 = vrot.slane %v2463_v47, 4  ;;  %v4554_v43 = vcombine.low %v1877_v4, %v1887_v14  ;;  %3421 = vrot.lane.b32.xlu0 %v4585_v55, %s4845_s6  ;;  %v1278_v11 = vshrl.u32 %v1050_v51, 16  ;;  %v1281_v52 = vshll.u32 %v1050_v51, 16 }
  0xd5   : > { %v2461_v6 = vrot.slane %v2459_v35, 5  ;;  %v2457_v27 = vrot.slane %v2456_v20, 4  ;;  %v2471_v58 = vrot.slane %v2469_v41, 5  ;;  %v1287_v59 = vshll.u32 %v5710_v40, 16 }
  0xd6   : > { %v1291_v21 = vshrl.u32 %v5710_v40, 16  ;;  %3247 = vrot.lane.b32.xlu1 %v4554_v43, %s4848_s9  ;;  %v1280_v56 = vrot.slane %v1278_v11, 4  ;;  %v1283_v9 = vrot.slane %v1281_v52, 5  ;;  %v1297_v63 = vshll.u32 %v5716_v10, 16 }
  0xd7   : > { %v2271_v22 = vld [vmem:[#allocation2 + $0x6c] sm:$0xf]  ;;  %v2466_v45 = vor.u32 %v2465_v32, %v2461_v6  ;;  %v2462_v38 = vsel %vm4980_vm12, %v2457_v27, %v2461_v6  ;;  %v1289_v26 = vrot.slane %v1287_v59, 5  ;;  %v4473_v60 = vrot.slane %v2695_v3, 9  ;;  %v5736_v11 = vpop.permute.xlu1 %3235  ;;  %v5741_v59 = vpop.permute.xlu0 %2979 }
  0xd8   : > { %v2474_v28 = vshrl.u32 %v2271_v22, 16  ;;  %v2477_v0 = vshll.u32 %v2271_v22, 16  ;;  %v1284_v4 = vor.u32 %v1283_v9, %v1280_v56  ;;  %v1293_v24 = vrot.slane %v1291_v21, 4  ;;  %v1052_v6 = vld [vmem:[#allocation2 + $0x6c] sm:$0xf] }
  0xd9   : > { %v2467_v30 = vrot.slane %v2466_v45, 4  ;;  %v1299_v16 = vrot.slane %v1297_v63, 5  ;;  %v2797_v47 = vrot.slane %v5690_v39, 5  ;;  %v2800_v14 = vrot.slane %v5699_v61, 5 }
  0xda   : > { %v2476_v34 = vrot.slane %v2474_v28, 4  ;;  %v2479_v54 = vrot.slane %v2477_v0, 5  ;;  %3327 = vrot.lane.b32.xlu1 %v4570_v13, %s4846_s7  ;;  %v2272_v51 = vld [vmem:[#allocation2 + $0x70] sm:$0xf]  ;;  %v5731_v62 = vld [vmem:[#allocation2 + $0x74] sm:$0x1]  ;;  %v1294_v35 = vor.u32 %v1293_v24, %v1289_v26 }
  0xdb   : > { %v2472_v55 = vsel %vm4980_vm12, %v2467_v30, %v2471_v58  ;;  %v1285_v17 = vrot.slane %v1284_v4, 4  ;;  %v2487_v20 = vshrl.u32 %v2272_v51, 16  ;;  %v4586_v32 = vcombine.low %v2271_v22, %v2272_v51  ;;  %v1053_v22 = vld [vmem:[#allocation2 + $0x70] sm:$0xf]  ;;  %v1075_v63 = vld [vmem:[#allocation2 + $0x74] sm:$0x1] }
  0xdc   : > { %v2480_v41 = vor.u32 %v2479_v54, %v2476_v34  ;;  %v2483_v43 = vshll.u32 %v2272_v51, 16  ;;  %v2493_v39 = vshll.u32 %v5731_v62, 16  ;;  %v4601_v13 = vcombine.low %v2462_v38, %v2472_v55  ;;  %v2696_v4 = vld [vmem:[#allocation2 + $0x6c] sm:$0xe] }
  0xdd   : > { %v1290_v52 = vsel %vm4980_vm12, %v1285_v17, %v1289_v26  ;;  %v1295_v27 = vrot.slane %v1294_v35, 4  ;;  %v2489_v3 = vrot.slane %v2487_v20, 4  ;;  %v2798_v61 = vsel %vm4917_vm8, %v4473_v60, %v2797_v47 }
  0xde   : > { %v2481_v58 = vrot.slane %v2480_v41, 4  ;;  %v2485_v21 = vrot.slane %v2483_v43, 5  ;;  %3423 = vrot.lane.b32.xlu1 %v4586_v32, %s4845_s6  ;;  %v2495_v45 = vrot.slane %v2493_v39, 5  ;;  %3501 = vrot.lane.b32.xlu0 %v4601_v13, %s4849_s10  ;;  %v2799_v9 = vrot.slane %v2797_v47, 4  ;;  %v5753_v47 = vpop.permute.xlu1 %3491  ;;  %v1478_v39 = vld [vmem:[#allocation2 + $0x6c] sm:$0xe]  ;;  %v5755_v13 = vpop.permute.xlu0 %3233 }
  0xdf   : > { %v1300_v56 = vsel %vm4980_vm12, %v1295_v27, %v1299_v16  ;;  %v1302_v28 = vshrl.u32 %v1052_v6, 16  ;;  %v1305_v30 = vshll.u32 %v1052_v6, 16  ;;  %v1311_v54 = vshll.u32 %v1053_v22, 16 }
  0xe0   : > { %v2486_v0 = vsel %vm4980_vm12, %v2481_v58, %v2485_v21  ;;  %v2490_v38 = vor.u32 %v2489_v3, %v2485_v21  ;;  %v4507_v26 = vcombine.low %v1290_v52, %v1300_v56  ;;  %v2801_v24 = vsel %vm4917_vm8, %v2799_v9, %v2800_v14  ;;  %v1477_v58 = vld [vmem:[#allocation2 + $0x60] sm:$0xe] }
  0xe1   : > { %v1304_v34 = vrot.slane %v1302_v28, 4  ;;  %v1315_v60 = vshrl.u32 %v1053_v22, 16  ;;  %v4617_v17 = vcombine.low %v2798_v61, %v2801_v24  ;;  %v1307_v35 = vrot.slane %v1305_v30, 5 }
  0xe2   : > { %v2491_v55 = vrot.slane %v2490_v38, 4  ;;  %v1321_v16 = vshll.u32 %v1075_v63, 16  ;;  %v1313_v20 = vrot.slane %v1311_v54, 5  ;;  %v4474_v41 = vrot.slane %v2696_v4, 9 }
  0xe3   : > { %v1317_v32 = vrot.slane %v1315_v60, 4  ;;  %v2804_v43 = vrot.slane %v2272_v51, 5  ;;  %3581 = vrot.lane.b32.xlu0 %v4617_v17, %s4847_s8  ;;  %v1308_v14 = vor.u32 %v1307_v35, %v1304_v34  ;;  %v2807_v27 = vrot.slane %v5731_v62, 5  ;;  %v1664_v60 = vld [vmem:[#allocation2 + $0x6c] sm:$0xf] }
  0xe4   : > { %v2496_v6 = vsel %vm4980_vm12, %v2491_v55, %v2495_v45  ;;  %v1323_v52 = vrot.slane %v1321_v16, 5  ;;  %v4444_v9 = vrot.slane %v1478_v39, 9  ;;  %v1601_v28 = vrot.slane %v1053_v22, 5  ;;  %v5771_v22 = vpop.permute.xlu1 %2981  ;;  %v1665_v35 = vld [vmem:[#allocation2 + $0x70] sm:$0xf]  ;;  %v5778_v16 = vpop.permute.xlu0 %3489 }
  0xe5   : > { %v4602_v21 = vcombine.low %v2486_v0, %v2496_v6  ;;  %v1318_v3 = vor.u32 %v1317_v32, %v1313_v20  ;;  %v2805_v61 = vsel %vm4917_vm8, %v4474_v41, %v2804_v43  ;;  %v2806_v56 = vrot.slane %v2804_v43, 4  ;;  %v5786_v41 = vld [vmem:[%s6906_s2] ss:$0 sm:$0xff] }
  0xe6   : > { %v1309_v51 = vrot.slane %v1308_v14, 4  ;;  %v1604_v38 = vrot.slane %v1075_v63, 5  ;;  %v4443_v4 = vrot.slane %v1477_v58, 9  ;;  %v1594_v62 = vrot.slane %v5710_v40, 5 }
  0xe7   : > { %3503 = vrot.lane.b32.xlu1 %v4602_v21, %s4849_s10  ;;  %v1319_v45 = vrot.slane %v1318_v3, 4  ;;  %v2808_v30 = vsel %vm4917_vm8, %v2806_v56, %v2807_v27  ;;  %v1602_v34 = vsel %vm4917_vm8, %v4444_v9, %v1601_v28  ;;  %v1603_v54 = vrot.slane %v1601_v28, 4  ;;  %v1688_v56 = vld [vmem:[#allocation2 + $0x74] sm:$0x1] }
  0xe8   : > { %v1314_v0 = vsel %vm4980_vm12, %v1309_v51, %v1313_v20  ;;  %v4618_v24 = vcombine.low %v2805_v61, %v2808_v30  ;;  %v1595_v55 = vsel %vm4917_vm8, %v4443_v4, %v1594_v62  ;;  %v1596_v17 = vrot.slane %v1594_v62, 4  ;;  %v2088_v51 = vld [vmem:[#allocation2 + $0x6c] sm:$0xe]  ;;  %v5797_v4 = vpop.permute.xlu1 %2983 }
  0xe9   : > { %v1324_v63 = vsel %vm4980_vm12, %v1319_v45, %v1323_v52  ;;  %v1597_v40 = vrot.slane %v5716_v10, 5  ;;  %v1605_v32 = vsel %vm4917_vm8, %v1603_v54, %v1604_v38  ;;  %v456_v43 = vadd.f32 %v5786_v41, %v5665_v2  ;;  %v335_v10 = vld [vmem:[#allocation2 + $0x80] sm:$0x1]  ;;  %v5800_v54 = vpop.permute.xlu0 %3237 }
  0xea   : > { %v4508_v20 = vcombine.low %v1314_v0, %v1324_v63  ;;  %3583 = vrot.lane.b32.xlu0 %v4618_v24, %s4847_s8  ;;  %v487_v39 = vmax.f32 %v5672_v19, 0.0  ;;  %v4524_v6 = vcombine.low %v1602_v34, %v1605_v32  ;;  %v1889_v52 = vshrl.u32 %v1664_v60, 16 }
  0xeb   : > { %2993 = vrot.lane.b32.xlu1 %v4507_v26, %s4843_s29  ;;  %v1598_v14 = vsel %vm4917_vm8, %v1596_v17, %v1597_v40  ;;  %v1892_v27 = vshll.u32 %v1664_v60, 16  ;;  %v488_v21 = vmax.f32 %v456_v43, 0.0  ;;  %v1902_v61 = vshrl.u32 %v1665_v35, 16  ;;  %v985_v40 = vld [vmem:[#allocation2 + $0x78] sm:$0xf] }
  0xec   : > { %v4523_v58 = vcombine.low %v1595_v55, %v1598_v14  ;;  %v4668_v3 = vpack.c.bf16 %v487_v39, %v487_v39  ;;  %v1891_v9 = vrot.slane %v1889_v52, 4  ;;  %v4539_v2 = vcombine.low %v1664_v60, %v1665_v35 }
  0xed   : > { %v1894_v28 = vrot.slane %v1892_v27, 5  ;;  %v336_v19 = vsel %vm4908_vm7, 0, %v335_v10  ;;  %v4669_v26 = vpack.c.bf16 %v488_v21, %v488_v21  ;;  %v1898_v30 = vshll.u32 %v1665_v35, 16  ;;  %v379_v21 = vld [vmem:[%s4926_s23 + $0xa0] sm:$0xff] }
  0xee   : > { %3073 = vrot.lane.b32.xlu0 %v4523_v58, %s4842_s28  ;;  %v753_v38 = vshrl.u32 %v4668_v3, 16  ;;  %v756_v45 = vshll.u32 %v4668_v3, 16  ;;  %337 = vst [vmem:[#allocation2 + $0x80] sm:$0x1] %v336_v19  ;;  %v1904_v0 = vrot.slane %v1902_v61, 4  ;;  %v1908_v24 = vshll.u32 %v1688_v56, 16  ;;  %v5814_v19 = vpop.permute.xlu1 %3239 }
  0xef   : > { %2995 = vrot.lane.b32.xlu1 %v4508_v20, %s4843_s29  ;;  %v1895_v62 = vor.u32 %v1894_v28, %v1891_v9  ;;  %v4459_v34 = vrot.slane %v2088_v51, 9  ;;  %v761_v63 = vshrl.u32 %v4669_v26, 16  ;;  %v764_v55 = vshll.u32 %v4669_v26, 16  ;;  %v282_v58 = vld [vmem:[#allocation2 + $0x84] sm:$0x1] }
  0xf0   : > { %v755_v60 = vrot.slane %v753_v38, 7  ;;  %v1900_v17 = vrot.slane %v1898_v30, 5  ;;  %v1910_v43 = vrot.slane %v1908_v24, 5  ;;  %v2202_v39 = vrot.slane %v1665_v35, 5  ;;  %v5828_v30 = vld [vmem:[%s6905_s1] ss:$0 sm:$0xff] }
  0xf1   : > { %v1896_v32 = vrot.slane %v1895_v62, 4  ;;  %v2205_v10 = vrot.slane %v1688_v56, 5  ;;  %v763_v20 = vrot.slane %v761_v63, 7  ;;  %vm3716_vm4 = vcmask 130048  }
  0xf2   : > { %v758_v14 = vor.u32 %v756_v45, %v755_v60  ;;  %v759_v52 = vrot.slane %v755_v60, 4  ;;  %3169 = vrot.lane.b32.xlu0 %v4539_v2, %s4844_s30  ;;  %v1905_v27 = vor.u32 %v1904_v0, %v1900_v17  ;;  %v5809_v61 = vsel %vm4917_vm8, %v4459_v34, %v2202_v39  ;;  %v380_v2 = vld [vmem:[%s4926_s23 + $0xa8] sm:$0xff]  ;;  %v5831_v0 = vpop.permute.xlu0 %3317 }
  0xf3   : > { %3075 = vrot.lane.b32.xlu1 %v4524_v6, %s4842_s28  ;;  %v1901_v3 = vsel %vm4980_vm12, %v1896_v32, %v1900_v17  ;;  %v2204_v35 = vrot.slane %v2202_v39, 4  ;;  %v766_v56 = vor.u32 %v764_v55, %v763_v20  ;;  %v768_v51 = vrot.slane %v763_v20, 4  ;;  %v338_v55 = vld [vmem:[#allocation2 + $0x8c] sm:$0x1]  ;;  %v4807_v32 = vld [vmem:[#allocation2 + $0x1c] sm:$0xf] }
  0xf4   : > { %v986_v9 = vsel %vm4988_vm13, %v758_v14, %v985_v40  ;;  %v1906_v28 = vrot.slane %v1905_v27, 4  ;;  %v3607_v38 = vsel %vm3601_vm15, %v4484_v46, %v5741_v59  ;;  %v283_v45 = vsel %vm4896_vm3, 0, %v282_v58  ;;  %v5848_v17 = vld [vmem:[%s6907_s3 + $0x10] ss:$0 sps:$4 sm:$0x33]  }
  0xf5   : > { %987 = vst [vmem:[#allocation2 + $0x78] sm:$0xf] %v986_v9  ;;  %v989_v6 = vld [vmem:[#allocation2 + $0x80] sm:$0x1]  ;;  %v2206_v26 = vsel %vm4917_vm8, %v2204_v35, %v2205_v10  ;;  %v418_v62 = vmul.f32 %v5828_v30, %v379_v21  ;;  %v767_v24 = vsel %vm4997_vm14, %v759_v52, %v766_v56  ;;  %284 = vst [vmem:[#allocation2 + $0x84] sm:$0x1] %v283_v45 }
  0xf6   : > { %v990_v36 = vsel %vm4896_vm3, %v768_v51, %v989_v6  ;;  %v1911_v57 = vsel %vm4980_vm12, %v1906_v28, %v1910_v43  ;;  %v4571_v46 = vcombine.low %v5809_v61, %v2206_v26  ;;  %988 = vst.msk [vmem:[#allocation2 + $0x7c] sm:$0xf] %vm237_vm0, %v767_v24  ;;  %v3654_v34 = vsel %vm3650_vm1, %v3607_v38, %v5668_v49  ;;  %v4808_v43 = vld [vmem:[#allocation2 + $0x18] sm:$0xf]  ;;  %v4809_v58 = vld [vmem:[#allocation2 + $0x28] sm:$0xf] }
  0xf7   : > { %991 = vst [vmem:[#allocation2 + $0x80] sm:$0x1] %v990_v36  ;;  %v4555_v59 = vcombine.low %v1901_v3, %v1911_v57  ;;  %v419_v60 = vmul.f32 %v5828_v30, %v380_v2  ;;  %v457_v63 = vadd.f32 %v5786_v41, %v418_v62  ;;  %v3687_v40 = vsel %vm3683_vm2, %v3654_v34, %v5594_v5  ;;  %v4810_v21 = vld [vmem:[#allocation2 + $0x24] sm:$0xf] }
  0xf8   : > { %v4485_v39 = vcombine.low %v4808_v43, %v4807_v32  ;;  %vm3749_vm5 = vcmask 162816   ;;  %v3718_v49 = vsel %vm3716_vm4, %v5658_v53, %v5755_v13  ;;  %v3720_v10 = vsel %vm3716_vm4, %v3687_v40, %v5736_v11  ;;  %v5865_v13 = vpop.permute.xlu1 %3319 }
  0xf9   : > { %3249 = vrot.lane.b32.xlu0 %v4555_v59, %s4848_s9  ;;  %v458_v14 = vadd.f32 %v5786_v41, %v419_v60  ;;  %v489_v52 = vmax.f32 %v457_v63, 0.0  ;;  %v3751_v20 = vsel %vm3749_vm5, %v3718_v49, %v5650_v48  ;;  %v339_v27 = vsel %vm4908_vm7, 0, %v338_v55  ;;  %v5871_v48 = vpop.permute.xlu0 %3413 }
  0xfa   : > { %v3610_v5 = vsel %vm3601_vm15, %v4485_v39, %v5771_v22  ;;  %v4486_v53 = vcombine.low %v4810_v21, %v4809_v58  ;;  %vm3934_vm6 = vcmask 1041408   ;;  %340 = vst [vmem:[#allocation2 + $0x8c] sm:$0x1] %v339_v27  ;;  %vm3782_vm9 = vcmask 195584  }
  0xfb   : > { %v490_v3 = vmax.f32 %v458_v14, 0.0  ;;  %v4670_v11 = vpack.c.bf16 %v489_v52, %v489_v52  ;;  %v3656_v61 = vsel %vm3650_vm1, %v3610_v5, %v5725_v18  ;;  %4745 = vmatprep.subr.msk.bf16.mxu0 %vm3934_vm6, %v5848_v17  ;;  %4746 = vmatprep.subr.msk.bf16.mxu1 %vm3934_vm6, %v5848_v17  ;;  %v5879_v51 = vsel %vm3782_vm9, %v3751_v20, %v5602_v50 }
  0xfc   : > { %v1666_v22 = vld [vmem:[#allocation2 + $0x78] sm:$0xf]  ;;  %v3613_v56 = vsel %vm3601_vm15, %v4486_v53, %v5797_v4  ;;  %v3753_v18 = vsel %vm3749_vm5, %v3720_v10, %v5694_v23  ;;  %v5890_v50 = vsel %vm3683_vm2, %v3656_v61, %v5620_v15  ;;  %v5892_v63 = vpop.permute.xlu1 %3415  ;;  %v992_v14 = vld [vmem:[#allocation2 + $0x84] sm:$0xf]  ;;  %vm3815_vm10 = vcmask 228352  }
  0xfd   : > { %v2089_v35 = vld [vmem:[#allocation2 + $0x78] sm:$0xe]  ;;  %v1913_v9 = vshrl.u32 %v1666_v22, 16  ;;  %v1916_v28 = vshll.u32 %v1666_v22, 16  ;;  %3329 = vrot.lane.b32.xlu0 %v4571_v46, %s4846_s7  ;;  %v4671_v6 = vpack.c.bf16 %v490_v3, %v490_v3  ;;  %v1667_v26 = vld [vmem:[#allocation2 + $0x7c] sm:$0xf]  ;;  %v5886_v4 = vsel %vm3650_vm1, %v3613_v56, %v5721_v37  ;;  %v5895_v39 = vpop.permute.xlu0 %3493 }
  0xfe   : > { %v4460_v2 = vrot.slane %v2089_v35, 9  ;;  %v1689_v38 = vld [vmem:[#allocation2 + $0x80] sm:$0x1]  ;;  %v770_v45 = vshrl.u32 %v4670_v11, 16  ;;  %v773_v62 = vshll.u32 %v4670_v11, 16  ;;  %v1926_v36 = vshrl.u32 %v1667_v26, 16 }
  0xff   : > { %v1915_v24 = vrot.slane %v1913_v9, 4  ;;  %v1918_v23 = vrot.slane %v1916_v28, 5  ;;  %v4540_v57 = vcombine.low %v1666_v22, %v1667_v26  ;;  %v1922_v59 = vshll.u32 %v1667_v26, 16  ;;  %v2273_v43 = vld [vmem:[#allocation2 + $0x78] sm:$0xf] }
 0x100   : > { %v1932_v34 = vshll.u32 %v1689_v38, 16  ;;  %v2209_v46 = vrot.slane %v1667_v26, 5  ;;  %v2212_v60 = vrot.slane %v1689_v38, 5  ;;  %v1928_v40 = vrot.slane %v1926_v36, 4  ;;  %v5905_v21 = vld [vmem:[#allocation2 + $0x7c] sm:$0xf] }
 0x101   : > { %3171 = vrot.lane.b32.xlu1 %v4540_v57, %s4844_s30  ;;  %v1919_v55 = vor.u32 %v1918_v23, %v1915_v24  ;;  %v772_v37 = vrot.slane %v770_v45, 7  ;;  %v778_v32 = vshrl.u32 %v4671_v6, 16  ;;  %v1924_v15 = vrot.slane %v1922_v59, 5  ;;  %v996_v22 = vld [vmem:[#allocation2 + $0x8c] sm:$0x1]  ;;  %v5922_v36 = vpop.permute.xlu0 %3573 }
 0x102   : > { %v1934_v49 = vrot.slane %v1932_v34, 5  ;;  %v2211_v10 = vrot.slane %v2209_v46, 4  ;;  %v5899_v52 = vsel %vm3782_vm9, %v3753_v18, %v5617_v29  ;;  %v5903_v5 = vsel %vm4917_vm8, %v4460_v2, %v2209_v46  ;;  %v5913_v9 = vld [vmem:[#allocation2 + $0x80] sm:$0x1] }
 0x103   : > { %v1920_v20 = vrot.slane %v1919_v55, 4  ;;  %v775_v27 = vor.u32 %v773_v62, %v772_v37  ;;  %v780_v58 = vrot.slane %v778_v32, 7  ;;  %v1929_v53 = vor.u32 %v1928_v40, %v1924_v15  ;;  %v5929_v55 = vld [vmem:[#allocation2 + $0x7c] sm:$0xf] }
 0x104   : > { %v776_v3 = vrot.slane %v772_v37, 4  ;;  %v781_v11 = vshll.u32 %v4671_v6, 16  ;;  %v2498_v61 = vshrl.u32 %v2273_v43, 16  ;;  %v2213_v29 = vsel %vm4917_vm8, %v2211_v10, %v2212_v60  ;;  %v5915_v6 = vpop.permute.xlu1 %3495  ;;  %v1054_v60 = vld [vmem:[#allocation2 + $0x78] sm:$0xf] }
 0x105   : > { %v1925_v35 = vsel %vm4980_vm12, %v1920_v20, %v1924_v15  ;;  %v785_v56 = vrot.slane %v780_v58, 4  ;;  %v993_v18 = vsel %vm4988_vm13, %v775_v27, %v992_v14  ;;  %v1930_v28 = vrot.slane %v1929_v53, 4  ;;  %v5934_v15 = vld [vmem:[#allocation2 + $0x80] sm:$0x1] }
 0x106   : > { %v783_v2 = vor.u32 %v781_v11, %v780_v58  ;;  %994 = vst [vmem:[#allocation2 + $0x84] sm:$0xf] %v993_v18  ;;  %v2500_v26 = vrot.slane %v2498_v61, 4  ;;  %v2501_v38 = vshll.u32 %v2273_v43, 16  ;;  %v2511_v45 = vshrl.u32 %v5905_v21, 16 }
 0x107   : > { %v4587_v62 = vcombine.low %v2273_v43, %v5905_v21  ;;  %v997_v24 = vsel %vm4896_vm3, %v785_v56, %v996_v22  ;;  %v2507_v23 = vshll.u32 %v5905_v21, 16  ;;  %v1935_v57 = vsel %vm4980_vm12, %v1930_v28, %v1934_v49  ;;  %v2697_v22 = vld [vmem:[#allocation2 + $0x78] sm:$0xe] }
 0x108   : > { %v784_v59 = vsel %vm4997_vm14, %v776_v3, %v783_v2  ;;  %v2503_v34 = vrot.slane %v2501_v38, 5  ;;  %998 = vst [vmem:[#allocation2 + $0x8c] sm:$0x1] %v997_v24  ;;  %v2517_v46 = vshll.u32 %v5913_v9, 16  ;;  %v4556_v40 = vcombine.low %v1925_v35, %v1935_v57  ;;  %v5945_v35 = vpop.permute.xlu1 %2985  ;;  %v5947_v2 = vpop.permute.xlu0 %3575 }
 0x109   : > { %v4572_v37 = vcombine.low %v5903_v5, %v2213_v29  ;;  %995 = vst.msk [vmem:[#allocation2 + $0x88] sm:$0xf] %vm237_vm0, %v784_v59  ;;  %3425 = vrot.lane.b32.xlu0 %v4587_v62, %s4845_s6  ;;  %v2509_v32 = vrot.slane %v2507_v23, 5  ;;  %v2513_v43 = vrot.slane %v2511_v45, 4  ;;  %v3936_v14 = vsel %vm3934_vm6, %v5848_v17, 0 }
 0x10a   : > { %v2504_v49 = vor.u32 %v2503_v34, %v2500_v26  ;;  %v2519_v10 = vrot.slane %v2517_v46, 5  ;;  %3251 = vrot.lane.b32.xlu1 %v4556_v40, %s4848_s9  ;;  %4706 = vmatpush3.bf16.msra.mxu0 %v3936_v14  ;;  %v1326_v27 = vshrl.u32 %v1054_v60, 16  ;;  %v1329_v5 = vshll.u32 %v1054_v60, 16 }
 0x10b   : > { %v2514_v20 = vor.u32 %v2513_v43, %v2509_v32  ;;  %v1335_v58 = vshll.u32 %v5929_v55, 16  ;;  %v3817_v3 = vsel %vm3815_vm10, %v5879_v51, %v5778_v16  ;;  %v1339_v11 = vshrl.u32 %v5929_v55, 16  ;;  %4744 = vmatpush3.bf16.msra.mxu1 %v3936_v14 }
 0x10c   : > { %v2505_v53 = vrot.slane %v2504_v49, 4  ;;  %v1345_v61 = vshll.u32 %v5934_v15, 16  ;;  %v1328_v56 = vrot.slane %v1326_v27, 4  ;;  %v1331_v18 = vrot.slane %v1329_v5, 5  ;;  %v5964_v27 = vpop.permute.xlu1 %2987 }
 0x10d   : > { %v2275_v17 = vld [vmem:[#allocation2 + $0x84] sm:$0xf]  ;;  %v2515_v29 = vrot.slane %v2514_v20, 4  ;;  %v1337_v28 = vrot.slane %v1335_v58, 5  ;;  %v1341_v51 = vrot.slane %v1339_v11, 4  ;;  %v4475_v23 = vrot.slane %v2697_v22, 9  ;;  %v5969_v22 = vpop.permute.xlu0 %3065 }
 0x10e   : > { %v2522_v26 = vshrl.u32 %v2275_v17, 16  ;;  %v2525_v38 = vshll.u32 %v2275_v17, 16  ;;  %v2510_v16 = vsel %vm4980_vm12, %v2505_v53, %v2509_v32  ;;  %3331 = vrot.lane.b32.xlu1 %v4572_v37, %s4846_s7  ;;  %v1332_v24 = vor.u32 %v1331_v18, %v1328_v56 }
 0x10f   : > { %v5952_v45 = vld [vmem:[#allocation2 + $0x8c] sm:$0x1]  ;;  %v2520_v62 = vsel %vm4980_vm12, %v2515_v29, %v2519_v10  ;;  %v2811_v57 = vrot.slane %v5905_v21, 5  ;;  %v1342_v20 = vor.u32 %v1341_v51, %v1337_v28  ;;  %v1347_v21 = vrot.slane %v1345_v61, 5 }
 0x110   : > { %v5957_v59 = vld [vmem:[#allocation2 + $0x88] sm:$0xf]  ;;  %v2524_v34 = vrot.slane %v2522_v26, 4  ;;  %v2527_v46 = vrot.slane %v2525_v38, 5  ;;  %v2541_v60 = vshll.u32 %v5952_v45, 16  ;;  %v4603_v40 = vcombine.low %v2510_v16, %v2520_v62 }
 0x111   : > { %v2535_v32 = vshrl.u32 %v5957_v59, 16  ;;  %v4588_v37 = vcombine.low %v2275_v17, %v5957_v59  ;;  %v2531_v43 = vshll.u32 %v5957_v59, 16  ;;  %v1333_v49 = vrot.slane %v1332_v24, 4  ;;  %v1056_v38 = vld [vmem:[#allocation2 + $0x84] sm:$0xf] }
 0x112   : > { %v2528_v14 = vor.u32 %v2527_v46, %v2524_v34  ;;  %v2543_v10 = vrot.slane %v2541_v60, 5  ;;  %3505 = vrot.lane.b32.xlu0 %v4603_v40, %s4849_s10  ;;  %v2812_v53 = vsel %vm4917_vm8, %v4475_v23, %v2811_v57  ;;  %v2813_v11 = vrot.slane %v2811_v57, 4  ;;  %v2698_v34 = vld [vmem:[#allocation2 + $0x84] sm:$0xe]  ;;  %v5995_v60 = vpop.permute.xlu1 %3067 }
 0x113   : > { %3427 = vrot.lane.b32.xlu1 %v4588_v37, %s4845_s6  ;;  %v2533_v5 = vrot.slane %v2531_v43, 5  ;;  %v2537_v58 = vrot.slane %v2535_v32, 4  ;;  %v1343_v29 = vrot.slane %v1342_v20, 4  ;;  %v2814_v56 = vrot.slane %v5913_v9, 5  ;;  %v1480_v20 = vld [vmem:[#allocation2 + $0x84] sm:$0xe] }
 0x114   : > { %v2529_v17 = vrot.slane %v2528_v14, 4  ;;  %v3691_v61 = vsel %vm3683_vm2, %v5886_v4, %v5641_v44  ;;  %v1338_v26 = vsel %vm4980_vm12, %v1333_v49, %v1337_v28  ;;  %vm3848_vm11 = vcmask 261120   ;;  %v1057_v44 = vld [vmem:[#allocation2 + $0x88] sm:$0xf]  ;;  %v5985_v4 = vld [vmem:[#allocation2 + $0x8c] sm:$0x1] }
 0x115   : > { %v2538_v18 = vor.u32 %v2537_v58, %v2533_v5  ;;  %vm3901_vm6 = vcmask 293888   ;;  %v1348_v16 = vsel %vm4980_vm12, %v1343_v29, %v1347_v21  ;;  %v2815_v51 = vsel %vm4917_vm8, %v2813_v11, %v2814_v56 }
 0x116   : > { %v3724_v9 = vsel %vm3716_vm4, %v3691_v61, %v5814_v19  ;;  %v3850_v62 = vsel %vm3848_vm11, %v3817_v3, %v5680_v42  ;;  %v2534_v28 = vsel %vm4980_vm12, %v2529_v17, %v2533_v5  ;;  %v4619_v23 = vcombine.low %v2812_v53, %v2815_v51  ;;  %v1479_v53 = vld [vmem:[#allocation2 + $0x78] sm:$0xe]  ;;  %v6015_v51 = vpop.permute.xlu1 %3163 }
 0x117   : > { %v2539_v24 = vrot.slane %v2538_v18, 4  ;;  %4707 = vmatprep.mubr.msk.bf16.mxu0 %vm3901_vm6, %v3850_v62  ;;  %v3819_v57 = vsel %vm3815_vm10, %v5899_v52, %v5753_v47  ;;  %v4509_v46 = vcombine.low %v1338_v26, %v1348_v16  ;;  %v1350_v42 = vshrl.u32 %v1056_v38, 16  ;;  %v6002_v52 = vpop.permute.xlu0 %3161 }
 0x118   : > { %v3852_v19 = vsel %vm3848_vm11, %v3819_v57, %v5701_v33  ;;  %v1353_v3 = vshll.u32 %v1056_v38, 16  ;;  %3585 = vrot.lane.b32.xlu0 %v4619_v23, %s4847_s8  ;;  %v1359_v32 = vshll.u32 %v1057_v44, 16  ;;  %v1363_v37 = vshrl.u32 %v1057_v44, 16 }
 0x119   : > { %v2544_v40 = vsel %vm4980_vm12, %v2539_v24, %v2543_v10  ;;  %4708 = vmatmul.mubr.msk.bf16.vlgmr.msra.gmra.mrb[0].mxu0 %vm3901_vm6, %v3852_v19  ;;  %v1369_v47 = vshll.u32 %v5985_v4, 16  ;;  %v1352_v49 = vrot.slane %v1350_v42, 4  ;;  %v4476_v14 = vrot.slane %v2698_v34, 9  ;;  %v381_v34 = vld [vmem:[%s4926_s23 + $0xb0] sm:$0xff]  ;;  %v382_v19 = vld [vmem:[%s4926_s23 + $0xb8] sm:$0xff] }
 0x11a   : > { %v4604_v43 = vcombine.low %v2534_v28, %v2544_v40  ;;  %v1355_v33 = vrot.slane %v1353_v3, 5  ;;  %v3722_v21 = vsel %vm3716_vm4, %v5890_v50, %v5800_v54  ;;  %v1361_v10 = vrot.slane %v1359_v32, 5  ;;  %v285_v28 = vld [vmem:[#allocation2 + $0x90] sm:$0x1]  ;;  %v1668_v3 = vld [vmem:[#allocation2 + $0x84] sm:$0xf] }
 0x11b   : > { %v1365_v5 = vrot.slane %v1363_v37, 4  ;;  %v2818_v58 = vrot.slane %v5957_v59, 5  ;;  %v1371_v17 = vrot.slane %v1369_v47, 5  ;;  %v2821_v29 = vrot.slane %v5952_v45, 5  ;;  %v6021_v24 = vpop.permute.xlu0 %3241  ;;  %v6036_v40 = vld [vmem:[#allocation2 + $0x88] sm:$0xf] }
 0x11c   : > { %3507 = vrot.lane.b32.xlu1 %v4604_v43, %s4849_s10  ;;  %v1356_v11 = vor.u32 %v1355_v33, %v1352_v49  ;;  %v3757_v56 = vsel %vm3749_vm5, %v3724_v9, %v5865_v13  ;;  %v4446_v54 = vrot.slane %v1480_v20, 9  ;;  %v1615_v38 = vrot.slane %v1057_v44, 5  ;;  %v341_v20 = vld [vmem:[#allocation2 + $0x98] sm:$0x1] }
 0x11d   : > { %v1366_v61 = vor.u32 %v1365_v5, %v1361_v10  ;;  %v2819_v18 = vsel %vm4917_vm8, %v4476_v14, %v2818_v58  ;;  %v2820_v26 = vrot.slane %v2818_v58, 4  ;;  %v1618_v59 = vrot.slane %v5985_v4, 5  ;;  %v6051_v58 = vpop.permute.xlu1 %3243 }
 0x11e   : > { %v1357_v50 = vrot.slane %v1356_v11, 4  ;;  %v4445_v16 = vrot.slane %v1479_v53, 9  ;;  %v1608_v13 = vrot.slane %v5929_v55, 5  ;;  %v1611_v9 = vrot.slane %v5934_v15, 5 }
 0x11f   : > { %v1367_v62 = vrot.slane %v1366_v61, 4  ;;  %v2822_v45 = vsel %vm4917_vm8, %v2820_v26, %v2821_v29  ;;  %v1616_v23 = vsel %vm4917_vm8, %v4446_v54, %v1615_v38  ;;  %v1617_v57 = vrot.slane %v1615_v38, 4  ;;  %v6060_v61 = vpop.permute.xlu0 %3321 }
 0x120   : > { %2997 = vrot.lane.b32.xlu1 %v4509_v46, %s4843_s29  ;;  %v1362_v44 = vsel %vm4980_vm12, %v1357_v50, %v1361_v10  ;;  %v4620_v4 = vcombine.low %v2819_v18, %v2822_v45  ;;  %v3755_v15 = vsel %vm3749_vm5, %v3722_v21, %v5831_v0  ;;  %v1609_v42 = vsel %vm4917_vm8, %v4445_v16, %v1608_v13  ;;  %v2090_v50 = vld [vmem:[#allocation2 + $0x84] sm:$0xe] }
 0x121   : > { %v1372_v55 = vsel %vm4980_vm12, %v1367_v62, %v1371_v17  ;;  %v1610_v46 = vrot.slane %v1608_v13, 4  ;;  %v1619_v37 = vsel %vm4917_vm8, %v1617_v57, %v1618_v59  ;;  %v3790_v47 = vsel %vm3782_vm9, %v3757_v56, %v5892_v63  ;;  %v6058_v56 = vld [vmem:[#allocation2 + $0x8c] sm:$0x1] }
 0x122   : > { %v4510_v32 = vcombine.low %v1362_v44, %v1372_v55  ;;  %3587 = vrot.lane.b32.xlu0 %v4620_v4, %s4847_s8  ;;  %v286_v43 = vsel %vm4896_vm3, 0, %v285_v28  ;;  %v4526_v0 = vcombine.low %v1616_v23, %v1619_v37  ;;  %v420_v33 = vmul.f32 %v5828_v30, %v381_v34  ;;  %v4811_v34 = vld [vmem:[#allocation2 + $0x30] sm:$0xf] }
 0x123   : > { %v1612_v49 = vsel %vm4917_vm8, %v1610_v46, %v1611_v9  ;;  %287 = vst [vmem:[#allocation2 + $0x90] sm:$0x1] %v286_v43  ;;  %v421_v14 = vmul.f32 %v5828_v30, %v382_v19  ;;  %v1937_v10 = vshrl.u32 %v1668_v3, 16  ;;  %v1940_v5 = vshll.u32 %v1668_v3, 16  ;;  %v4812_v19 = vld [vmem:[#allocation2 + $0x34] sm:$0xf]  ;;  %v6078_v46 = vpop.permute.xlu1 %3323  ;;  %v6080_v43 = vpop.permute.xlu0 %3417 }
 0x124   : > { %2999 = vrot.lane.b32.xlu1 %v4510_v32, %s4843_s29  ;;  %v4525_v21 = vcombine.low %v1609_v42, %v1612_v49  ;;  %v1950_v63 = vshrl.u32 %v6036_v40, 16  ;;  %v3788_v53 = vsel %vm3782_vm9, %v3755_v15, %v5871_v48  ;;  %v459_v11 = vadd.f32 %v5786_v41, %v420_v33  ;;  %v383_v42 = vld [vmem:[%s4926_s23 + $0xc0] sm:$0xff] }
 0x125   : > { %v460_v17 = vadd.f32 %v5786_v41, %v421_v14  ;;  %v4541_v29 = vcombine.low %v1668_v3, %v6036_v40  ;;  %v1939_v18 = vrot.slane %v1937_v10, 4  ;;  %v1942_v26 = vrot.slane %v1940_v5, 5  ;;  %v4813_v10 = vld [vmem:[#allocation2 + $0x3c] sm:$0xf]  ;;  %v4814_v5 = vld [vmem:[#allocation2 + $0x40] sm:$0xf] }
 0x126   : > { %3077 = vrot.lane.b32.xlu0 %v4525_v21, %s4842_s28  ;;  %v3823_v54 = vsel %vm3815_vm10, %v3790_v47, %v5915_v6  ;;  %v342_v48 = vsel %vm4908_vm7, 0, %v341_v20  ;;  %v491_v38 = vmax.f32 %v459_v11, 0.0  ;;  %v3821_v16 = vsel %vm3815_vm10, %v3788_v53, %v5895_v39  ;;  %v288_v47 = vld [vmem:[#allocation2 + $0x9c] sm:$0x1]  ;;  %v384_v53 = vld [vmem:[%s4926_s23 + $0xc8] sm:$0xff] }
 0x127   : > { %v492_v59 = vmax.f32 %v460_v17, 0.0  ;;  %343 = vst [vmem:[#allocation2 + $0x98] sm:$0x1] %v342_v48  ;;  %v1946_v62 = vshll.u32 %v6036_v40, 16  ;;  %v1943_v45 = vor.u32 %v1942_v26, %v1939_v18  ;;  %v1952_v13 = vrot.slane %v1950_v63, 4 }
 0x128   : > { %3079 = vrot.lane.b32.xlu1 %v4526_v0, %s4842_s28  ;;  %v1956_v9 = vshll.u32 %v6058_v56, 16  ;;  %v3854_v6 = vsel %vm3848_vm11, %v3821_v16, %v5922_v36  ;;  %v4672_v28 = vpack.c.bf16 %v491_v38, %v491_v38  ;;  %v4461_v23 = vrot.slane %v2090_v50, 9 }
 0x129   : > { %v4673_v44 = vpack.c.bf16 %v492_v59, %v492_v59  ;;  %v1948_v4 = vrot.slane %v1946_v62, 5  ;;  %4711 = vmatprep.mubr.msk.bf16.mxu0 %vm3901_vm6, %v3854_v6  ;;  %v1944_v39 = vrot.slane %v1943_v45, 4  ;;  %v4487_v55 = vcombine.low %v4811_v34, %v4812_v19  ;;  %v344_v45 = vld [vmem:[#allocation2 + $0xa4] sm:$0x1]  ;;  %v385_v19 = vld [vmem:[%s4926_s23 + $0xd0] sm:$0xff] }
 0x12a   : > { %3173 = vrot.lane.b32.xlu0 %v4541_v29, %s4844_s30  ;;  %v1958_v57 = vrot.slane %v1956_v9, 5  ;;  %v2216_v15 = vrot.slane %v6036_v40, 5  ;;  %v787_v3 = vshrl.u32 %v4672_v28, 16  ;;  %v790_v36 = vshll.u32 %v4672_v28, 16  ;;  %v999_v11 = vld [vmem:[#allocation2 + $0x90] sm:$0xf] }
 0x12b   : > { %v795_v32 = vshrl.u32 %v4673_v44, 16  ;;  %v798_v37 = vshll.u32 %v4673_v44, 16  ;;  %v1949_v0 = vsel %vm4980_vm12, %v1944_v39, %v1948_v4  ;;  %v1953_v49 = vor.u32 %v1952_v13, %v1948_v4  ;;  %v3420_v13 = vpop.permute.xlu1 %3419  ;;  %v291_v9 = vld [vmem:[#allocation2 + $0xa8] sm:$0x1] }
 0x12c   : > { %v2217_v33 = vsel %vm4917_vm8, %v4461_v23, %v2216_v15  ;;  %v2218_v14 = vrot.slane %v2216_v15, 4  ;;  %v789_v40 = vrot.slane %v787_v3, 7  ;;  %v2219_v21 = vrot.slane %v6058_v56, 5  ;;  %v3498_v23 = vpop.permute.xlu0 %3497  ;;  %v386_v15 = vld [vmem:[%s4926_s23 + $0xd8] sm:$0xff] }
 0x12d   : > { %v797_v20 = vrot.slane %v795_v32, 7  ;;  %v4488_v63 = vcombine.low %v4813_v10, %v4814_v5  ;;  %v1954_v29 = vrot.slane %v1953_v49, 4  ;;  %v3856_v18 = vsel %vm3848_vm11, %v3823_v54, %v5947_v2 }
 0x12e   : > { %v1003_v17 = vld [vmem:[#allocation2 + $0x98] sm:$0x1]  ;;  %v289_v26 = vsel %vm4896_vm3, 0, %v288_v47  ;;  %v422_v48 = vmul.f32 %v5828_v30, %v383_v42  ;;  %v792_v50 = vor.u32 %v790_v36, %v789_v40  ;;  %v793_v38 = vrot.slane %v789_v40, 4  ;;  %4712 = vmatmul.mubr.msk.bf16.gmra.mrb[4].mxu0 %vm3901_vm6, %v3856_v18  ;;  %v6157_v18 = vld [vmem:[#allocation2 + $0x4c] sm:$0xf] }
 0x12f   : > { %v800_v59 = vor.u32 %v798_v37, %v797_v20  ;;  %v802_v16 = vrot.slane %v797_v20, 4  ;;  %290 = vst [vmem:[#allocation2 + $0x9c] sm:$0x1] %v289_v26  ;;  %v1959_v56 = vsel %vm4980_vm12, %v1954_v29, %v1958_v57  ;;  %v2220_v62 = vsel %vm4917_vm8, %v2218_v14, %v2219_v21  ;;  %v6155_v29 = vld [vmem:[#allocation2 + $0x48] sm:$0xf] }
 0x130   : > { %v3619_v2 = vsel %vm3601_vm15, %v4488_v63, %v5964_v27  ;;  %v423_v54 = vmul.f32 %v5828_v30, %v384_v53  ;;  %v1000_v28 = vsel %vm4988_vm13, %v792_v50, %v999_v11  ;;  %v4557_v4 = vcombine.low %v1949_v0, %v1959_v56 }
 0x131   : > { %v801_v6 = vsel %vm4997_vm14, %v793_v38, %v800_v59  ;;  %v1004_v44 = vsel %vm4896_vm3, %v802_v16, %v1003_v17  ;;  %1001 = vst [vmem:[#allocation2 + $0x90] sm:$0xf] %v1000_v28  ;;  %v3616_v27 = vsel %vm3601_vm15, %v4487_v55, %v5945_v35  ;;  %v4573_v39 = vcombine.low %v2217_v33, %v2220_v62 }
 0x132   : > { %1002 = vst.msk [vmem:[#allocation2 + $0x94] sm:$0xf] %vm237_vm0, %v801_v6  ;;  %1005 = vst [vmem:[#allocation2 + $0x98] sm:$0x1] %v1004_v44  ;;  %v461_v57 = vadd.f32 %v5786_v41, %v422_v48  ;;  %v462_v34 = vadd.f32 %v5786_v41, %v423_v54  ;;  %3253 = vrot.lane.b32.xlu0 %v4557_v4, %s4848_s9  ;;  %v3662_v42 = vsel %vm3650_vm1, %v3619_v2, %v5995_v60 }
 0x133   : > { %v3660_v3 = vsel %vm3650_vm1, %v3616_v27, %v5969_v22  ;;  %v345_v36 = vsel %vm4908_vm7, 0, %v344_v45  ;;  %v292_v35 = vsel %vm4896_vm3, 0, %v291_v9  ;;  %v3695_v37 = vsel %vm3683_vm2, %v3662_v42, %v6015_v51 }
 0x134   : > { %v493_v55 = vmax.f32 %v461_v57, 0.0  ;;  %v494_v32 = vmax.f32 %v462_v34, 0.0  ;;  %346 = vst [vmem:[#allocation2 + $0xa4] sm:$0x1] %v345_v36  ;;  %v3693_v47 = vsel %vm3683_vm2, %v3660_v3, %v6002_v52  ;;  %293 = vst [vmem:[#allocation2 + $0xa8] sm:$0x1] %v292_v35  ;;  %v3728_v60 = vsel %vm3716_vm4, %v3695_v37, %v6051_v58  ;;  %v3500_v52 = vpop.permute.xlu1 %3499 }
 0x135   : > { %v3726_v22 = vsel %vm3716_vm4, %v3693_v47, %v6021_v24  ;;  %v424_v0 = vmul.f32 %v5828_v30, %v385_v19  ;;  %v425_v49 = vmul.f32 %v5828_v30, %v386_v15  ;;  %v3761_v40 = vsel %vm3749_vm5, %v3728_v60, %v6078_v46  ;;  %v6144_v30 = vpop.permute.xlu0 %3577 }
 0x136   : > { %v4674_v33 = vpack.c.bf16 %v493_v55, %v493_v55  ;;  %v4675_v14 = vpack.c.bf16 %v494_v32, %v494_v32  ;;  %v3759_v51 = vsel %vm3749_vm5, %v3726_v22, %v6060_v61  ;;  %3333 = vrot.lane.b32.xlu0 %v4573_v39, %s4846_s7  ;;  %v3794_v58 = vsel %vm3782_vm9, %v3761_v40, %v3420_v13  ;;  %v1006_v36 = vld [vmem:[#allocation2 + $0x9c] sm:$0xf] }
 0x137   : > { %v3792_v24 = vsel %vm3782_vm9, %v3759_v51, %v6080_v43  ;;  %v6142_v20 = vadd.f32 %v5786_v41, %v424_v0  ;;  %v6147_v11 = vadd.f32 %v5786_v41, %v425_v49  ;;  %v6150_v17 = vsel %vm3815_vm10, %v3794_v58, %v3500_v52 }
 0x138   : > { %v804_v21 = vshrl.u32 %v4674_v33, 16  ;;  %v807_v10 = vshll.u32 %v4674_v33, 16  ;;  %v812_v5 = vshrl.u32 %v4675_v14, 16  ;;  %v815_v46 = vshll.u32 %v4675_v14, 16  ;;  %v1670_v63 = vld [vmem:[#allocation2 + $0x90] sm:$0xf]  ;;  %v6174_v0 = vpop.permute.xlu1 %2989 }
 0x139   : > { %v1671_v53 = vld [vmem:[#allocation2 + $0x94] sm:$0xf]  ;;  %v1691_v61 = vld [vmem:[#allocation2 + $0x98] sm:$0x1]  ;;  %v6153_v43 = vsel %vm3815_vm10, %v3792_v24, %v3498_v23  ;;  %v4489_v26 = vcombine.low %v6155_v29, %v6157_v18  ;;  %v1961_v48 = vshrl.u32 %v1670_v63, 16  ;;  %v1964_v50 = vshll.u32 %v1670_v63, 16  ;;  %v6168_v39 = vpop.permute.xlu0 %3579 }
 0x13a   : > { %v1974_v38 = vshrl.u32 %v1671_v53, 16  ;;  %v4542_v59 = vcombine.low %v1670_v63, %v1671_v53  ;;  %v2091_v16 = vld [vmem:[#allocation2 + $0x90] sm:$0xe]  ;;  %v1970_v41 = vshll.u32 %v1671_v53, 16  ;;  %v1980_v56 = vshll.u32 %v1691_v61, 16 }
 0x13b   : > { %v4462_v62 = vrot.slane %v2091_v16, 9  ;;  %v2223_v2 = vrot.slane %v1671_v53, 5  ;;  %v2277_v54 = vld [vmem:[#allocation2 + $0x90] sm:$0xf]  ;;  %v1963_v45 = vrot.slane %v1961_v48, 4  ;;  %v1966_v13 = vrot.slane %v1964_v50, 5 }
 0x13c   : > { %3175 = vrot.lane.b32.xlu1 %v4542_v59, %s4844_s30  ;;  %v1976_v9 = vrot.slane %v1974_v38, 4  ;;  %v2226_v6 = vrot.slane %v1691_v61, 5  ;;  %v6162_v28 = vld [vmem:[#allocation2 + $0x94] sm:$0xf]  ;;  %v1972_v44 = vrot.slane %v1970_v41, 5  ;;  %v1982_v4 = vrot.slane %v1980_v56, 5 }
 0x13d   : > { %v6166_v23 = vsel %vm4917_vm8, %v4462_v62, %v2223_v2  ;;  %v2225_v27 = vrot.slane %v2223_v2, 4  ;;  %v1967_v57 = vor.u32 %v1966_v13, %v1963_v45  ;;  %v806_v34 = vrot.slane %v804_v21, 7  ;;  %v1010_v22 = vld [vmem:[#allocation2 + $0xa4] sm:$0x1]  ;;  %v6176_v51 = vld [vmem:[#allocation2 + $0x98] sm:$0x1]  ;;  %v6194_v50 = vpop.permute.xlu0 %3069 }
 0x13e   : > { %v814_v19 = vrot.slane %v812_v5, 7  ;;  %v2546_v15 = vshrl.u32 %v2277_v54, 16  ;;  %v1977_v42 = vor.u32 %v1976_v9, %v1972_v44  ;;  %v2549_v35 = vshll.u32 %v2277_v54, 16  ;;  %v6183_v5 = vld [vmem:[#allocation2 + $0x94] sm:$0xf] }
 0x13f   : > { %v2227_v3 = vsel %vm4917_vm8, %v2225_v27, %v2226_v6  ;;  %v2559_v55 = vshrl.u32 %v6162_v28, 16  ;;  %v1968_v32 = vrot.slane %v1967_v57, 4  ;;  %v809_v47 = vor.u32 %v807_v10, %v806_v34  ;;  %v1058_v10 = vld [vmem:[#allocation2 + $0x90] sm:$0xf]  ;;  %v6192_v48 = vld [vmem:[#allocation2 + $0x98] sm:$0x1] }
 0x140   : > { %v4574_v37 = vcombine.low %v6166_v23, %v2227_v3  ;;  %v810_v60 = vrot.slane %v806_v34, 4  ;;  %v1978_v49 = vrot.slane %v1977_v42, 4  ;;  %v817_v33 = vor.u32 %v815_v46, %v814_v19 }
 0x141   : > { %v819_v14 = vrot.slane %v814_v19, 4  ;;  %v2548_v40 = vrot.slane %v2546_v15, 4  ;;  %v1973_v52 = vsel %vm4980_vm12, %v1968_v32, %v1972_v44  ;;  %v1007_v58 = vsel %vm4988_vm13, %v809_v47, %v1006_v36  ;;  %v2699_v44 = vld [vmem:[#allocation2 + $0x90] sm:$0xe]  ;;  %v6209_v36 = vld [vmem:[#allocation2 + $0x54] sm:$0xf] }
 0x142   : > { %v2551_v24 = vrot.slane %v2549_v35, 5  ;;  %v4589_v21 = vcombine.low %v2277_v54, %v6162_v28  ;;  %v1983_v63 = vsel %vm4980_vm12, %v1978_v49, %v1982_v4  ;;  %v818_v46 = vsel %vm4997_vm14, %v810_v60, %v817_v33  ;;  %1008 = vst [vmem:[#allocation2 + $0x9c] sm:$0xf] %v1007_v58  ;;  %v6203_v4 = vpop.permute.xlu1 %2991  ;;  %v6205_v19 = vld [vmem:[#allocation2 + $0x90] sm:$0xe]  ;;  %v6216_v49 = vpop.permute.xlu0 %3165 }
 0x143   : > { %v1011_v53 = vsel %vm4896_vm3, %v819_v14, %v1010_v22  ;;  %v2555_v61 = vshll.u32 %v6162_v28, 16  ;;  %v4558_v38 = vcombine.low %v1973_v52, %v1983_v63  ;;  %1009 = vst.msk [vmem:[#allocation2 + $0xa0] sm:$0xf] %vm237_vm0, %v818_v46  ;;  %v2561_v16 = vrot.slane %v2559_v55, 4  ;;  %v6211_v35 = vld [vmem:[#allocation2 + $0x58] sm:$0xf] }
 0x144   : > { %3429 = vrot.lane.b32.xlu0 %v4589_v21, %s4845_s6  ;;  %1012 = vst [vmem:[#allocation2 + $0xa4] sm:$0x1] %v1011_v53  ;;  %v2552_v59 = vor.u32 %v2551_v24, %v2548_v40  ;;  %v2565_v41 = vshll.u32 %v6176_v51, 16  ;;  %v1374_v62 = vshrl.u32 %v1058_v10, 16  ;;  %v1377_v2 = vshll.u32 %v1058_v10, 16 }
 0x145   : > { %v2557_v56 = vrot.slane %v2555_v61, 5  ;;  %v1383_v54 = vshll.u32 %v6183_v5, 16  ;;  %3255 = vrot.lane.b32.xlu1 %v4558_v38, %s4848_s9  ;;  %v1387_v9 = vshrl.u32 %v6183_v5, 16  ;;  %v1393_v6 = vshll.u32 %v6192_v48, 16 }
 0x146   : > { %v2553_v45 = vrot.slane %v2552_v59, 4  ;;  %v2567_v13 = vrot.slane %v2565_v41, 5  ;;  %v1376_v27 = vrot.slane %v1374_v62, 4  ;;  %v1379_v57 = vrot.slane %v1377_v2, 5 }
 0x147   : > { %v2562_v23 = vor.u32 %v2561_v16, %v2557_v56  ;;  %v1385_v34 = vrot.slane %v1383_v54, 5  ;;  %v1389_v42 = vrot.slane %v1387_v9, 4  ;;  %v1395_v3 = vrot.slane %v1393_v6, 5 }
 0x148   : > { %v2558_v15 = vsel %vm4980_vm12, %v2553_v45, %v2557_v56  ;;  %v4490_v55 = vcombine.low %v6209_v36, %v6211_v35  ;;  %v1380_v47 = vor.u32 %v1379_v57, %v1376_v27  ;;  %v4477_v60 = vrot.slane %v2699_v44, 9  ;;  %v6235_v57 = vpop.permute.xlu0 %3245 }
 0x149   : > { %v2563_v32 = vrot.slane %v2562_v23, 4  ;;  %v2825_v22 = vrot.slane %v6162_v28, 5  ;;  %3335 = vrot.lane.b32.xlu1 %v4574_v37, %s4846_s7  ;;  %v2279_v33 = vld [vmem:[#allocation2 + $0x9c] sm:$0xf]  ;;  %v1390_v14 = vor.u32 %v1389_v42, %v1385_v34  ;;  %v1625_v40 = vrot.slane %v6192_v48, 5 }
 0x14a   : > { %v2828_v52 = vrot.slane %v6176_v51, 5  ;;  %v4447_v58 = vrot.slane %v6205_v19, 9  ;;  %v2280_v24 = vld [vmem:[#allocation2 + $0xa0] sm:$0xf]  ;;  %v2570_v21 = vshrl.u32 %v2279_v33, 16  ;;  %v2573_v10 = vshll.u32 %v2279_v33, 16  ;;  %v6229_v51 = vpop.permute.xlu1 %3071 }
 0x14b   : > { %v6222_v63 = vld [vmem:[#allocation2 + $0xa4] sm:$0x1]  ;;  %v2568_v28 = vsel %vm4980_vm12, %v2563_v32, %v2567_v13  ;;  %v2826_v46 = vsel %vm4917_vm8, %v4477_v60, %v2825_v22  ;;  %v2583_v37 = vshrl.u32 %v2280_v24, 16  ;;  %v4590_v53 = vcombine.low %v2279_v33, %v2280_v24  ;;  %v1060_v59 = vld [vmem:[#allocation2 + $0x9c] sm:$0xf] }
 0x14c   : > { %v2579_v61 = vshll.u32 %v2280_v24, 16  ;;  %v2589_v38 = vshll.u32 %v6222_v63, 16  ;;  %v2572_v16 = vrot.slane %v2570_v21, 4  ;;  %v2575_v41 = vrot.slane %v2573_v10, 5  ;;  %v1061_v2 = vld [vmem:[#allocation2 + $0xa0] sm:$0xf] }
 0x14d   : > { %v4605_v56 = vcombine.low %v2558_v15, %v2568_v28  ;;  %v1381_v62 = vrot.slane %v1380_v47, 4  ;;  %3431 = vrot.lane.b32.xlu1 %v4590_v53, %s4845_s6  ;;  %v2585_v45 = vrot.slane %v2583_v37, 4  ;;  %v1391_v9 = vrot.slane %v1390_v14, 4  ;;  %v1079_v32 = vld [vmem:[#allocation2 + $0xa4] sm:$0x1] }
 0x14e   : > { %v2581_v54 = vrot.slane %v2579_v61, 5  ;;  %v2591_v13 = vrot.slane %v2589_v38, 5  ;;  %v2576_v6 = vor.u32 %v2575_v41, %v2572_v16  ;;  %v2827_v23 = vrot.slane %v2825_v22, 4  ;;  %v2700_v28 = vld [vmem:[#allocation2 + $0x9c] sm:$0xe]  ;;  %v6241_v61 = vpop.permute.xlu1 %3167 }
 0x14f   : > { %3509 = vrot.lane.b32.xlu0 %v4605_v56, %s4849_s10  ;;  %v1386_v44 = vsel %vm4980_vm12, %v1381_v62, %v1385_v34  ;;  %v1398_v27 = vshrl.u32 %v1060_v59, 16  ;;  %v1396_v15 = vsel %vm4980_vm12, %v1391_v9, %v1395_v3  ;;  %v1401_v47 = vshll.u32 %v1060_v59, 16  ;;  %v1482_v41 = vld [vmem:[#allocation2 + $0x9c] sm:$0xe] }
 0x150   : > { %v2586_v42 = vor.u32 %v2585_v45, %v2581_v54  ;;  %v1407_v60 = vshll.u32 %v1061_v2, 16  ;;  %v2577_v33 = vrot.slane %v2576_v6, 4  ;;  %v4511_v21 = vcombine.low %v1386_v44, %v1396_v15 }
 0x151   : > { %v2829_v14 = vsel %vm4917_vm8, %v2827_v23, %v2828_v52  ;;  %v1400_v10 = vrot.slane %v1398_v27, 4  ;;  %v1403_v22 = vrot.slane %v1401_v47, 5  ;;  %v1411_v3 = vshrl.u32 %v1061_v2, 16  ;;  %v6249_v23 = vld [vmem:[#allocation2 + $0x9c] sm:$0xf] }
 0x152   : > { %v2587_v37 = vrot.slane %v2586_v42, 4  ;;  %v4621_v34 = vcombine.low %v2826_v46, %v2829_v14  ;;  %v1409_v53 = vrot.slane %v1407_v60, 5  ;;  %v2582_v38 = vsel %vm4980_vm12, %v2577_v33, %v2581_v54  ;;  %v6251_v54 = vpop.permute.xlu0 %3325 }
 0x153   : > { %v1417_v16 = vshll.u32 %v1079_v32, 16  ;;  %v1632_v59 = vrot.slane %v1079_v32, 5  ;;  %v1404_v52 = vor.u32 %v1403_v22, %v1400_v10  ;;  %v4478_v62 = vrot.slane %v2700_v28, 9  ;;  %v6264_v28 = vpop.permute.xlu1 %3247 }
 0x154   : > { %v2592_v56 = vsel %vm4980_vm12, %v2587_v37, %v2591_v13  ;;  %3589 = vrot.lane.b32.xlu0 %v4621_v34, %s4847_s8  ;;  %v2832_v45 = vrot.slane %v2280_v24, 5  ;;  %v1413_v9 = vrot.slane %v1411_v3, 4  ;;  %v2835_v44 = vrot.slane %v6222_v63, 5 }
 0x155   : > { %v4606_v46 = vcombine.low %v2582_v38, %v2592_v56  ;;  %v1419_v6 = vrot.slane %v1417_v16, 5  ;;  %v1405_v27 = vrot.slane %v1404_v52, 4  ;;  %v4448_v13 = vrot.slane %v1482_v41, 9  ;;  %v6278_v16 = vld [vmem:[#allocation2 + $0xa0] sm:$0xf] }
 0x156   : > { %v2833_v42 = vsel %vm4917_vm8, %v4478_v62, %v2832_v45  ;;  %v2834_v15 = vrot.slane %v2832_v45, 4  ;;  %v1414_v32 = vor.u32 %v1413_v9, %v1409_v53  ;;  %v1629_v47 = vrot.slane %v1061_v2, 5  ;;  %v6281_v56 = vpop.permute.xlu0 %3421  ;;  %v347_v45 = vld [vmem:[#allocation2 + $0xb0] sm:$0x1] }
 0x157   : > { %3511 = vrot.lane.b32.xlu1 %v4606_v46, %s4849_s10  ;;  %v1622_v24 = vrot.slane %v6183_v5, 5  ;;  %v495_v60 = vmax.f32 %v6142_v20, 0.0  ;;  %v1410_v63 = vsel %vm4980_vm12, %v1405_v27, %v1409_v53  ;;  %v496_v14 = vmax.f32 %v6147_v11, 0.0  ;;  %v6287_v46 = vld [vmem:[#allocation2 + $0xa4] sm:$0x1]  ;;  %v6292_v48 = vpop.permute.xlu1 %3327 }
 0x158   : > { %v2836_v33 = vsel %vm4917_vm8, %v2834_v15, %v2835_v44  ;;  %v1985_v10 = vshrl.u32 %v6249_v23, 16  ;;  %v1415_v37 = vrot.slane %v1414_v32, 4  ;;  %v1630_v2 = vsel %vm4917_vm8, %v4448_v13, %v1629_v47 }
 0x159   : > { %v4622_v34 = vcombine.low %v2833_v42, %v2836_v33  ;;  %v1631_v5 = vrot.slane %v1629_v47, 4  ;;  %v1623_v20 = vsel %vm4917_vm8, %v4447_v58, %v1622_v24  ;;  %v1624_v22 = vrot.slane %v1622_v24, 4  ;;  %v1013_v42 = vld [vmem:[#allocation2 + $0xa8] sm:$0xf] }
 0x15a   : > { %v4676_v53 = vpack.c.bf16 %v495_v60, %v495_v60  ;;  %v4677_v38 = vpack.c.bf16 %v496_v14, %v496_v14  ;;  %v1420_v11 = vsel %vm4980_vm12, %v1415_v37, %v1419_v6  ;;  %v1987_v41 = vrot.slane %v1985_v10, 4 }
 0x15b   : > { %3001 = vrot.lane.b32.xlu1 %v4511_v21, %s4843_s29  ;;  %3591 = vrot.lane.b32.xlu0 %v4622_v34, %s4847_s8  ;;  %v1633_v3 = vsel %vm4917_vm8, %v1631_v5, %v1632_v59  ;;  %v1988_v19 = vshll.u32 %v6249_v23, 16  ;;  %v4512_v58 = vcombine.low %v1410_v63, %v1420_v11  ;;  %v1626_v21 = vsel %vm4917_vm8, %v1624_v22, %v1625_v40  ;;  %v2092_v63 = vld [vmem:[#allocation2 + $0x9c] sm:$0xe]  ;;  %v387_v22 = vld [vmem:[%s4926_s23 + $0xe0] sm:$0xff] }
 0x15c   : > { %v4528_v52 = vcombine.low %v1630_v2, %v1633_v3  ;;  %v821_v62 = vshrl.u32 %v4676_v53, 16  ;;  %v4527_v9 = vcombine.low %v1623_v20, %v1626_v21  ;;  %v824_v59 = vshll.u32 %v4676_v53, 16  ;;  %v294_v20 = vld [vmem:[#allocation2 + $0xb4] sm:$0x1]  ;;  %v6304_v53 = vpop.permute.xlu0 %3501 }
 0x15d   : > { %v829_v6 = vshrl.u32 %v4677_v38, 16  ;;  %v832_v44 = vshll.u32 %v4677_v38, 16  ;;  %v1990_v15 = vrot.slane %v1988_v19, 5  ;;  %v1998_v13 = vshrl.u32 %v6278_v16, 16  ;;  %v388_v19 = vld [vmem:[%s4926_s23 + $0xe8] sm:$0xff] }
 0x15e   : > { %v823_v27 = vrot.slane %v821_v62, 7  ;;  %v4543_v32 = vcombine.low %v6249_v23, %v6278_v16  ;;  %v348_v47 = vsel %vm4908_vm7, 0, %v347_v45  ;;  %v1994_v24 = vshll.u32 %v6278_v16, 16  ;;  %v350_v62 = vld [vmem:[#allocation2 + $0xbc] sm:$0x1] }
 0x15f   : > { %3003 = vrot.lane.b32.xlu1 %v4512_v58, %s4843_s29  ;;  %3081 = vrot.lane.b32.xlu0 %v4527_v9, %s4842_s28  ;;  %v831_v40 = vrot.slane %v829_v6, 7  ;;  %v2004_v60 = vshll.u32 %v6287_v46, 16  ;;  %349 = vst [vmem:[#allocation2 + $0xb0] sm:$0x1] %v348_v47  ;;  %v1991_v23 = vor.u32 %v1990_v15, %v1987_v41  ;;  %v2000_v10 = vrot.slane %v1998_v13, 4 }
 0x160   : > { %v826_v33 = vor.u32 %v824_v59, %v823_v27  ;;  %v827_v14 = vrot.slane %v823_v27, 4  ;;  %v1996_v34 = vrot.slane %v1994_v24, 5  ;;  %v3860_v5 = vsel %vm3848_vm11, %v6150_v17, %v6168_v39  ;;  %v6361_v13 = vpop.permute.xlu0 %3581 }
 0x161   : > { %v834_v37 = vor.u32 %v832_v44, %v831_v40  ;;  %v2006_v2 = vrot.slane %v2004_v60, 5  ;;  %v1992_v11 = vrot.slane %v1991_v23, 4  ;;  %v3858_v3 = vsel %vm3848_vm11, %v6153_v43, %v6144_v30 }
 0x162   : > { %v1014_v38 = vsel %vm4988_vm13, %v826_v33, %v1013_v42  ;;  %v4463_v41 = vrot.slane %v2092_v63, 9  ;;  %v2001_v17 = vor.u32 %v2000_v10, %v1996_v34  ;;  %v2230_v39 = vrot.slane %v6278_v16, 5  ;;  %4715 = vmatprep.mubr.msk.bf16.mxu0 %vm3901_vm6, %v3858_v3  ;;  %v6330_v16 = vld [vmem:[%s6905_s1] ss:$0 sm:$0xff] }
 0x163   : > { %3083 = vrot.lane.b32.xlu1 %v4528_v52, %s4842_s28  ;;  %v835_v58 = vsel %vm4997_vm14, %v827_v14, %v834_v37  ;;  %1015 = vst [vmem:[#allocation2 + $0xa8] sm:$0xf] %v1014_v38  ;;  %3177 = vrot.lane.b32.xlu0 %v4543_v32, %s4844_s30  ;;  %v2233_v21 = vrot.slane %v6287_v46, 5  ;;  %v836_v45 = vrot.slane %v831_v40, 4  ;;  %v3625_v30 = vsel %vm3601_vm15, %v4490_v55, %v6203_v4  ;;  %v6333_v46 = vpop.permute.xlu1 %3423  ;;  %v6349_v55 = vld [vmem:[%s6906_s2] ss:$0 sm:$0xff] }
 0x164   : > { %1016 = vst.msk [vmem:[#allocation2 + $0xac] sm:$0xf] %vm237_vm0, %v835_v58  ;;  %v295_v43 = vsel %vm4896_vm3, 0, %v294_v20  ;;  %v426_v52 = vmul.f32 %v6330_v16, %v387_v22  ;;  %v1997_v9 = vsel %vm4980_vm12, %v1992_v11, %v1996_v34  ;;  %v2002_v59 = vrot.slane %v2001_v17, 4  ;;  %4716 = vmatmul.mubr.msk.bf16.gmra.mrb[8].mxu0 %vm3901_vm6, %v3860_v5  ;;  %v297_v42 = vld [vmem:[#allocation2 + $0xc0] sm:$0x1] }
 0x165   : > { %v2232_v6 = vrot.slane %v2230_v39, 4  ;;  %296 = vst [vmem:[#allocation2 + $0xb4] sm:$0x1] %v295_v43  ;;  %v427_v4 = vmul.f32 %v6330_v16, %v388_v19  ;;  %v3622_v36 = vsel %vm3601_vm15, %v4489_v26, %v6174_v0  ;;  %v2231_v35 = vsel %vm4917_vm8, %v4463_v41, %v2230_v39 }
 0x166   : > { %v465_v44 = vadd.f32 %v6349_v55, %v426_v52  ;;  %v351_v27 = vsel %vm4908_vm7, 0, %v350_v62  ;;  %v1017_v15 = vld [vmem:[#allocation2 + $0xb0] sm:$0x1]  ;;  %v2007_v29 = vsel %vm4980_vm12, %v2002_v59, %v2006_v2  ;;  %v3666_v0 = vsel %vm3650_vm1, %v3625_v30, %v6229_v51 }
 0x167   : > { %v2234_v18 = vsel %vm4917_vm8, %v2232_v6, %v2233_v21  ;;  %v466_v26 = vadd.f32 %v6349_v55, %v427_v4  ;;  %352 = vst [vmem:[#allocation2 + $0xbc] sm:$0x1] %v351_v27  ;;  %v1018_v32 = vsel %vm4896_vm3, %v836_v45, %v1017_v15  ;;  %v4559_v40 = vcombine.low %v1997_v9, %v2007_v29 }
 0x168   : > { %v497_v47 = vmax.f32 %v465_v44, 0.0  ;;  %v3664_v24 = vsel %vm3650_vm1, %v3622_v36, %v6194_v50  ;;  %1019 = vst [vmem:[#allocation2 + $0xb0] sm:$0x1] %v1018_v32  ;;  %v3699_v63 = vsel %vm3683_vm2, %v3666_v0, %v6241_v61  ;;  %v298_v51 = vsel %vm4896_vm3, 0, %v297_v42  ;;  %v6382_v61 = vpop.permute.xlu1 %3503 }
 0x169   : > { %v498_v60 = vmax.f32 %v466_v26, 0.0  ;;  %v3697_v33 = vsel %vm3683_vm2, %v3664_v24, %v6216_v49  ;;  %3257 = vrot.lane.b32.xlu0 %v4559_v40, %s4848_s9  ;;  %v4575_v10 = vcombine.low %v2231_v35, %v2234_v18  ;;  %v6376_v50 = vsel %vm3716_vm4, %v3699_v63, %v6264_v28  ;;  %299 = vst [vmem:[#allocation2 + $0xc0] sm:$0x1] %v298_v51 }
 0x16a   : > { %v1674_v14 = vld [vmem:[#allocation2 + $0xa8] sm:$0xf]  ;;  %v4678_v37 = vpack.c.bf16 %v497_v47, %v497_v47  ;;  %v6380_v34 = vsel %vm3716_vm4, %v3697_v33, %v6235_v57  ;;  %v6386_v57 = vpop.permute.xlu0 %3583 }
 0x16b   : > { %v2093_v23 = vld [vmem:[#allocation2 + $0xa8] sm:$0xe]  ;;  %v1675_v49 = vld [vmem:[#allocation2 + $0xac] sm:$0xf]  ;;  %v2009_v2 = vshrl.u32 %v1674_v14, 16  ;;  %v2012_v5 = vshll.u32 %v1674_v14, 16  ;;  %v4679_v22 = vpack.c.bf16 %v498_v60, %v498_v60 }
 0x16c   : > { %v4464_v20 = vrot.slane %v2093_v23, 9  ;;  %v2022_v38 = vshrl.u32 %v1675_v49, 16  ;;  %v4544_v11 = vcombine.low %v1674_v14, %v1675_v49  ;;  %v2018_v3 = vshll.u32 %v1675_v49, 16  ;;  %v2281_v19 = vld [vmem:[#allocation2 + $0xa8] sm:$0xf]  ;;  %v6395_v15 = vpop.permute.xlu1 %2993 }
 0x16d   : > { %v2237_v41 = vrot.slane %v1675_v49, 5  ;;  %v2011_v58 = vrot.slane %v2009_v2, 4  ;;  %v2014_v28 = vrot.slane %v2012_v5, 5  ;;  %v838_v17 = vshrl.u32 %v4678_v37, 16  ;;  %v6384_v21 = vld [vmem:[#allocation2 + $0xac] sm:$0xf]  ;;  %3337 = vrot.lane.b32.xlu0 %v4575_v10, %s4846_s7 }
 0x16e   : > { %v841_v39 = vshll.u32 %v4678_v37, 16  ;;  %3179 = vrot.lane.b32.xlu1 %v4544_v11, %s4844_s30  ;;  %v2020_v62 = vrot.slane %v2018_v3, 5  ;;  %v2024_v45 = vrot.slane %v2022_v38, 4  ;;  %v846_v59 = vshrl.u32 %v4679_v22, 16  ;;  %v1020_v4 = vld [vmem:[#allocation2 + $0xb4] sm:$0xf]  ;;  %v6403_v23 = vpop.permute.xlu0 %3073 }
 0x16f   : > { %v6391_v30 = vsel %vm4917_vm8, %v4464_v20, %v2237_v41  ;;  %v2239_v43 = vrot.slane %v2237_v41, 4  ;;  %v2015_v52 = vor.u32 %v2014_v28, %v2011_v58  ;;  %v840_v9 = vrot.slane %v838_v17, 7  ;;  %v1693_v36 = vld [vmem:[#allocation2 + $0xb0] sm:$0x1]  ;;  %v1024_v14 = vld [vmem:[#allocation2 + $0xbc] sm:$0x1] }
 0x170   : > { %v849_v6 = vshll.u32 %v4679_v22, 16  ;;  %v2025_v35 = vor.u32 %v2024_v45, %v2020_v62  ;;  %v2594_v44 = vshrl.u32 %v2281_v19, 16  ;;  %v2597_v27 = vshll.u32 %v2281_v19, 16  ;;  %v6406_v5 = vld [vmem:[#allocation2 + $0xb0] sm:$0x1]  ;;  %v6422_v45 = vpop.permute.xlu1 %2995 }
 0x171   : > { %v2607_v42 = vshrl.u32 %v6384_v21, 16  ;;  %v2016_v29 = vrot.slane %v2015_v52, 4  ;;  %v2028_v18 = vshll.u32 %v1693_v36, 16  ;;  %v2240_v26 = vrot.slane %v1693_v36, 5  ;;  %v6408_v20 = vld [vmem:[#allocation2 + $0xa8] sm:$0xf] }
 0x172   : > { %v843_v0 = vor.u32 %v841_v39, %v840_v9  ;;  %v2026_v32 = vrot.slane %v2025_v35, 4  ;;  %v844_v40 = vrot.slane %v840_v9, 4  ;;  %v848_v47 = vrot.slane %v846_v59, 7  ;;  %v6414_v41 = vld [vmem:[#allocation2 + $0xac] sm:$0xf]  ;;  %v389_v9 = vld [vmem:[%s4926_s23 + $0xf0] sm:$0xff] }
 0x173   : > { %v2596_v24 = vrot.slane %v2594_v44, 4  ;;  %v2021_v60 = vsel %vm4980_vm12, %v2016_v29, %v2020_v62  ;;  %v2030_v63 = vrot.slane %v2028_v18, 5  ;;  %v2241_v33 = vsel %vm4917_vm8, %v2239_v43, %v2240_v26  ;;  %v6416_v58 = vld [vmem:[#allocation2 + $0xb0] sm:$0x1]  ;;  %v2701_v35 = vld [vmem:[#allocation2 + $0xa8] sm:$0xe]  ;;  %v6434_v18 = vpop.permute.xlu0 %3169 }
 0x174   : > { %v1021_v51 = vsel %vm4988_vm13, %v843_v0, %v1020_v4  ;;  %v4576_v10 = vcombine.low %v6391_v30, %v2241_v33  ;;  %v851_v37 = vor.u32 %v849_v6, %v848_v47  ;;  %v853_v49 = vrot.slane %v848_v47, 4 }
 0x175   : > { %1022 = vst [vmem:[#allocation2 + $0xb4] sm:$0xf] %v1021_v51  ;;  %v2599_v2 = vrot.slane %v2597_v27, 5  ;;  %v2031_v22 = vsel %vm4980_vm12, %v2026_v32, %v2030_v63  ;;  %v4591_v38 = vcombine.low %v2281_v19, %v6384_v21  ;;  %v2603_v11 = vshll.u32 %v6384_v21, 16 }
 0x176   : > { %v2609_v3 = vrot.slane %v2607_v42, 4  ;;  %v4560_v28 = vcombine.low %v2021_v60, %v2031_v22  ;;  %v852_v17 = vsel %vm4997_vm14, %v844_v40, %v851_v37  ;;  %v1025_v39 = vsel %vm4896_vm3, %v853_v49, %v1024_v14 }
 0x177   : > { %v2600_v62 = vor.u32 %v2599_v2, %v2596_v24  ;;  %1023 = vst.msk [vmem:[#allocation2 + $0xb8] sm:$0xf] %vm237_vm0, %v852_v17  ;;  %3433 = vrot.lane.b32.xlu0 %v4591_v38, %s4845_s6  ;;  %1026 = vst [vmem:[#allocation2 + $0xbc] sm:$0x1] %v1025_v39  ;;  %v2605_v19 = vrot.slane %v2603_v11, 5  ;;  %v2613_v30 = vshll.u32 %v6406_v5, 16  ;;  %v6439_v40 = vmul.f32 %v6330_v16, %v389_v9  ;;  %v6444_v2 = vpop.permute.xlu1 %3075  ;;  %v6455_v9 = vpop.permute.xlu0 %3249 }
 0x178   : > { %v1422_v43 = vshrl.u32 %v6408_v20, 16  ;;  %v1425_v52 = vshll.u32 %v6408_v20, 16  ;;  %3259 = vrot.lane.b32.xlu1 %v4560_v28, %s4848_s9  ;;  %v1431_v6 = vshll.u32 %v6414_v41, 16  ;;  %v1435_v4 = vshrl.u32 %v6414_v41, 16 }
 0x179   : > { %v2601_v59 = vrot.slane %v2600_v62, 4  ;;  %v1441_v36 = vshll.u32 %v6416_v58, 16  ;;  %v2610_v44 = vor.u32 %v2609_v3, %v2605_v19  ;;  %v2615_v27 = vrot.slane %v2613_v30, 5 }
 0x17a   : > { %v1424_v42 = vrot.slane %v1422_v43, 4  ;;  %v1427_v29 = vrot.slane %v1425_v52, 5  ;;  %v1433_v0 = vrot.slane %v1431_v6, 5  ;;  %v1437_v32 = vrot.slane %v1435_v4, 4 }
 0x17b   : > { %v2606_v26 = vsel %vm4980_vm12, %v2601_v59, %v2605_v19  ;;  %v2611_v24 = vrot.slane %v2610_v44, 4  ;;  %v4479_v63 = vrot.slane %v2701_v35, 9  ;;  %v2839_v33 = vrot.slane %v6384_v21, 5 }
 0x17c   : > { %v2283_v47 = vld [vmem:[#allocation2 + $0xb4] sm:$0xf]  ;;  %v1428_v60 = vor.u32 %v1427_v29, %v1424_v42  ;;  %3339 = vrot.lane.b32.xlu1 %v4576_v10, %s4846_s7  ;;  %v1438_v37 = vor.u32 %v1437_v32, %v1433_v0  ;;  %v2842_v49 = vrot.slane %v6406_v5, 5  ;;  %v1443_v11 = vrot.slane %v1441_v36, 5 }
 0x17d   : > { %v2618_v51 = vshrl.u32 %v2283_v47, 16  ;;  %v2621_v14 = vshll.u32 %v2283_v47, 16  ;;  %v2616_v22 = vsel %vm4980_vm12, %v2611_v24, %v2615_v27  ;;  %v2841_v3 = vrot.slane %v2839_v33, 4  ;;  %v6453_v52 = vld [vmem:[#allocation2 + $0xb4] sm:$0xf] }
 0x17e   : > { %v1429_v38 = vrot.slane %v1428_v60, 4  ;;  %v2284_v28 = vld [vmem:[#allocation2 + $0xb8] sm:$0xf]  ;;  %v6448_v62 = vld [vmem:[#allocation2 + $0xbc] sm:$0x1]  ;;  %v4607_v21 = vcombine.low %v2606_v26, %v2616_v22  ;;  %v2840_v10 = vsel %vm4917_vm8, %v4479_v63, %v2839_v33  ;;  %v1439_v4 = vrot.slane %v1438_v37, 4  ;;  %v6469_v63 = vpop.permute.xlu1 %3171 }
 0x17f   : > { %v2620_v17 = vrot.slane %v2618_v51, 4  ;;  %v2623_v39 = vrot.slane %v2621_v14, 5  ;;  %v2631_v19 = vshrl.u32 %v2284_v28, 16  ;;  %v4592_v30 = vcombine.low %v2283_v47, %v2284_v28  ;;  %v6462_v35 = vld [vmem:[#allocation2 + $0xb8] sm:$0xf] }
 0x180   : > { %v2627_v5 = vshll.u32 %v2284_v28, 16  ;;  %v2637_v43 = vshll.u32 %v6448_v62, 16  ;;  %3513 = vrot.lane.b32.xlu0 %v4607_v21, %s4849_s10  ;;  %v1434_v6 = vsel %vm4980_vm12, %v1429_v38, %v1433_v0  ;;  %v2843_v36 = vsel %vm4917_vm8, %v2841_v3, %v2842_v49  ;;  %v1081_v26 = vld [vmem:[#allocation2 + $0xbc] sm:$0x1]  ;;  %v2702_v60 = vld [vmem:[#allocation2 + $0xb4] sm:$0xe] }
 0x181   : > { %v2624_v59 = vor.u32 %v2623_v39, %v2620_v17  ;;  %3435 = vrot.lane.b32.xlu1 %v4592_v30, %s4845_s6  ;;  %v2633_v27 = vrot.slane %v2631_v19, 4  ;;  %v4623_v29 = vcombine.low %v2840_v10, %v2843_v36  ;;  %v1444_v47 = vsel %vm4980_vm12, %v1439_v4, %v1443_v11  ;;  %v1484_v3 = vld [vmem:[#allocation2 + $0xb4] sm:$0xe]  ;;  %v6476_v19 = vpop.permute.xlu0 %3329 }
 0x182   : > { %v2629_v44 = vrot.slane %v2627_v5, 5  ;;  %v2639_v42 = vrot.slane %v2637_v43, 5  ;;  %v1446_v24 = vshrl.u32 %v6453_v52, 16  ;;  %v1449_v0 = vshll.u32 %v6453_v52, 16 }
 0x183   : > { %v2625_v32 = vrot.slane %v2624_v59, 4  ;;  %v4513_v51 = vcombine.low %v1434_v6, %v1444_v47  ;;  %v1455_v14 = vshll.u32 %v6462_v35, 16  ;;  %v1459_v37 = vshrl.u32 %v6462_v35, 16 }
 0x184   : > { %v2634_v33 = vor.u32 %v2633_v27, %v2629_v44  ;;  %3593 = vrot.lane.b32.xlu0 %v4623_v29, %s4847_s8  ;;  %v1448_v22 = vrot.slane %v1446_v24, 4  ;;  %v1451_v38 = vrot.slane %v1449_v0, 5  ;;  %v1465_v11 = vshll.u32 %v1081_v26, 16  ;;  %v1483_v27 = vld [vmem:[#allocation2 + $0xa8] sm:$0xe]  ;;  %v6484_v0 = vpop.permute.xlu1 %3251 }
 0x185   : > { %v2630_v49 = vsel %vm4980_vm12, %v2625_v32, %v2629_v44  ;;  %v1457_v39 = vrot.slane %v1455_v14, 5  ;;  %v1461_v21 = vrot.slane %v1459_v37, 4  ;;  %v4480_v10 = vrot.slane %v2702_v60, 9 }
 0x186   : > { %v2635_v17 = vrot.slane %v2634_v33, 4  ;;  %v1452_v30 = vor.u32 %v1451_v38, %v1448_v22  ;;  %v1467_v5 = vrot.slane %v1465_v11, 5  ;;  %v2846_v43 = vrot.slane %v2284_v28, 5  ;;  %v390_v22 = vld [vmem:[%s4926_s23 + $0xf8] sm:$0xff] }
 0x187   : > { %v2849_v59 = vrot.slane %v6448_v62, 5  ;;  %v1462_v4 = vor.u32 %v1461_v21, %v1457_v39  ;;  %v4450_v36 = vrot.slane %v1484_v3, 9  ;;  %v1643_v44 = vrot.slane %v6462_v35, 5  ;;  %v6502_v21 = vld [vmem:[#allocation2 + $0xb8] sm:$0xf] }
 0x188   : > { %v2640_v6 = vsel %vm4980_vm12, %v2635_v17, %v2639_v42  ;;  %v1453_v32 = vrot.slane %v1452_v30, 4  ;;  %v2847_v47 = vsel %vm4917_vm8, %v4480_v10, %v2846_v43  ;;  %v2848_v24 = vrot.slane %v2846_v43, 4  ;;  %v1676_v17 = vld [vmem:[#allocation2 + $0xb4] sm:$0xf] }
 0x189   : > { %v4608_v29 = vcombine.low %v2630_v49, %v2640_v6  ;;  %v1463_v28 = vrot.slane %v1462_v4, 4  ;;  %v6488_v62 = vsel %vm4917_vm8, %v4450_v36, %v1643_v44  ;;  %v1645_v42 = vrot.slane %v1643_v44, 4  ;;  %v353_v36 = vld [vmem:[#allocation2 + $0xc8] sm:$0x1]  ;;  %v6523_v44 = vpop.permute.xlu1 %3331 }
 0x18a   : > { %v1646_v60 = vrot.slane %v1081_v26, 5  ;;  %v1458_v33 = vsel %vm4980_vm12, %v1453_v32, %v1457_v39  ;;  %v2850_v14 = vsel %vm4917_vm8, %v2848_v24, %v2849_v59  ;;  %v4449_v37 = vrot.slane %v1483_v27, 9  ;;  %v6504_v39 = vpop.permute.xlu0 %3425 }
 0x18b   : > { %3515 = vrot.lane.b32.xlu1 %v4608_v29, %s4849_s10  ;;  %v1636_v49 = vrot.slane %v6414_v41, 5  ;;  %v1468_v38 = vsel %vm4980_vm12, %v1463_v28, %v1467_v5  ;;  %v4624_v11 = vcombine.low %v2847_v47, %v2850_v14  ;;  %v1639_v26 = vrot.slane %v6416_v58, 5 }
 0x18c   : > { %v1647_v3 = vsel %vm4917_vm8, %v1645_v42, %v1646_v60  ;;  %v3765_v10 = vsel %vm3749_vm5, %v6376_v50, %v6292_v48  ;;  %v3763_v30 = vsel %vm3749_vm5, %v6380_v34, %v6251_v54  ;;  %v4514_v59 = vcombine.low %v1458_v33, %v1468_v38 }
 0x18d   : > { %v1637_v5 = vsel %vm4917_vm8, %v4449_v37, %v1636_v49  ;;  %v1638_v43 = vrot.slane %v1636_v49, 4  ;;  %3595 = vrot.lane.b32.xlu0 %v4624_v11, %s4847_s8  ;;  %v4530_v58 = vcombine.low %v6488_v62, %v1647_v3  ;;  %v429_v6 = vmul.f32 %v6330_v16, %v390_v22  ;;  %v2094_v3 = vld [vmem:[#allocation2 + $0xb4] sm:$0xe] }
 0x18e   : > { %v467_v4 = vadd.f32 %v6349_v55, %v6439_v40  ;;  %v2033_v54 = vshrl.u32 %v1676_v17, 16  ;;  %v2036_v50 = vshll.u32 %v1676_v17, 16  ;;  %v2046_v34 = vshrl.u32 %v6502_v21, 16  ;;  %v6528_v40 = vld [vmem:[#allocation2 + $0xbc] sm:$0x1] }
 0x18f   : > { %3005 = vrot.lane.b32.xlu1 %v4513_v51, %s4843_s29  ;;  %v1640_v48 = vsel %vm4917_vm8, %v1638_v43, %v1639_v26  ;;  %v3798_v29 = vsel %vm3782_vm9, %v3765_v10, %v6333_v46  ;;  %v468_v16 = vadd.f32 %v6349_v55, %v429_v6  ;;  %v3796_v51 = vsel %vm3782_vm9, %v3763_v30, %v6281_v56  ;;  %v6537_v55 = vpop.permute.xlu0 %3505 }
 0x190   : > { %v4529_v27 = vcombine.low %v1637_v5, %v1640_v48  ;;  %v499_v32 = vmax.f32 %v467_v4, 0.0  ;;  %v2035_v47 = vrot.slane %v2033_v54, 4  ;;  %v2038_v24 = vrot.slane %v2036_v50, 5  ;;  %v6547_v5 = vpop.permute.xlu1 %3427  ;;  %v1027_v4 = vld [vmem:[#allocation2 + $0xc0] sm:$0xf] }
 0x191   : > { %v4545_v28 = vcombine.low %v1676_v17, %v6502_v21  ;;  %v500_v62 = vmax.f32 %v468_v16, 0.0  ;;  %v354_v60 = vsel %vm4908_vm7, 0, %v353_v36  ;;  %v2042_v46 = vshll.u32 %v6502_v21, 16 }
 0x192   : > { %3085 = vrot.lane.b32.xlu0 %v4529_v27, %s4842_s28  ;;  %v4680_v42 = vpack.c.bf16 %v499_v32, %v499_v32  ;;  %v3829_v56 = vsel %vm3815_vm10, %v3796_v51, %v6304_v53  ;;  %355 = vst [vmem:[#allocation2 + $0xc8] sm:$0x1] %v354_v60  ;;  %v2039_v33 = vor.u32 %v2038_v24, %v2035_v47  ;;  %v2048_v14 = vrot.slane %v2046_v34, 4  ;;  %v4821_v51 = vld [vmem:[#allocation2 + $0x6c] sm:$0xf] }
 0x193   : > { %3007 = vrot.lane.b32.xlu1 %v4514_v59, %s4843_s29  ;;  %v2052_v37 = vshll.u32 %v6528_v40, 16  ;;  %v4681_v49 = vpack.c.bf16 %v500_v62, %v500_v62  ;;  %v2044_v11 = vrot.slane %v2042_v46, 5  ;;  %v3831_v26 = vsel %vm3815_vm10, %v3798_v29, %v6382_v61  ;;  %v300_v29 = vld [vmem:[#allocation2 + $0xcc] sm:$0x1]  ;;  %v6556_v16 = vpop.permute.xlu0 %3585  ;;  %v4822_v47 = vld [vmem:[#allocation2 + $0x70] sm:$0xf]  ;;  %s6725_s29 = scalar_lea.vmem %s6908_s4, %s4648_s20 }
 0x194   : > { %v855_v22 = vshrl.u32 %v4680_v42, 16  ;;  %v858_v38 = vshll.u32 %v4680_v42, 16  ;;  %v2040_v17 = vrot.slane %v2039_v33, 4  ;;  %v3862_v30 = vsel %vm3848_vm11, %v3829_v56, %v6361_v13  ;;  %v6566_v56 = vld [vmem:[#allocation2 + $0xd0] sm:$0xf]  ;;  %s4400_s20 = sshll.u32 %s6926_s19, 1 }
 0x195   : > { %v2054_v10 = vrot.slane %v2052_v37, 5  ;;  %v863_v43 = vshrl.u32 %v4681_v49, 16  ;;  %v866_v59 = vshll.u32 %v4681_v49, 16  ;;  %v2049_v6 = vor.u32 %v2048_v14, %v2044_v11  ;;  %4719 = vmatprep.mubr.msk.bf16.mxu0 %vm3901_vm6, %v3862_v30  ;;  %v6573_v37 = vpop.permute.xlu1 %3507 }
 0x196   : > { %v857_v53 = vrot.slane %v855_v22, 7  ;;  %3181 = vrot.lane.b32.xlu0 %v4545_v28, %s4844_s30  ;;  %v2045_v61 = vsel %vm4980_vm12, %v2040_v17, %v2044_v11  ;;  %v4465_v48 = vrot.slane %v2094_v3, 9  ;;  %v2244_v54 = vrot.slane %v6502_v21, 5  ;;  %v356_v21 = vld [vmem:[#allocation2 + $0xd4] sm:$0x1] }
 0x197   : > { %3087 = vrot.lane.b32.xlu1 %v4530_v58, %s4842_s28  ;;  %v2247_v13 = vrot.slane %v6528_v40, 5  ;;  %v865_v36 = vrot.slane %v863_v43, 7  ;;  %v2050_v27 = vrot.slane %v2049_v6, 4  ;;  %v4492_v24 = vcombine.low %v4821_v51, %v4822_v47  ;;  %v4823_v22 = vld [vmem:[#allocation2 + $0x60] sm:$0xf] }
 0x198   : > { %v860_v50 = vor.u32 %v858_v38, %v857_v53  ;;  %v861_v34 = vrot.slane %v857_v53, 4  ;;  %v2245_v32 = vsel %vm4917_vm8, %v4465_v48, %v2244_v54  ;;  %v2246_v58 = vrot.slane %v2244_v54, 4  ;;  %v4824_v38 = vld [vmem:[#allocation2 + $0x64] sm:$0xf] }
 0x199   : > { %v3864_v28 = vsel %vm3848_vm11, %v3831_v26, %v6386_v57  ;;  %v868_v62 = vor.u32 %v866_v59, %v865_v36  ;;  %v870_v40 = vrot.slane %v865_v36, 4  ;;  %v1031_v60 = vld [vmem:[#allocation2 + $0xc8] sm:$0x1]  ;;  %v2055_v46 = vsel %vm4980_vm12, %v2050_v27, %v2054_v10  ;;  %v6587_v10 = vpop.permute.xlu0 %3587  ;;  %v6601_v6 = vpop.permute.xlu1 %2997 }
 0x19a   : > { %v1028_v42 = vsel %vm4988_vm13, %v860_v50, %v1027_v4  ;;  %4720 = vmatmul.mubr.msk.bf16.gmra.mrb[12].mxu0 %vm3901_vm6, %v3864_v28  ;;  %v4561_v33 = vcombine.low %v2045_v61, %v2055_v46  ;;  %v2248_v14 = vsel %vm4917_vm8, %v2246_v58, %v2247_v13  ;;  %v301_v57 = vsel %vm4896_vm3, 0, %v300_v29 }
 0x19b   : > { %1029 = vst [vmem:[#allocation2 + $0xc0] sm:$0xf] %v1028_v42  ;;  %v869_v25 = vsel %vm4997_vm14, %v861_v34, %v868_v62  ;;  %v1032_v49 = vsel %vm4896_vm3, %v870_v40, %v1031_v60  ;;  %v4491_v11 = vcombine.low %v4823_v22, %v4824_v38  ;;  %v3631_v3 = vsel %vm3601_vm15, %v4492_v24, %v6422_v45 }
 0x19c   : > { %302 = vst [vmem:[#allocation2 + $0xcc] sm:$0x1] %v301_v57  ;;  %1030 = vst.msk [vmem:[#allocation2 + $0xc4] sm:$0xf] %vm237_vm0, %v869_v25  ;;  %3261 = vrot.lane.b32.xlu0 %v4561_v33, %s4848_s9  ;;  %v4577_v26 = vcombine.low %v2245_v32, %v2248_v14  ;;  %v2679_v17 = vshrl.u32 %v6566_v56, 16  ;;  %v357_v31 = vsel %vm4908_vm7, 0, %v356_v21  ;;  %v3670_v30 = vsel %vm3650_vm1, %v3631_v3, %v6444_v2 }
 0x19d   : > { %1033 = vst [vmem:[#allocation2 + $0xc8] sm:$0x1] %v1032_v49  ;;  %v2675_v1 = vshll.u32 %v6566_v56, 16  ;;  %358 = vst [vmem:[#allocation2 + $0xd4] sm:$0x1] %v357_v31  ;;  %v3628_v45 = vsel %vm3601_vm15, %v4491_v11, %v6395_v15  ;;  %v2860_v59 = vrot.slane %v6566_v56, 5  ;;  %v3703_v15 = vsel %vm3683_vm2, %v3670_v30, %v6469_v63  ;;  %v6617_v58 = vpop.permute.xlu0 %3077  ;;  %v6624_v33 = vpop.permute.xlu1 %2999 }
 0x19e   : > { %v3668_v53 = vsel %vm3650_vm1, %v3628_v45, %v6403_v23  ;;  %v6598_v8 = vrot.slane %v2679_v17, 4  ;;  %v3736_v34 = vsel %vm3716_vm4, %v3703_v15, %v6484_v0  ;;  %vm4301_vm0 = vcmask 1040384  }
 0x19f   : > { %v6596_v43 = vrot.slane %v2675_v1, 5  ;;  %v3701_v2 = vsel %vm3683_vm2, %v3668_v53, %v6434_v18  ;;  %v3769_v18 = vsel %vm3749_vm5, %v3736_v34, %v6523_v44  ;;  %vm4303_vm3 = vcmask 25600  }
 0x1a0   : > { %3341 = vrot.lane.b32.xlu0 %v4577_v26, %s4846_s7  ;;  %v3734_v63 = vsel %vm3716_vm4, %v3701_v2, %v6455_v9  ;;  %v3802_v15 = vsel %vm3782_vm9, %v3769_v18, %v6547_v5 }
 0x1a1   : > { %v3767_v42 = vsel %vm3749_vm5, %v3734_v63, %v6476_v19  ;;  %v2682_v1 = vor.u32 %v6598_v8, %v6596_v43  ;;  %v6632_v30 = vpop.permute.xlu0 %3173  ;;  %v3835_v18 = vsel %vm3815_vm10, %v3802_v15, %v6573_v37 }
 0x1a2   : > { %v1678_v4 = vld [vmem:[#allocation2 + $0xc0] sm:$0xf]  ;;  %v3800_v63 = vsel %vm3782_vm9, %v3767_v42, %v6504_v39 }
 0x1a3   : > { %v2095_v61 = vld [vmem:[#allocation2 + $0xc0] sm:$0xe]  ;;  %v2057_v54 = vshrl.u32 %v1678_v4, 16  ;;  %v2060_v13 = vshll.u32 %v1678_v4, 16  ;;  %v6607_v23 = vld [vmem:[#allocation2 + $0xcc] sm:$0xf] }
 0x1a4   : > { %v2285_v48 = vld [vmem:[#allocation2 + $0xc0] sm:$0xf]  ;;  %v1679_v36 = vld [vmem:[#allocation2 + $0xc4] sm:$0xf]  ;;  %v1695_v27 = vld [vmem:[#allocation2 + $0xc8] sm:$0x1] }
 0x1a5   : > { %v2642_v50 = vshrl.u32 %v2285_v48, 16  ;;  %v2666_v29 = vshrl.u32 %v6607_v23, 16  ;;  %v2669_v32 = vshll.u32 %v6607_v23, 16  ;;  %v2059_v51 = vrot.slane %v2057_v54, 4  ;;  %v6619_v40 = vld [vmem:[#allocation2 + $0xc4] sm:$0xf] }
 0x1a6   : > { %v2062_v47 = vrot.slane %v2060_v13, 5  ;;  %v2070_v24 = vshrl.u32 %v1679_v36, 16  ;;  %v4546_v28 = vcombine.low %v1678_v4, %v1679_v36  ;;  %v2066_v21 = vshll.u32 %v1679_v36, 16  ;;  %v6628_v31 = vld [vmem:[#allocation2 + $0xd4] sm:$0x1] }
 0x1a7   : > { %v2076_v0 = vshll.u32 %v1695_v27, 16  ;;  %v2251_v62 = vrot.slane %v1679_v36, 5  ;;  %v4466_v46 = vrot.slane %v2095_v61, 9  ;;  %v2254_v44 = vrot.slane %v1695_v27, 5  ;;  %v2303_v45 = vld [vmem:[#allocation2 + $0xc8] sm:$0x1] }
 0x1a8   : > { %3183 = vrot.lane.b32.xlu1 %v4546_v28, %s4844_s30  ;;  %v2063_v9 = vor.u32 %v2062_v47, %v2059_v51  ;;  %v2072_v60 = vrot.slane %v2070_v24, 4  ;;  %v2068_v14 = vrot.slane %v2066_v21, 5  ;;  %v2668_v25 = vrot.slane %v2666_v29, 4  ;;  %v2703_v27 = vld [vmem:[#allocation2 + $0xc0] sm:$0xe]  ;;  %v6645_v29 = vpop.permute.xlu1 %3079 }
 0x1a9   : > { %v2253_v57 = vrot.slane %v2251_v62, 4  ;;  %v2671_v49 = vrot.slane %v2669_v32, 5  ;;  %v2644_v38 = vrot.slane %v2642_v50, 4  ;;  %v2645_v11 = vshll.u32 %v2285_v48, 16 }
 0x1aa   : > { %v2064_v22 = vrot.slane %v2063_v9, 4  ;;  %v2655_v3 = vshrl.u32 %v6619_v40, 16  ;;  %v2073_v26 = vor.u32 %v2072_v60, %v2068_v14  ;;  %v2078_v17 = vrot.slane %v2076_v0, 5  ;;  %v3254_v60 = vpop.permute.xlu0 %3253 }
 0x1ab   : > { %v4593_v19 = vcombine.low %v2285_v48, %v6619_v40  ;;  %v2252_v53 = vsel %vm4917_vm8, %v4466_v46, %v2251_v62  ;;  %v2255_v4 = vsel %vm4917_vm8, %v2253_v57, %v2254_v44  ;;  %v2647_v61 = vrot.slane %v2645_v11, 5 }
 0x1ac   : > { %v2069_v48 = vsel %vm4980_vm12, %v2064_v22, %v2068_v14  ;;  %v2074_v2 = vrot.slane %v2073_v26, 4  ;;  %v2672_v8 = vor.u32 %v2671_v49, %v2668_v25  ;;  %v2651_v54 = vshll.u32 %v6619_v40, 16  ;;  %v2704_v14 = vld [vmem:[#allocation2 + $0xcc] sm:$0xe] }
 0x1ad   : > { %3437 = vrot.lane.b32.xlu0 %v4593_v19, %s4845_s6  ;;  %v2685_v13 = vshll.u32 %v6628_v31, 16  ;;  %v2648_v50 = vor.u32 %v2647_v61, %v2644_v38  ;;  %v2657_v34 = vrot.slane %v2655_v3, 4  ;;  %v2661_v36 = vshll.u32 %v2303_v45, 16 }
 0x1ae   : > { %v2079_v5 = vsel %vm4980_vm12, %v2074_v2, %v2078_v17  ;;  %v2653_v32 = vrot.slane %v2651_v54, 5  ;;  %v4578_v47 = vcombine.low %v2252_v53, %v2255_v4  ;;  %v3833_v28 = vsel %vm3815_vm10, %v3800_v63, %v6537_v55  ;;  %v3176_v22 = vpop.permute.xlu1 %3175  ;;  %v3334_v53 = vpop.permute.xlu0 %3333  ;;  %v4825_v2 = vld [vmem:[#allocation2 + $0x78] sm:$0xf] }
 0x1af   : > { %v4562_v51 = vcombine.low %v2069_v48, %v2079_v5  ;;  %v2649_v24 = vrot.slane %v2648_v50, 4  ;;  %v2683_v21 = vrot.slane %v2682_v1, 4  ;;  %v2663_v62 = vrot.slane %v2661_v36, 5  ;;  %v4827_v50 = vld [vmem:[#allocation2 + $0x84] sm:$0xf] }
 0x1b0   : > { %v2658_v0 = vor.u32 %v2657_v34, %v2653_v32  ;;  %v4481_v9 = vrot.slane %v2703_v27, 9  ;;  %v2673_v46 = vrot.slane %v2672_v8, 4  ;;  %v2687_v44 = vrot.slane %v2685_v13, 5  ;;  %v4826_v8 = vld [vmem:[#allocation2 + $0x7c] sm:$0xf] }
 0x1b1   : > { %3263 = vrot.lane.b32.xlu1 %v4562_v51, %s4848_s9  ;;  %v2853_v39 = vrot.slane %v6619_v40, 5  ;;  %v2856_v42 = vrot.slane %v2303_v45, 5  ;;  %v2654_v37 = vsel %vm4980_vm12, %v2649_v24, %v2653_v32  ;;  %v3866_v55 = vsel %vm3848_vm11, %v3833_v28, %v6556_v16 }
 0x1b2   : > { %v2659_v57 = vrot.slane %v2658_v0, 4  ;;  %v3868_v25 = vsel %vm3848_vm11, %v3835_v18, %v6587_v10  ;;  %4723 = vmatprep.mubr.msk.bf16.mxu1 %vm3901_vm6, %v3866_v55  ;;  %v4482_v11 = vrot.slane %v2704_v14, 9  ;;  %v2862_v40 = vrot.slane %v2860_v59, 4  ;;  %v4829_v55 = vld [vmem:[#allocation2 + $0x90] sm:$0xf] }
 0x1b3   : > { %v2855_v49 = vrot.slane %v2853_v39, 4  ;;  %v2854_v3 = vsel %vm4917_vm8, %v4481_v9, %v2853_v39  ;;  %4724 = vmatmul.mubr.msk.bf16.vlgmr.msra.gmra.mrb[0].mxu1 %vm3901_vm6, %v3868_v25  ;;  %v4594_v16 = vcombine.low %v6607_v23, %v6566_v56  ;;  %v4497_v17 = vcombine.low %v6408_v20, %v6414_v41  ;;  %v4830_v25 = vld [vmem:[#allocation2 + $0x94] sm:$0xf] }
 0x1b4   : > { %v2664_v38 = vsel %vm4980_vm12, %v2659_v57, %v2663_v62  ;;  %v2678_v19 = vsel %vm4980_vm12, %v2673_v46, %v6596_v43  ;;  %v2688_v1 = vsel %vm4980_vm12, %v2683_v21, %v2687_v44  ;;  %v2863_v45 = vrot.slane %v6628_v31, 5 }
 0x1b5   : > { %3343 = vrot.lane.b32.xlu1 %v4578_v47, %s4846_s7  ;;  %v4609_v10 = vcombine.low %v2654_v37, %v2664_v38  ;;  %v2857_v26 = vsel %vm4917_vm8, %v2855_v49, %v2856_v42  ;;  %v4498_v23 = vcombine.low %v6453_v52, %v6462_v35  ;;  %v4610_v61 = vcombine.low %v2678_v19, %v2688_v1  ;;  %s235_s7 = scalar_lea.vmem %s6909_s5, %s4400_s20 }
 0x1b6   : > { %v4625_v4 = vcombine.low %v2854_v3, %v2857_v26  ;;  %v2861_v43 = vsel %vm4917_vm8, %v4482_v11, %v2860_v59  ;;  %v2864_v7 = vsel %vm4917_vm8, %v2862_v40, %v2863_v45  ;;  %v3430_v31 = vpop.permute.xlu0 %3429  ;;  %v4493_v54 = vcombine.low %v4825_v2, %v4826_v8  ;;  %v4828_v59 = vld [vmem:[#allocation2 + $0x88] sm:$0xf] }
 0x1b7   : > { %3517 = vrot.lane.b32.xlu0 %v4609_v10, %s4849_s10  ;;  %v3256_v15 = vpop.permute.xlu1 %3255  ;;  %v4626_v48 = vcombine.low %v2861_v43, %v2864_v7  ;;  %v4494_v34 = vcombine.low %v4827_v50, %v4828_v59  ;;  %v4495_v49 = vcombine.low %v4829_v55, %v4830_v25 }
 0x1b8   : > { %v3634_v56 = vsel %vm3601_vm15, %v4493_v54, %v6601_v6  ;;  %v4831_v54 = vld [vmem:[#allocation2 + $0x9c] sm:$0xf] }
 0x1b9   : > { %3439 = vrot.lane.b32.xlu1 %v4594_v16, %s4845_s6  ;;  %v3672_v12 = vsel %vm3650_vm1, %v3634_v56, %v6617_v58  ;;  %v3637_v18 = vsel %vm3601_vm15, %v4494_v34, %v6624_v33 }
 0x1ba   : > { %v3705_v27 = vsel %vm3683_vm2, %v3672_v12, %v6632_v30  ;;  %v3674_v58 = vsel %vm3650_vm1, %v3637_v18, %v6645_v29 }
 0x1bb   : > { %3597 = vrot.lane.b32.xlu0 %v4625_v4, %s4847_s8  ;;  %v3336_v13 = vpop.permute.xlu1 %3335  ;;  %v3738_v5 = vsel %vm3716_vm4, %v3705_v27, %v3254_v60  ;;  %v3707_v30 = vsel %vm3683_vm2, %v3674_v58, %v3176_v22 }
 0x1bc   : > { %v3771_v32 = vsel %vm3749_vm5, %v3738_v5, %v3334_v53  ;;  %v3740_v28 = vsel %vm3716_vm4, %v3707_v30, %v3256_v15 }
 0x1bd   : > { %3519 = vrot.lane.b32.xlu1 %v4610_v61, %s4849_s10  ;;  %v3804_v6 = vsel %vm3782_vm9, %v3771_v32, %v3430_v31  ;;  %v3773_v0 = vsel %vm3749_vm5, %v3740_v28, %v3336_v13  ;;  %v4832_v13 = vld [vmem:[#allocation2 + $0xa0] sm:$0xf] }
 0x1be   : > { %v4496_v56 = vcombine.low %v4831_v54, %v4832_v13 }
 0x1bf   : > { %v3432_v63 = vpop.permute.xlu1 %3431 }
 0x1c0   : > { %v3806_v33 = vsel %vm3782_vm9, %v3773_v0, %v3432_v63 }
 0x1c1   : > { %3599 = vrot.lane.b32.xlu1 %v4626_v48, %s4847_s8  ;;  %v3510_v36 = vpop.permute.xlu0 %3509 }
 0x1c2   : > { %v3837_v51 = vsel %vm3815_vm10, %v3804_v6, %v3510_v36 }
 0x1c6   : > { %v3590_v47 = vpop.permute.xlu0 %3589 }
 0x1c7   : > { %v3870_v24 = vsel %vm3848_vm11, %v3837_v51, %v3590_v47 }
 0x1c8   : > { %4727 = vmatprep.mubr.msk.bf16.mxu1 %vm3901_vm6, %v3870_v24 }
 0x1c9   : > { %v3512_v21 = vpop.permute.xlu1 %3511 }
 0x1ca   : > { %v3839_v62 = vsel %vm3815_vm10, %v3806_v33, %v3512_v21 }
 0x1cd   : > { %v3592_v9 = vpop.permute.xlu0 %3591  ;;  %v3002_v29 = vpop.permute.xlu1 %3001 }
 0x1ce   : > { %v3872_v60 = vsel %vm3848_vm11, %v3839_v62, %v3592_v9  ;;  %v3640_v3 = vsel %vm3601_vm15, %v4495_v49, %v3002_v29 }
 0x1cf   : > { %4728 = vmatmul.mubr.msk.bf16.gmra.mrb[4].mxu1 %vm3901_vm6, %v3872_v60 }
 0x1d1   : > { %v3082_v46 = vpop.permute.xlu0 %3081  ;;  %v3004_v44 = vpop.permute.xlu1 %3003 }
 0x1d2   : > { %v3676_v26 = vsel %vm3650_vm1, %v3640_v3, %v3082_v46  ;;  %v3643_v24 = vsel %vm3601_vm15, %v4496_v56, %v3004_v44 }
 0x1d5   : > { %v3178_v14 = vpop.permute.xlu0 %3177  ;;  %v3084_v39 = vpop.permute.xlu1 %3083 }
 0x1d6   : > { %v3709_v15 = vsel %vm3683_vm2, %v3676_v26, %v3178_v14  ;;  %v3678_v28 = vsel %vm3650_vm1, %v3643_v24, %v3084_v39 }
 0x1db   : > { %v3258_v42 = vpop.permute.xlu0 %3257 }
 0x1dc   : > { %v3742_v50 = vsel %vm3716_vm4, %v3709_v15, %v3258_v42 }
 0x1df   : > { %v3338_v57 = vpop.permute.xlu0 %3337 }
 0x1e0   : > { %v3180_v37 = vpop.permute.xlu1 %3179  ;;  %v3775_v12 = vsel %vm3749_vm5, %v3742_v50, %v3338_v57 }
 0x1e1   : > { %v3711_v21 = vsel %vm3683_vm2, %v3678_v28, %v3180_v37 }
 0x1e9   : > { %v3434_v38 = vpop.permute.xlu0 %3433 }
 0x1ea   : > { %v3260_v22 = vpop.permute.xlu1 %3259  ;;  %v3808_v5 = vsel %vm3782_vm9, %v3775_v12, %v3434_v38 }
 0x1eb   : > { %v3744_v0 = vsel %vm3716_vm4, %v3711_v21, %v3260_v22 }
 0x1ec   : > { %v4709_v11 = vpop.f32.mrb[0].mxu0 }
 0x1ed   : > { %4101 = vst.msk [vmem:[%s6725_s29 + $0x10] sm:$0xff] %vm3601_vm15, %v4709_v11  ;;  %v3972_v40 = vpop.f32.mrb[1].mxu0  ;;  %v4202_v45 = vmul.f32 %v4709_v11, %v4709_v11  ;;  %v4134_v31 = vsel %vm3601_vm15, %v4709_v11, 0.0 }
 0x1ee   : > { %4099 = vst.msk [vmem:[%s6725_s29] sm:$0xff] %vm3601_vm15, %v3972_v40  ;;  %v4200_v16 = vmul.f32 %v3972_v40, %v3972_v40  ;;  %v4710_v10 = vpop.f32.mrb[2].mxu0  ;;  %v3340_v1 = vpop.permute.xlu1 %3339  ;;  %v4131_v53 = vsel %vm3601_vm15, %v3972_v40, 0.0 }
 0x1ef   : > { %4102 = vst.msk [vmem:[%s6725_s29 + $0x18] sm:$0xff] %vm3601_vm15, %v4710_v10  ;;  %v3975_v19 = vpop.f32.mrb[3].mxu0  ;;  %v4203_v2 = vmul.f32 %v4710_v10, %v4710_v10  ;;  %v4235_v36 = vsel %vm3601_vm15, %v4202_v45, 0.0  ;;  %v4136_v27 = vsel %vm3601_vm15, %v4710_v10, 0.0  ;;  %v3777_v62 = vsel %vm3749_vm5, %v3744_v0, %v3340_v1 }
 0x1f0   : > { %4100 = vst.msk [vmem:[%s6725_s29 + $0x8] sm:$0xff] %vm3601_vm15, %v3975_v19  ;;  %v4132_v4 = vsel %vm3601_vm15, %v3975_v19, 0.0  ;;  %v4201_v61 = vmul.f32 %v3975_v19, %v3975_v19  ;;  %v4232_v48 = vsel %vm3601_vm15, %v4200_v16, 0.0 }
 0x1f1   : > { %v4133_v43 = vadd.f32 %v4132_v4, %v4131_v53  ;;  %v4237_v47 = vsel %vm3601_vm15, %v4203_v2, 0.0 }
 0x1f2   : > { %v3514_v7 = vpop.permute.xlu0 %3513  ;;  %v4233_v8 = vsel %vm3601_vm15, %v4201_v61, 0.0 }
 0x1f3   : > { %v4135_v59 = vadd.f32 %v4134_v31, %v4133_v43  ;;  %v4234_v34 = vadd.f32 %v4233_v8, %v4232_v48  ;;  %v3436_v18 = vpop.permute.xlu1 %3435  ;;  %v3841_v6 = vsel %vm3815_vm10, %v3808_v5, %v3514_v7 }
 0x1f4   : > { %v3810_v9 = vsel %vm3782_vm9, %v3777_v62, %v3436_v18 }
 0x1f5   : > { %v4236_v32 = vadd.f32 %v4235_v36, %v4234_v34  ;;  %v4137_v63 = vadd.f32 %v4136_v27, %v4135_v59 }
 0x1f6   : > { %v3594_v51 = vpop.permute.xlu0 %3593 }
 0x1f7   : > { %v3874_v58 = vsel %vm3848_vm11, %v3841_v6, %v3594_v51  ;;  %v4238_v30 = vadd.f32 %v4237_v47, %v4236_v32 }
 0x1f8   : > { %4731 = vmatprep.mubr.msk.bf16.mxu1 %vm3901_vm6, %v3874_v58 }
 0x1fd   : > { %v3516_v33 = vpop.permute.xlu1 %3515 }
 0x1fe   : > { %v3843_v60 = vsel %vm3815_vm10, %v3810_v9, %v3516_v33 }
 0x1ff   : > { %v3596_v29 = vpop.permute.xlu0 %3595 }
 0x200   : > { %v3876_v46 = vsel %vm3848_vm11, %v3843_v60, %v3596_v29 }
 0x201   : > { %4732 = vmatmul.mubr.msk.bf16.gmra.mrb[8].mxu1 %vm3901_vm6, %v3876_v46  ;;  %v4713_v44 = vpop.f32.mrb[4].mxu0  ;;  %v3006_v1 = vpop.permute.xlu1 %3005 }
 0x202   : > { %4105 = vst.msk [vmem:[%s6725_s29 + $0x30] sm:$0xff] %vm3601_vm15, %v4713_v44  ;;  %v3988_v14 = vpop.f32.mrb[5].mxu0  ;;  %v4206_v25 = vmul.f32 %v4713_v44, %v4713_v44  ;;  %v4142_v3 = vsel %vm3601_vm15, %v4713_v44, 0.0  ;;  %v3646_v59 = vsel %vm3601_vm15, %v4497_v17, %v3006_v1 }
 0x203   : > { %4103 = vst.msk [vmem:[%s6725_s29 + $0x20] sm:$0xff] %vm3601_vm15, %v3988_v14  ;;  %v4138_v39 = vsel %vm3601_vm15, %v3988_v14, 0.0  ;;  %v4204_v42 = vmul.f32 %v3988_v14, %v3988_v14  ;;  %v4714_v37 = vpop.f32.mrb[6].mxu0 }
 0x204   : > { %v4139_v57 = vadd.f32 %v4138_v39, %v4137_v63  ;;  %4106 = vst.msk [vmem:[%s6725_s29 + $0x38] sm:$0xff] %vm3601_vm15, %v4714_v37  ;;  %v3991_v55 = vpop.f32.mrb[7].mxu0  ;;  %v4207_v16 = vmul.f32 %v4714_v37, %v4714_v37  ;;  %v3086_v45 = vpop.permute.xlu0 %3085  ;;  %v4243_v53 = vsel %vm3601_vm15, %v4206_v25, 0.0  ;;  %v4144_v4 = vsel %vm3601_vm15, %v4714_v37, 0.0 }
 0x205   : > { %v4239_v49 = vsel %vm3601_vm15, %v4204_v42, 0.0  ;;  %4104 = vst.msk [vmem:[%s6725_s29 + $0x28] sm:$0xff] %vm3601_vm15, %v3991_v55  ;;  %v4140_v22 = vsel %vm3601_vm15, %v3991_v55, 0.0  ;;  %v4205_v38 = vmul.f32 %v3991_v55, %v3991_v55  ;;  %v3008_v31 = vpop.permute.xlu1 %3007  ;;  %v3680_v12 = vsel %vm3650_vm1, %v3646_v59, %v3086_v45 }
 0x206   : > { %v4240_v11 = vadd.f32 %v4239_v49, %v4238_v30  ;;  %v4141_v40 = vadd.f32 %v4140_v22, %v4139_v57  ;;  %v4245_v43 = vsel %vm3601_vm15, %v4207_v16, 0.0  ;;  %v3649_v32 = vsel %vm3601_vm15, %v4498_v23, %v3008_v31 }
 0x207   : > { %v4241_v10 = vsel %vm3601_vm15, %v4205_v38, 0.0 }
 0x208   : > { %v4143_v26 = vadd.f32 %v4142_v3, %v4141_v40  ;;  %v4242_v19 = vadd.f32 %v4241_v10, %v4240_v11  ;;  %v3182_v48 = vpop.permute.xlu0 %3181 }
 0x209   : > { %v3088_v2 = vpop.permute.xlu1 %3087  ;;  %v3713_v36 = vsel %vm3683_vm2, %v3680_v12, %v3182_v48 }
 0x20a   : > { %v4244_v61 = vadd.f32 %v4243_v53, %v4242_v19  ;;  %v4145_v15 = vadd.f32 %v4144_v4, %v4143_v26  ;;  %v3682_v6 = vsel %vm3650_vm1, %v3649_v32, %v3088_v2 }
 0x20c   : > { %v4246_v7 = vadd.f32 %v4245_v43, %v4244_v61 }
 0x20e   : > { %v3262_v8 = vpop.permute.xlu0 %3261 }
 0x20f   : > { %v3746_v5 = vsel %vm3716_vm4, %v3713_v36, %v3262_v8 }
 0x212   : > { %v3342_v13 = vpop.permute.xlu0 %3341 }
 0x213   : > { %v3779_v63 = vsel %vm3749_vm5, %v3746_v5, %v3342_v13 }
 0x21a   : > { %v3184_v54 = vpop.permute.xlu1 %3183 }
 0x21b   : > { %v3715_v47 = vsel %vm3683_vm2, %v3682_v6, %v3184_v54 }
 0x21f   : > { %v3438_v50 = vpop.permute.xlu0 %3437 }
 0x220   : > { %v3812_v20 = vsel %vm3782_vm9, %v3779_v63, %v3438_v50 }
 0x223   : > { %v3264_v56 = vpop.permute.xlu1 %3263 }
 0x224   : > { %v3748_v52 = vsel %vm3716_vm4, %v3715_v47, %v3264_v56 }
 0x227   : > { %v3344_v34 = vpop.permute.xlu1 %3343 }
 0x228   : > { %v3781_v35 = vsel %vm3749_vm5, %v3748_v52, %v3344_v34 }
 0x229   : > { %v3518_v27 = vpop.permute.xlu0 %3517 }
 0x22a   : > { %v3845_v41 = vsel %vm3815_vm10, %v3812_v20, %v3518_v27 }
 0x22b   : > { %v3440_v18 = vpop.permute.xlu1 %3439 }
 0x22c   : > { %v3814_v23 = vsel %vm3782_vm9, %v3781_v35, %v3440_v18 }
 0x22d   : > { %v3598_v17 = vpop.permute.xlu0 %3597 }
 0x22e   : > { %v3878_v51 = vsel %vm3848_vm11, %v3845_v41, %v3598_v17 }
 0x22f   : > { %v3520_v24 = vpop.permute.xlu1 %3519  ;;  %4735 = vmatprep.mubr.msk.bf16.mxu1 %vm3901_vm6, %v3878_v51 }
 0x230   : > { %v3847_v58 = vsel %vm3815_vm10, %v3814_v23, %v3520_v24 }
 0x233   : > { %v3600_v30 = vpop.permute.xlu1 %3599 }
 0x234   : > { %v3880_v28 = vsel %vm3848_vm11, %v3847_v58, %v3600_v30 }
 0x235   : > { %4736 = vmatmul.mubr.msk.bf16.gmra.mrb[12].mxu1 %vm3901_vm6, %v3880_v28 }
 0x237   : > { %v4717_v21 = vpop.f32.mrb[8].mxu0 }
 0x238   : > { %4109 = vst.msk [vmem:[%s6725_s29 + $0x50] sm:$0xff] %vm3601_vm15, %v4717_v21  ;;  %v4004_v0 = vpop.f32.mrb[9].mxu0  ;;  %v4210_v46 = vmul.f32 %v4717_v21, %v4717_v21  ;;  %v4150_v57 = vsel %vm3601_vm15, %v4717_v21, 0.0 }
 0x239   : > { %4107 = vst.msk [vmem:[%s6725_s29 + $0x40] sm:$0xff] %vm3601_vm15, %v4004_v0  ;;  %v4146_v33 = vsel %vm3601_vm15, %v4004_v0, 0.0  ;;  %v4208_v62 = vmul.f32 %v4004_v0, %v4004_v0  ;;  %v4718_v9 = vpop.f32.mrb[10].mxu0 }
 0x23a   : > { %v4147_v60 = vadd.f32 %v4146_v33, %v4145_v15  ;;  %4110 = vst.msk [vmem:[%s6725_s29 + $0x58] sm:$0xff] %vm3601_vm15, %v4718_v9  ;;  %v4007_v29 = vpop.f32.mrb[11].mxu0  ;;  %v4211_v55 = vmul.f32 %v4718_v9, %v4718_v9  ;;  %v4251_v38 = vsel %vm3601_vm15, %v4210_v46, 0.0  ;;  %v4152_v11 = vsel %vm3601_vm15, %v4718_v9, 0.0 }
 0x23b   : > { %v4247_v44 = vsel %vm3601_vm15, %v4208_v62, 0.0  ;;  %4108 = vst.msk [vmem:[%s6725_s29 + $0x48] sm:$0xff] %vm3601_vm15, %v4007_v29  ;;  %v4148_v14 = vsel %vm3601_vm15, %v4007_v29, 0.0  ;;  %v4209_v39 = vmul.f32 %v4007_v29, %v4007_v29 }
 0x23c   : > { %v4248_v42 = vadd.f32 %v4247_v44, %v4246_v7  ;;  %v4149_v37 = vadd.f32 %v4148_v14, %v4147_v60  ;;  %v4253_v16 = vsel %vm3601_vm15, %v4211_v55, 0.0 }
 0x23d   : > { %v4249_v25 = vsel %vm3601_vm15, %v4209_v39, 0.0 }
 0x23e   : > { %v4151_v49 = vadd.f32 %v4150_v57, %v4149_v37  ;;  %v4250_v22 = vadd.f32 %v4249_v25, %v4248_v42 }
 0x240   : > { %v4252_v40 = vadd.f32 %v4251_v38, %v4250_v22  ;;  %v4153_v3 = vadd.f32 %v4152_v11, %v4151_v49 }
 0x242   : > { %v4254_v10 = vadd.f32 %v4253_v16, %v4252_v40 }
 0x26d   : > { %v4721_v26 = vpop.f32.mrb[12].mxu0 }
 0x26e   : > { %4113 = vst.msk [vmem:[%s6725_s29 + $0x70] sm:$0xff] %vm3601_vm15, %v4721_v26  ;;  %v4020_v19 = vpop.f32.mrb[13].mxu0  ;;  %v4214_v15 = vmul.f32 %v4721_v26, %v4721_v26  ;;  %v4158_v8 = vsel %vm3601_vm15, %v4721_v26, 0.0 }
 0x26f   : > { %4111 = vst.msk [vmem:[%s6725_s29 + $0x60] sm:$0xff] %vm3601_vm15, %v4020_v19  ;;  %v4154_v1 = vsel %vm3601_vm15, %v4020_v19, 0.0  ;;  %v4212_v45 = vmul.f32 %v4020_v19, %v4020_v19  ;;  %v4722_v53 = vpop.f32.mrb[14].mxu0 }
 0x270   : > { %v4155_v4 = vadd.f32 %v4154_v1, %v4153_v3  ;;  %4114 = vst.msk [vmem:[%s6725_s29 + $0x78] sm:$0xff] %vm3601_vm15, %v4722_v53  ;;  %v4023_v61 = vpop.f32.mrb[15].mxu0  ;;  %v4215_v54 = vmul.f32 %v4722_v53, %v4722_v53  ;;  %v4259_v59 = vsel %vm3601_vm15, %v4214_v15, 0.0  ;;  %v4160_v34 = vsel %vm3601_vm15, %v4722_v53, 0.0 }
 0x271   : > { %v4255_v43 = vsel %vm3601_vm15, %v4212_v45, 0.0  ;;  %4112 = vst.msk [vmem:[%s6725_s29 + $0x68] sm:$0xff] %vm3601_vm15, %v4023_v61  ;;  %v4156_v7 = vsel %vm3601_vm15, %v4023_v61, 0.0  ;;  %v4213_v31 = vmul.f32 %v4023_v61, %v4023_v61 }
 0x272   : > { %v4256_v48 = vadd.f32 %v4255_v43, %v4254_v10  ;;  %v4157_v2 = vadd.f32 %v4156_v7, %v4155_v4  ;;  %v4261_v27 = vsel %vm3601_vm15, %v4215_v54, 0.0 }
 0x273   : > { %v4257_v13 = vsel %vm3601_vm15, %v4213_v31, 0.0 }
 0x274   : > { %v4159_v56 = vadd.f32 %v4158_v8, %v4157_v2  ;;  %v4258_v50 = vadd.f32 %v4257_v13, %v4256_v48 }
 0x276   : > { %v4260_v12 = vadd.f32 %v4259_v59, %v4258_v50  ;;  %v4161_v36 = vadd.f32 %v4160_v34, %v4159_v56 }
 0x278   : > { %v4262_v5 = vadd.f32 %v4261_v27, %v4260_v12 }
 0x286   : > { %v4725_v32 = vpop.f32.mrb[0].mxu1 }
 0x287   : > { %4117 = vst.msk [vmem:[%s6725_s29 + $0x90] sm:$0xff] %vm3601_vm15, %v4725_v32  ;;  %v4036_v63 = vpop.f32.mrb[1].mxu1  ;;  %v4218_v51 = vmul.f32 %v4725_v32, %v4725_v32  ;;  %v4166_v58 = vsel %vm3601_vm15, %v4725_v32, 0.0 }
 0x288   : > { %4115 = vst.msk [vmem:[%s6725_s29 + $0x80] sm:$0xff] %vm3601_vm15, %v4036_v63  ;;  %v4162_v18 = vsel %vm3601_vm15, %v4036_v63, 0.0  ;;  %v4216_v20 = vmul.f32 %v4036_v63, %v4036_v63  ;;  %v4726_v41 = vpop.f32.mrb[2].mxu1 }
 0x289   : > { %v4163_v17 = vadd.f32 %v4162_v18, %v4161_v36  ;;  %4118 = vst.msk [vmem:[%s6725_s29 + $0x98] sm:$0xff] %vm3601_vm15, %v4726_v41  ;;  %v4039_v6 = vpop.f32.mrb[3].mxu1  ;;  %v4219_v30 = vmul.f32 %v4726_v41, %v4726_v41  ;;  %v4267_v33 = vsel %vm3601_vm15, %v4218_v51, 0.0  ;;  %v4168_v62 = vsel %vm3601_vm15, %v4726_v41, 0.0 }
 0x28a   : > { %v4263_v47 = vsel %vm3601_vm15, %v4216_v20, 0.0  ;;  %4116 = vst.msk [vmem:[%s6725_s29 + $0x88] sm:$0xff] %vm3601_vm15, %v4039_v6  ;;  %v4164_v24 = vsel %vm3601_vm15, %v4039_v6, 0.0  ;;  %v4217_v52 = vmul.f32 %v4039_v6, %v4039_v6 }
 0x28b   : > { %v4264_v35 = vadd.f32 %v4263_v47, %v4262_v5  ;;  %v4165_v23 = vadd.f32 %v4164_v24, %v4163_v17  ;;  %v4269_v29 = vsel %vm3601_vm15, %v4219_v30, 0.0 }
 0x28c   : > { %v4265_v28 = vsel %vm3601_vm15, %v4217_v52, 0.0 }
 0x28d   : > { %v4167_v21 = vadd.f32 %v4166_v58, %v4165_v23  ;;  %v4266_v0 = vadd.f32 %v4265_v28, %v4264_v35 }
 0x28f   : > { %v4268_v9 = vadd.f32 %v4267_v33, %v4266_v0  ;;  %v4169_v60 = vadd.f32 %v4168_v62, %v4167_v21 }
 0x291   : > { %v4270_v46 = vadd.f32 %v4269_v29, %v4268_v9 }
 0x2a2   : > { %v4729_v44 = vpop.f32.mrb[4].mxu1 }
 0x2a3   : > { %4121 = vst.msk [vmem:[%s6725_s29 + $0xb0] sm:$0xff] %vm3601_vm15, %v4729_v44  ;;  %v4052_v14 = vpop.f32.mrb[5].mxu1  ;;  %v4222_v25 = vmul.f32 %v4729_v44, %v4729_v44  ;;  %v4174_v3 = vsel %vm3601_vm15, %v4729_v44, 0.0 }
 0x2a4   : > { %4119 = vst.msk [vmem:[%s6725_s29 + $0xa0] sm:$0xff] %vm3601_vm15, %v4052_v14  ;;  %v4170_v39 = vsel %vm3601_vm15, %v4052_v14, 0.0  ;;  %v4220_v42 = vmul.f32 %v4052_v14, %v4052_v14  ;;  %v4730_v37 = vpop.f32.mrb[6].mxu1 }
 0x2a5   : > { %v4171_v57 = vadd.f32 %v4170_v39, %v4169_v60  ;;  %4122 = vst.msk [vmem:[%s6725_s29 + $0xb8] sm:$0xff] %vm3601_vm15, %v4730_v37  ;;  %v4055_v55 = vpop.f32.mrb[7].mxu1  ;;  %v4223_v16 = vmul.f32 %v4730_v37, %v4730_v37  ;;  %v4275_v1 = vsel %vm3601_vm15, %v4222_v25, 0.0  ;;  %v4176_v45 = vsel %vm3601_vm15, %v4730_v37, 0.0 }
 0x2a6   : > { %v4271_v49 = vsel %vm3601_vm15, %v4220_v42, 0.0  ;;  %4120 = vst.msk [vmem:[%s6725_s29 + $0xa8] sm:$0xff] %vm3601_vm15, %v4055_v55  ;;  %v4172_v22 = vsel %vm3601_vm15, %v4055_v55, 0.0  ;;  %v4221_v38 = vmul.f32 %v4055_v55, %v4055_v55 }
 0x2a7   : > { %v4272_v11 = vadd.f32 %v4271_v49, %v4270_v46  ;;  %v4173_v40 = vadd.f32 %v4172_v22, %v4171_v57  ;;  %v4277_v61 = vsel %vm3601_vm15, %v4223_v16, 0.0 }
 0x2a8   : > { %v4273_v10 = vsel %vm3601_vm15, %v4221_v38, 0.0 }
 0x2a9   : > { %v4175_v26 = vadd.f32 %v4174_v3, %v4173_v40  ;;  %v4274_v19 = vadd.f32 %v4273_v10, %v4272_v11 }
 0x2ab   : > { %v4276_v53 = vadd.f32 %v4275_v1, %v4274_v19  ;;  %v4177_v4 = vadd.f32 %v4176_v45, %v4175_v26 }
 0x2ad   : > { %v4278_v15 = vadd.f32 %v4277_v61, %v4276_v53 }
 0x2d4   : > { %v4733_v43 = vpop.f32.mrb[8].mxu1 }
 0x2d5   : > { %4125 = vst.msk [vmem:[%s6725_s29 + $0xd0] sm:$0xff] %vm3601_vm15, %v4733_v43  ;;  %v4068_v7 = vpop.f32.mrb[9].mxu1  ;;  %v4226_v13 = vmul.f32 %v4733_v43, %v4733_v43  ;;  %v4182_v36 = vsel %vm3601_vm15, %v4733_v43, 0.0 }
 0x2d6   : > { %4123 = vst.msk [vmem:[%s6725_s29 + $0xc0] sm:$0xff] %vm3601_vm15, %v4068_v7  ;;  %v4178_v31 = vsel %vm3601_vm15, %v4068_v7, 0.0  ;;  %v4224_v48 = vmul.f32 %v4068_v7, %v4068_v7  ;;  %v4734_v2 = vpop.f32.mrb[10].mxu1 }
 0x2d7   : > { %v4179_v8 = vadd.f32 %v4178_v31, %v4177_v4  ;;  %4126 = vst.msk [vmem:[%s6725_s29 + $0xd8] sm:$0xff] %vm3601_vm15, %v4734_v2  ;;  %v4071_v54 = vpop.f32.mrb[11].mxu1  ;;  %v4227_v27 = vmul.f32 %v4734_v2, %v4734_v2  ;;  %v4283_v18 = vsel %vm3601_vm15, %v4226_v13, 0.0  ;;  %v4184_v20 = vsel %vm3601_vm15, %v4734_v2, 0.0 }
 0x2d8   : > { %v4279_v56 = vsel %vm3601_vm15, %v4224_v48, 0.0  ;;  %4124 = vst.msk [vmem:[%s6725_s29 + $0xc8] sm:$0xff] %vm3601_vm15, %v4071_v54  ;;  %v4180_v50 = vsel %vm3601_vm15, %v4071_v54, 0.0  ;;  %v4225_v59 = vmul.f32 %v4071_v54, %v4071_v54 }
 0x2d9   : > { %v4280_v34 = vadd.f32 %v4279_v56, %v4278_v15  ;;  %v4181_v12 = vadd.f32 %v4180_v50, %v4179_v8  ;;  %v4285_v6 = vsel %vm3601_vm15, %v4227_v27, 0.0 }
 0x2da   : > { %v4281_v5 = vsel %vm3601_vm15, %v4225_v59, 0.0 }
 0x2db   : > { %v4183_v32 = vadd.f32 %v4182_v36, %v4181_v12  ;;  %v4282_v63 = vadd.f32 %v4281_v5, %v4280_v34 }
 0x2dd   : > { %v4284_v41 = vadd.f32 %v4283_v18, %v4282_v63  ;;  %v4185_v17 = vadd.f32 %v4184_v20, %v4183_v32 }
 0x2df   : > { %v4286_v51 = vadd.f32 %v4285_v6, %v4284_v41 }
 0x308   : > { %v4737_v47 = vpop.f32.mrb[12].mxu1 }
 0x309   : > { %4129 = vst.msk [vmem:[%s6725_s29 + $0xf0] sm:$0xff] %vm3601_vm15, %v4737_v47  ;;  %v4084_v24 = vpop.f32.mrb[13].mxu1  ;;  %v4230_v28 = vmul.f32 %v4737_v47, %v4737_v47  ;;  %v4190_v60 = vsel %vm3601_vm15, %v4737_v47, 0.0 }
 0x30a   : > { %4127 = vst.msk [vmem:[%s6725_s29 + $0xe0] sm:$0xff] %vm3601_vm15, %v4084_v24  ;;  %v4186_v52 = vsel %vm3601_vm15, %v4084_v24, 0.0  ;;  %v4228_v35 = vmul.f32 %v4084_v24, %v4084_v24  ;;  %v4738_v23 = vpop.f32.mrb[14].mxu1 }
 0x30b   : > { %v4187_v58 = vadd.f32 %v4186_v52, %v4185_v17  ;;  %4130 = vst.msk [vmem:[%s6725_s29 + $0xf8] sm:$0xff] %vm3601_vm15, %v4738_v23  ;;  %v4087_v30 = vpop.f32.mrb[15].mxu1  ;;  %v4231_v29 = vmul.f32 %v4738_v23, %v4738_v23  ;;  %v4291_v39 = vsel %vm3601_vm15, %v4230_v28, 0.0  ;;  %v4192_v42 = vsel %vm3601_vm15, %v4738_v23, 0.0 }
 0x30c   : > { %v4287_v21 = vsel %vm3601_vm15, %v4228_v35, 0.0  ;;  %4128 = vst.msk [vmem:[%s6725_s29 + $0xe8] sm:$0xff] %vm3601_vm15, %v4087_v30  ;;  %v4188_v0 = vsel %vm3601_vm15, %v4087_v30, 0.0  ;;  %v4229_v33 = vmul.f32 %v4087_v30, %v4087_v30 }
 0x30d   : > { %v4288_v62 = vadd.f32 %v4287_v21, %v4286_v51  ;;  %v4189_v9 = vadd.f32 %v4188_v0, %v4187_v58  ;;  %v4293_v55 = vsel %vm3601_vm15, %v4231_v29, 0.0 }
 0x30e   : > { %v4289_v46 = vsel %vm3601_vm15, %v4229_v33, 0.0 }
 0x30f   : > { %v4191_v44 = vadd.f32 %v4190_v60, %v4189_v9  ;;  %v4290_v14 = vadd.f32 %v4289_v46, %v4288_v62 }
 0x311   : > { %v4193_v37 = vadd.f32 %v4192_v42, %v4191_v44  ;;  %v4292_v57 = vadd.f32 %v4291_v39, %v4290_v14 }
 0x313   : > { %v4194_v25 = vrot.slane %v4193_v37, 4  ;;  %v4294_v49 = vadd.f32 %v4293_v55, %v4292_v57 }
 0x315   : > { %v4195_v22 = vadd.f32 %v4194_v25, %v4193_v37  ;;  %v4295_v38 = vrot.slane %v4294_v49, 4 }
 0x317   : > { %v4196_v11 = vrot.slane %v4195_v22, 2  ;;  %v4296_v40 = vadd.f32 %v4295_v38, %v4294_v49 }
 0x319   : > { %v4197_v3 = vadd.f32 %v4196_v11, %v4195_v22  ;;  %v4297_v16 = vrot.slane %v4296_v40, 2 }
 0x31b   : > { %v4198_v10 = vrot.slane %v4197_v3, 1  ;;  %v4298_v26 = vadd.f32 %v4297_v16, %v4296_v40 }
 0x31d   : > { %v4299_v19 = vrot.slane %v4298_v26, 1  ;;  %v4199_v1 = vadd.f32 %v4198_v10, %v4197_v3 }
 0x31f   : > { %v4300_v45 = vadd.f32 %v4299_v19, %v4298_v26 }
 0x321   : > { %v4302_v53 = vsel %vm4301_vm0, %v4199_v1, %v4300_v45 }
 0x322   : > { %4304 = vst.msk [vmem:[%s235_s7] sm:$0x3] %vm4303_vm3, %v4302_v53 }
 0x323 PF: > { %s16_s18 = sadd.s32 1, %s4839_s18  }
 0x324   : > { %p13_p4 = scmp.ge.s32.totalorder %s16_s18, 4  }
 0x326   :  { %15 = sbr.rel (!%p13_p4) target bundleno = 1 (0x1), region = 81 }

</bundles_post_ra>
